<compile_context>
chip_gen: v5e
topology: v5e:2x2
jax: 0.10.0
libtpu: 0.0.40
codegen_flags: <defaults>
</compile_context>

<pallas_src>
import functools

import jax
import jax.numpy as jnp
import numpy as np
from jax.experimental import pallas as pl
from jax.experimental.pallas import tpu as pltpu


def _convt_phase_kernel(xa_ref, xb_ref, w_ref, b_ref, o_ref):
    """One grid step = one batch element x one block of `bd` input depth planes.

    xa_ref: (1, bd, Hp, Wp, Cin)         input planes [d0, d0+bd)   (Hp=H+1, Wp=W+1)
    xb_ref: (1, 1,  Hp, Wp, Cin)         depth-halo plane d0+bd
    w_ref : (8, Cin, 8*Cout)             per-tap phase-combined weight (resident)
    b_ref : (1, 8*Cout)                  phase-replicated bias, f32 (resident)
    o_ref : (1, bd, 2, H, 2, W, 2*Cout)  phase-interleaved output block
    """
    _, bd, Hp, Wp, Cin = xa_ref.shape
    H, W = Hp - 1, Wp - 1
    HW = H * W
    Nc = w_ref.shape[-1]

    def tap_matmul(x4d, tap):
        # x4d: (n, H, W, Cin) -> (n*H*W, Nc) f32 on the MXU (K = Cin).
        rows = x4d.shape[0] * HW
        return jnp.dot(x4d.reshape(rows, Cin), w_ref[tap],
                       preferred_element_type=jnp.float32)

    # --- dd = 0 taps: input planes d0 .. d0+bd-1, entirely from xa ----------
    acc0 = None
    for dh in range(2):
        for dw in range(2):
            t = dh * 2 + dw
            r = tap_matmul(xa_ref[0, :, dh:dh + H, dw:dw + W, :], t)
            acc0 = r if acc0 is None else acc0 + r

    # --- dd = 1 taps: input planes d0+1 .. d0+bd (xa[1:] plus halo plane) ---
    # Accumulated per output-row range so no (bd+1)-plane depth concat of the
    # input block is ever materialized (perf-review item).
    acc_a = None   # output depth rows 0 .. bd-2   (input planes 1 .. bd-1)
    acc_b = None   # output depth row  bd-1        (input plane  bd, the halo)
    for dh in range(2):
        for dw in range(2):
            t = 4 + dh * 2 + dw
            rb = tap_matmul(xb_ref[0, :, dh:dh + H, dw:dw + W, :], t)
            acc_b = rb if acc_b is None else acc_b + rb
            if bd > 1:
                ra = tap_matmul(xa_ref[0, 1:bd, dh:dh + H, dw:dw + W, :], t)
                acc_a = ra if acc_a is None else acc_a + ra

    acc1 = jnp.concatenate([acc_a, acc_b], axis=0) if bd > 1 else acc_b
    acc = acc0 + acc1 + b_ref[...]                      # (bd*H*W, 8*Cout) f32

    # --- on-chip phase interleave + store (replaces the XLA pixel-shuffle) --
    # acc columns are ordered (pd, ph, pw, co); group g=(pd,ph) is a contiguous
    # 2*Cout column slice whose inner order (pw, co) is already the minor-dim
    # order of the final layout, so the store needs no lane transpose.
    C2 = Nc // 4                                        # = 2 * Cout
    for pd in range(2):
        for ph in range(2):
            g = pd * 2 + ph
            sub = acc[:, g * C2:(g + 1) * C2]
            sub = sub.reshape(bd, H, W, C2).astype(o_ref.dtype)
            o_ref[0, :, pd, :, ph, :, :] = sub


def _vmem_capacity_bytes():
    try:
        return int(pltpu.get_tpu_info().vmem_capacity_bytes)
    except Exception:
        return 64 * 1024 * 1024          # conservative (v7x-sized) fallback


def _step_vmem_bytes(bd, H, W, Cin, Cout, in_bytes, out_bytes):
    """Rough per-grid-step VMEM footprint (double-buffered pipelined blocks)."""
    Hp, Wp = H + 1, W + 1
    Nc = 8 * Cout
    M = bd * H * W
    xa = 2 * bd * Hp * Wp * Cin * in_bytes      # input block
    xb = 2 * Hp * Wp * Cin * in_bytes           # halo plane
    w = 2 * 8 * Cin * Nc * in_bytes             # resident combined weight
    b = 2 * Nc * 4                              # resident bias (f32)
    out = 2 * M * Nc * out_bytes                # output block
    acc = 3 * M * Nc * 4                        # live f32 accumulator values
    tap = 2 * M * Cin * in_bytes                # sliced tap / matmul staging
    return xa + xb + w + b + out + acc + tap


@functools.partial(
    jax.jit,
    static_argnames=("stride", "padding", "output_padding",
                     "channels_last_out", "max_bd"),
)
def conv_transpose3d(x, weight, bias, *, stride=2, padding=1, output_padding=1,
                     channels_last_out=False, max_bd=8):
    """nn.ConvTranspose3d(k=3, stride=2, padding=1, output_padding=1) forward."""
    B, Cin, D, H, W = x.shape
    _, Cout, K, _, _ = weight.shape
    # Phase decomposition below is specialized to the module's configuration.
    # TODO(synk): generalize phase decomposition to arbitrary (k, stride, pad, out_pad).
    assert (K, stride, padding, output_padding) == (3, 2, 1, 1)

    Nc = 8 * Cout
    Hp, Wp = H + 1, W + 1

    # channels-last + right-pad by one plane/row/col (x[m+1] taps of the odd
    # output phases read the pad; the last depth block's halo reads the pad plane).
    xl = jnp.transpose(x, (0, 2, 3, 4, 1))                       # (B, D, H, W, Cin)
    xp = jnp.pad(xl, ((0, 0), (0, 1), (0, 1), (0, 1), (0, 0)))   # (B, D+1, Hp, Wp, Cin)

    # Per-dim tap selection: output index 2m+p gathers x[m+d] * w[k]:
    #   p=0: (d=0,k=1)          p=1: (d=0,k=2), (d=1,k=0)
    S = np.zeros((2, 2, 3), np.float32)
    S[0, 0, 1] = 1.0
    S[1, 0, 2] = 1.0
    S[1, 1, 0] = 1.0
    S = jnp.asarray(S, dtype=weight.dtype)

    # Phase-combined weight: (dd,dh,dw,Cin, pd,ph,pw,Cout) -> (8, Cin, 8*Cout),
    # rows grouped per tap (kernel slices whole taps, no misaligned sublane
    # slices), columns ordered (pd, ph, pw, co).
    # TODO(synk): for best MXU utilization, pad Cin/Cout to multiples of
    # 32 (v6e/v7x) or 16 (v5e) here when the model's channel counts don't comply.
    w_c = jnp.einsum("adi,bej,cfk,IOijk->defIabcO", S, S, S, weight)
    w_tap = w_c.reshape(8, Cin, Nc).astype(x.dtype)

    # Bias replicated over the 8 phases (added in f32 inside the kernel).
    b_c = jnp.tile(bias.astype(jnp.float32), 8).reshape(1, Nc)

    # ---- depth block from a VMEM budget (v7x: 64 MiB, v5e/v6e: 128 MiB) ----
    in_bytes = x.dtype.itemsize
    vmem_phys = _vmem_capacity_bytes()
    vmem_cap = (7 * vmem_phys) // 8          # headroom for runtime reserves
    budget = (3 * vmem_cap) // 4             # target per-step footprint
    bd = 1
    for cand in range(1, min(D, max_bd) + 1):
        if D % cand:
            continue
        if cand > 1 and B * (D // cand) < 2:
            continue                          # keep >= 2 parallel steps (v7x: 2 TCs)
        if _step_vmem_bytes(cand, H, W, Cin, Cout, in_bytes, in_bytes) <= budget:
            bd = cand
    nDb = D // bd
    est = _step_vmem_bytes(bd, H, W, Cin, Cout, in_bytes, in_bytes)
    vmem_limit = int(min(vmem_cap, max(2 * est, budget)))

    # TODO(synk): for very large Cin*Cout (e.g. 320x320 f32) also tile the
    # 8*Cout column dimension with a third grid axis so the resident combined
    # weight + accumulator fit v7x's 64 MiB VMEM.

    out_k = pl.pallas_call(
        _convt_phase_kernel,
        out_shape=jax.ShapeDtypeStruct((B, D, 2, H, 2, W, 2 * Cout), x.dtype),
        grid_spec=pltpu.PrefetchScalarGridSpec(
            num_scalar_prefetch=0,
            grid=(B, nDb),
            in_specs=[
                # bd input depth planes for this step
                pl.BlockSpec((1, bd, Hp, Wp, Cin),
                             lambda b, db: (b, db, 0, 0, 0)),
                # depth-halo plane d0 + bd (same padded array, block depth 1)
                pl.BlockSpec((1, 1, Hp, Wp, Cin),
                             lambda b, db: (b, db * bd + bd, 0, 0, 0)),
                # resident phase-combined weight / bias (grid-invariant index
                # maps; pl.Buffered(1) would halve their VMEM residency).
                pl.BlockSpec((8, Cin, Nc), lambda b, db: (0, 0, 0)),
                pl.BlockSpec((1, Nc), lambda b, db: (0, 0)),
            ],
            # Phase-interleaved output block: minor dim (pw, co) = 2*Cout, so
            # the post-kernel pixel-shuffle disappears (free reshape below).
            out_specs=pl.BlockSpec((1, bd, 2, H, 2, W, 2 * Cout),
                                   lambda b, db: (b, db, 0, 0, 0, 0, 0)),
        ),
        compiler_params=pltpu.CompilerParams(
            dimension_semantics=("parallel", "parallel"),
            vmem_limit_bytes=vmem_limit,
        ),
    )(xp, xp, w_tap, b_c)

    # Free reshape (pure metadata): (B, D,2, H,2, W,2*Cout) -> NDHWC.
    y = out_k.reshape(B, 2 * D, 2 * H, 2 * W, Cout)
    if channels_last_out:
        return y
    # PyTorch layout parity (NCDHW).  If the consumer is channels-last, pass
    # channels_last_out=True and skip this — it is the only remaining HBM
    # round trip of the upsampled output.
    return jnp.transpose(y, (0, 4, 1, 2, 3))


def _reference(x, weight, bias, *, stride=2, padding=1, output_padding=1):
    """Independent reference via lax.conv_general_dilated (input dilation)."""
    K = weight.shape[2]
    w_oidhw = jnp.transpose(weight[:, :, ::-1, ::-1, ::-1], (1, 0, 2, 3, 4))
    p_lo = K - 1 - padding
    p_hi = K - 1 - padding + output_padding
    y = jax.lax.conv_general_dilated(
        x,
        w_oidhw,
        window_strides=(1, 1, 1),
        padding=[(p_lo, p_hi)] * 3,
        lhs_dilation=(stride,) * 3,
        dimension_numbers=("NCDHW", "OIDHW", "NCDHW"),
    )
    return y + bias.reshape(1, -1, 1, 1, 1)


if __name__ == "__main__":
    B, Cin, Cout, D, H, W = 2, 4, 8, 8, 8, 8
    K = 3

    key = jax.random.PRNGKey(0)
    kx, kw, kb = jax.random.split(key, 3)

    x = jax.random.normal(kx, (B, Cin, D, H, W), dtype=jnp.float32)
    bound = 1.0 / np.sqrt(Cin * K * K * K)
    weight = jax.random.uniform(
        kw, (Cin, Cout, K, K, K), minval=-bound, maxval=bound, dtype=jnp.float32
    )
    bias = jax.random.uniform(
        kb, (Cout,), minval=-bound, maxval=bound, dtype=jnp.float32
    )

    y_ref = jax.block_until_ready(
        _reference(x, weight, bias, stride=2, padding=1, output_padding=1)
    )

    # Default: largest depth block that fits the VMEM budget.
    y = jax.block_until_ready(
        conv_transpose3d(x, weight, bias, stride=2, padding=1, output_padding=1)
    )
    assert y.shape == (B, Cout, 2 * D, 2 * H, 2 * W), y.shape
    np.testing.assert_allclose(np.asarray(y), np.asarray(y_ref), rtol=1e-4, atol=1e-4)

    # Smaller depth block -> several grid steps; exercises the inter-block
    # depth halo path (halo plane is real data, not just the zero pad).
    y2 = jax.block_until_ready(
        conv_transpose3d(x, weight, bias, stride=2, padding=1, output_padding=1,
                         max_bd=2)
    )
    np.testing.assert_allclose(np.asarray(y2), np.asarray(y_ref), rtol=1e-4, atol=1e-4)

    print("KERNEL_OK")
</pallas_src>

<mosaic_0001>
module attributes {stable_mosaic.version = 11 : i64} {
  func.func @_convt_phase_kernel(%arg0: i32, %arg1: i32, %arg2: memref<1x8x9x9x4xf32, #tpu.memory_space<vmem>>, %arg3: memref<1x1x9x9x4xf32, #tpu.memory_space<vmem>>, %arg4: memref<8x4x64xf32, #tpu.memory_space<vmem>>, %arg5: memref<1x64xf32, #tpu.memory_space<vmem>>, %arg6: memref<1x8x2x8x2x8x16xf32, #tpu.memory_space<vmem>>) attributes {dimension_semantics = [#tpu.dimension_semantics<parallel>, #tpu.dimension_semantics<parallel>], iteration_bounds = array<i64: 2, 1>, scalar_prefetch = 0 : i64, scratch_operands = 0 : i64, tpu.core_type = #tpu.core_type<tc>, window_params = [{transform_indices = @transform_0, window_bounds = array<i64: 1, 8, 9, 9, 4>}, {transform_indices = @transform_1, window_bounds = array<i64: 1, 1, 9, 9, 4>}, {pipeline_mode = #tpu.pipeline_mode<synchronous>, transform_indices = @transform_2, window_bounds = array<i64: 8, 4, 64>}, {pipeline_mode = #tpu.pipeline_mode<synchronous>, transform_indices = @transform_3, window_bounds = array<i64: 1, 64>}, {transform_indices = @transform_4, window_bounds = array<i64: 1, 8, 2, 8, 2, 8, 16>}]} {
    %c0 = arith.constant 0 : index
    %c0_0 = arith.constant 0 : index
    %c0_1 = arith.constant 0 : index
    %c0_2 = arith.constant 0 : index
    %c0_3 = arith.constant 0 : index
    %0 = vector.load %arg2[%c0, %c0_0, %c0_1, %c0_2, %c0_3] : memref<1x8x9x9x4xf32, #tpu.memory_space<vmem>>, vector<1x8x8x8x4xf32>
    %1 = vector.shape_cast %0 : vector<1x8x8x8x4xf32> to vector<8x8x8x4xf32>
    %2 = vector.shape_cast %1 : vector<8x8x8x4xf32> to vector<512x4xf32>
    %c0_4 = arith.constant 0 : index
    %c0_5 = arith.constant 0 : index
    %c0_6 = arith.constant 0 : index
    %3 = vector.load %arg4[%c0_4, %c0_5, %c0_6] : memref<8x4x64xf32, #tpu.memory_space<vmem>>, vector<1x4x64xf32>
    %4 = vector.shape_cast %3 : vector<1x4x64xf32> to vector<4x64xf32>
    %cst = arith.constant dense<0.000000e+00> : vector<512x64xf32>
    %5 = tpu.matmul %2, %4, %cst {dimension_numbers = #tpu.dot_dimension_numbers<[1], [0], [0], [1], [0, 0, 1, 1], [], []>} : vector<512x4xf32>, vector<4x64xf32>, vector<512x64xf32> -> vector<512x64xf32>
    %c0_7 = arith.constant 0 : index
    %c0_8 = arith.constant 0 : index
    %c0_9 = arith.constant 0 : index
    %c1 = arith.constant 1 : index
    %c0_10 = arith.constant 0 : index
    %6 = vector.load %arg2[%c0_7, %c0_8, %c0_9, %c1, %c0_10] : memref<1x8x9x9x4xf32, #tpu.memory_space<vmem>>, vector<1x8x8x8x4xf32>
    %7 = vector.shape_cast %6 : vector<1x8x8x8x4xf32> to vector<8x8x8x4xf32>
    %8 = vector.shape_cast %7 : vector<8x8x8x4xf32> to vector<512x4xf32>
    %c1_11 = arith.constant 1 : index
    %c0_12 = arith.constant 0 : index
    %c0_13 = arith.constant 0 : index
    %9 = vector.load %arg4[%c1_11, %c0_12, %c0_13] : memref<8x4x64xf32, #tpu.memory_space<vmem>>, vector<1x4x64xf32>
    %10 = vector.shape_cast %9 : vector<1x4x64xf32> to vector<4x64xf32>
    %cst_14 = arith.constant dense<0.000000e+00> : vector<512x64xf32>
    %11 = tpu.matmul %8, %10, %cst_14 {dimension_numbers = #tpu.dot_dimension_numbers<[1], [0], [0], [1], [0, 0, 1, 1], [], []>} : vector<512x4xf32>, vector<4x64xf32>, vector<512x64xf32> -> vector<512x64xf32>
    %12 = arith.addf %5, %11 : vector<512x64xf32>
    %c0_15 = arith.constant 0 : index
    %c0_16 = arith.constant 0 : index
    %c1_17 = arith.constant 1 : index
    %c0_18 = arith.constant 0 : index
    %c0_19 = arith.constant 0 : index
    %13 = vector.load %arg2[%c0_15, %c0_16, %c1_17, %c0_18, %c0_19] : memref<1x8x9x9x4xf32, #tpu.memory_space<vmem>>, vector<1x8x8x8x4xf32>
    %14 = vector.shape_cast %13 : vector<1x8x8x8x4xf32> to vector<8x8x8x4xf32>
    %15 = vector.shape_cast %14 : vector<8x8x8x4xf32> to vector<512x4xf32>
    %c2 = arith.constant 2 : index
    %c0_20 = arith.constant 0 : index
    %c0_21 = arith.constant 0 : index
    %16 = vector.load %arg4[%c2, %c0_20, %c0_21] : memref<8x4x64xf32, #tpu.memory_space<vmem>>, vector<1x4x64xf32>
    %17 = vector.shape_cast %16 : vector<1x4x64xf32> to vector<4x64xf32>
    %cst_22 = arith.constant dense<0.000000e+00> : vector<512x64xf32>
    %18 = tpu.matmul %15, %17, %cst_22 {dimension_numbers = #tpu.dot_dimension_numbers<[1], [0], [0], [1], [0, 0, 1, 1], [], []>} : vector<512x4xf32>, vector<4x64xf32>, vector<512x64xf32> -> vector<512x64xf32>
    %19 = arith.addf %12, %18 : vector<512x64xf32>
    %c0_23 = arith.constant 0 : index
    %c0_24 = arith.constant 0 : index
    %c1_25 = arith.constant 1 : index
    %c1_26 = arith.constant 1 : index
    %c0_27 = arith.constant 0 : index
    %20 = vector.load %arg2[%c0_23, %c0_24, %c1_25, %c1_26, %c0_27] : memref<1x8x9x9x4xf32, #tpu.memory_space<vmem>>, vector<1x8x8x8x4xf32>
    %21 = vector.shape_cast %20 : vector<1x8x8x8x4xf32> to vector<8x8x8x4xf32>
    %22 = vector.shape_cast %21 : vector<8x8x8x4xf32> to vector<512x4xf32>
    %c3 = arith.constant 3 : index
    %c0_28 = arith.constant 0 : index
    %c0_29 = arith.constant 0 : index
    %23 = vector.load %arg4[%c3, %c0_28, %c0_29] : memref<8x4x64xf32, #tpu.memory_space<vmem>>, vector<1x4x64xf32>
    %24 = vector.shape_cast %23 : vector<1x4x64xf32> to vector<4x64xf32>
    %cst_30 = arith.constant dense<0.000000e+00> : vector<512x64xf32>
    %25 = tpu.matmul %22, %24, %cst_30 {dimension_numbers = #tpu.dot_dimension_numbers<[1], [0], [0], [1], [0, 0, 1, 1], [], []>} : vector<512x4xf32>, vector<4x64xf32>, vector<512x64xf32> -> vector<512x64xf32>
    %26 = arith.addf %19, %25 : vector<512x64xf32>
    %c0_31 = arith.constant 0 : index
    %c0_32 = arith.constant 0 : index
    %c0_33 = arith.constant 0 : index
    %c0_34 = arith.constant 0 : index
    %c0_35 = arith.constant 0 : index
    %27 = vector.load %arg3[%c0_31, %c0_32, %c0_33, %c0_34, %c0_35] : memref<1x1x9x9x4xf32, #tpu.memory_space<vmem>>, vector<1x1x8x8x4xf32>
    %28 = vector.shape_cast %27 : vector<1x1x8x8x4xf32> to vector<1x8x8x4xf32>
    %29 = vector.shape_cast %28 : vector<1x8x8x4xf32> to vector<64x4xf32>
    %c4 = arith.constant 4 : index
    %c0_36 = arith.constant 0 : index
    %c0_37 = arith.constant 0 : index
    %30 = vector.load %arg4[%c4, %c0_36, %c0_37] : memref<8x4x64xf32, #tpu.memory_space<vmem>>, vector<1x4x64xf32>
    %31 = vector.shape_cast %30 : vector<1x4x64xf32> to vector<4x64xf32>
    %cst_38 = arith.constant dense<0.000000e+00> : vector<64x64xf32>
    %32 = tpu.matmul %29, %31, %cst_38 {dimension_numbers = #tpu.dot_dimension_numbers<[1], [0], [0], [1], [0, 0, 1, 1], [], []>} : vector<64x4xf32>, vector<4x64xf32>, vector<64x64xf32> -> vector<64x64xf32>
    %c0_39 = arith.constant 0 : index
    %c1_40 = arith.constant 1 : index
    %c0_41 = arith.constant 0 : index
    %c0_42 = arith.constant 0 : index
    %c0_43 = arith.constant 0 : index
    %33 = vector.load %arg2[%c0_39, %c1_40, %c0_41, %c0_42, %c0_43] : memref<1x8x9x9x4xf32, #tpu.memory_space<vmem>>, vector<1x7x8x8x4xf32>
    %34 = vector.shape_cast %33 : vector<1x7x8x8x4xf32> to vector<7x8x8x4xf32>
    %35 = vector.shape_cast %34 : vector<7x8x8x4xf32> to vector<448x4xf32>
    %c4_44 = arith.constant 4 : index
    %c0_45 = arith.constant 0 : index
    %c0_46 = arith.constant 0 : index
    %36 = vector.load %arg4[%c4_44, %c0_45, %c0_46] : memref<8x4x64xf32, #tpu.memory_space<vmem>>, vector<1x4x64xf32>
    %37 = vector.shape_cast %36 : vector<1x4x64xf32> to vector<4x64xf32>
    %cst_47 = arith.constant dense<0.000000e+00> : vector<448x64xf32>
    %38 = tpu.matmul %35, %37, %cst_47 {dimension_numbers = #tpu.dot_dimension_numbers<[1], [0], [0], [1], [0, 0, 1, 1], [], []>} : vector<448x4xf32>, vector<4x64xf32>, vector<448x64xf32> -> vector<448x64xf32>
    %c0_48 = arith.constant 0 : index
    %c0_49 = arith.constant 0 : index
    %c0_50 = arith.constant 0 : index
    %c1_51 = arith.constant 1 : index
    %c0_52 = arith.constant 0 : index
    %39 = vector.load %arg3[%c0_48, %c0_49, %c0_50, %c1_51, %c0_52] : memref<1x1x9x9x4xf32, #tpu.memory_space<vmem>>, vector<1x1x8x8x4xf32>
    %40 = vector.shape_cast %39 : vector<1x1x8x8x4xf32> to vector<1x8x8x4xf32>
    %41 = vector.shape_cast %40 : vector<1x8x8x4xf32> to vector<64x4xf32>
    %c5 = arith.constant 5 : index
    %c0_53 = arith.constant 0 : index
    %c0_54 = arith.constant 0 : index
    %42 = vector.load %arg4[%c5, %c0_53, %c0_54] : memref<8x4x64xf32, #tpu.memory_space<vmem>>, vector<1x4x64xf32>
    %43 = vector.shape_cast %42 : vector<1x4x64xf32> to vector<4x64xf32>
    %cst_55 = arith.constant dense<0.000000e+00> : vector<64x64xf32>
    %44 = tpu.matmul %41, %43, %cst_55 {dimension_numbers = #tpu.dot_dimension_numbers<[1], [0], [0], [1], [0, 0, 1, 1], [], []>} : vector<64x4xf32>, vector<4x64xf32>, vector<64x64xf32> -> vector<64x64xf32>
    %45 = arith.addf %32, %44 : vector<64x64xf32>
    %c0_56 = arith.constant 0 : index
    %c1_57 = arith.constant 1 : index
    %c0_58 = arith.constant 0 : index
    %c1_59 = arith.constant 1 : index
    %c0_60 = arith.constant 0 : index
    %46 = vector.load %arg2[%c0_56, %c1_57, %c0_58, %c1_59, %c0_60] : memref<1x8x9x9x4xf32, #tpu.memory_space<vmem>>, vector<1x7x8x8x4xf32>
    %47 = vector.shape_cast %46 : vector<1x7x8x8x4xf32> to vector<7x8x8x4xf32>
    %48 = vector.shape_cast %47 : vector<7x8x8x4xf32> to vector<448x4xf32>
    %c5_61 = arith.constant 5 : index
    %c0_62 = arith.constant 0 : index
    %c0_63 = arith.constant 0 : index
    %49 = vector.load %arg4[%c5_61, %c0_62, %c0_63] : memref<8x4x64xf32, #tpu.memory_space<vmem>>, vector<1x4x64xf32>
    %50 = vector.shape_cast %49 : vector<1x4x64xf32> to vector<4x64xf32>
    %cst_64 = arith.constant dense<0.000000e+00> : vector<448x64xf32>
    %51 = tpu.matmul %48, %50, %cst_64 {dimension_numbers = #tpu.dot_dimension_numbers<[1], [0], [0], [1], [0, 0, 1, 1], [], []>} : vector<448x4xf32>, vector<4x64xf32>, vector<448x64xf32> -> vector<448x64xf32>
    %52 = arith.addf %38, %51 : vector<448x64xf32>
    %c0_65 = arith.constant 0 : index
    %c0_66 = arith.constant 0 : index
    %c1_67 = arith.constant 1 : index
    %c0_68 = arith.constant 0 : index
    %c0_69 = arith.constant 0 : index
    %53 = vector.load %arg3[%c0_65, %c0_66, %c1_67, %c0_68, %c0_69] : memref<1x1x9x9x4xf32, #tpu.memory_space<vmem>>, vector<1x1x8x8x4xf32>
    %54 = vector.shape_cast %53 : vector<1x1x8x8x4xf32> to vector<1x8x8x4xf32>
    %55 = vector.shape_cast %54 : vector<1x8x8x4xf32> to vector<64x4xf32>
    %c6 = arith.constant 6 : index
    %c0_70 = arith.constant 0 : index
    %c0_71 = arith.constant 0 : index
    %56 = vector.load %arg4[%c6, %c0_70, %c0_71] : memref<8x4x64xf32, #tpu.memory_space<vmem>>, vector<1x4x64xf32>
    %57 = vector.shape_cast %56 : vector<1x4x64xf32> to vector<4x64xf32>
    %cst_72 = arith.constant dense<0.000000e+00> : vector<64x64xf32>
    %58 = tpu.matmul %55, %57, %cst_72 {dimension_numbers = #tpu.dot_dimension_numbers<[1], [0], [0], [1], [0, 0, 1, 1], [], []>} : vector<64x4xf32>, vector<4x64xf32>, vector<64x64xf32> -> vector<64x64xf32>
    %59 = arith.addf %45, %58 : vector<64x64xf32>
    %c0_73 = arith.constant 0 : index
    %c1_74 = arith.constant 1 : index
    %c1_75 = arith.constant 1 : index
    %c0_76 = arith.constant 0 : index
    %c0_77 = arith.constant 0 : index
    %60 = vector.load %arg2[%c0_73, %c1_74, %c1_75, %c0_76, %c0_77] : memref<1x8x9x9x4xf32, #tpu.memory_space<vmem>>, vector<1x7x8x8x4xf32>
    %61 = vector.shape_cast %60 : vector<1x7x8x8x4xf32> to vector<7x8x8x4xf32>
    %62 = vector.shape_cast %61 : vector<7x8x8x4xf32> to vector<448x4xf32>
    %c6_78 = arith.constant 6 : index
    %c0_79 = arith.constant 0 : index
    %c0_80 = arith.constant 0 : index
    %63 = vector.load %arg4[%c6_78, %c0_79, %c0_80] : memref<8x4x64xf32, #tpu.memory_space<vmem>>, vector<1x4x64xf32>
    %64 = vector.shape_cast %63 : vector<1x4x64xf32> to vector<4x64xf32>
    %cst_81 = arith.constant dense<0.000000e+00> : vector<448x64xf32>
    %65 = tpu.matmul %62, %64, %cst_81 {dimension_numbers = #tpu.dot_dimension_numbers<[1], [0], [0], [1], [0, 0, 1, 1], [], []>} : vector<448x4xf32>, vector<4x64xf32>, vector<448x64xf32> -> vector<448x64xf32>
    %66 = arith.addf %52, %65 : vector<448x64xf32>
    %c0_82 = arith.constant 0 : index
    %c0_83 = arith.constant 0 : index
    %c1_84 = arith.constant 1 : index
    %c1_85 = arith.constant 1 : index
    %c0_86 = arith.constant 0 : index
    %67 = vector.load %arg3[%c0_82, %c0_83, %c1_84, %c1_85, %c0_86] : memref<1x1x9x9x4xf32, #tpu.memory_space<vmem>>, vector<1x1x8x8x4xf32>
    %68 = vector.shape_cast %67 : vector<1x1x8x8x4xf32> to vector<1x8x8x4xf32>
    %69 = vector.shape_cast %68 : vector<1x8x8x4xf32> to vector<64x4xf32>
    %c7 = arith.constant 7 : index
    %c0_87 = arith.constant 0 : index
    %c0_88 = arith.constant 0 : index
    %70 = vector.load %arg4[%c7, %c0_87, %c0_88] : memref<8x4x64xf32, #tpu.memory_space<vmem>>, vector<1x4x64xf32>
    %71 = vector.shape_cast %70 : vector<1x4x64xf32> to vector<4x64xf32>
    %cst_89 = arith.constant dense<0.000000e+00> : vector<64x64xf32>
    %72 = tpu.matmul %69, %71, %cst_89 {dimension_numbers = #tpu.dot_dimension_numbers<[1], [0], [0], [1], [0, 0, 1, 1], [], []>} : vector<64x4xf32>, vector<4x64xf32>, vector<64x64xf32> -> vector<64x64xf32>
    %73 = arith.addf %59, %72 : vector<64x64xf32>
    %c0_90 = arith.constant 0 : index
    %c1_91 = arith.constant 1 : index
    %c1_92 = arith.constant 1 : index
    %c1_93 = arith.constant 1 : index
    %c0_94 = arith.constant 0 : index
    %74 = vector.load %arg2[%c0_90, %c1_91, %c1_92, %c1_93, %c0_94] : memref<1x8x9x9x4xf32, #tpu.memory_space<vmem>>, vector<1x7x8x8x4xf32>
    %75 = vector.shape_cast %74 : vector<1x7x8x8x4xf32> to vector<7x8x8x4xf32>
    %76 = vector.shape_cast %75 : vector<7x8x8x4xf32> to vector<448x4xf32>
    %c7_95 = arith.constant 7 : index
    %c0_96 = arith.constant 0 : index
    %c0_97 = arith.constant 0 : index
    %77 = vector.load %arg4[%c7_95, %c0_96, %c0_97] : memref<8x4x64xf32, #tpu.memory_space<vmem>>, vector<1x4x64xf32>
    %78 = vector.shape_cast %77 : vector<1x4x64xf32> to vector<4x64xf32>
    %cst_98 = arith.constant dense<0.000000e+00> : vector<448x64xf32>
    %79 = tpu.matmul %76, %78, %cst_98 {dimension_numbers = #tpu.dot_dimension_numbers<[1], [0], [0], [1], [0, 0, 1, 1], [], []>} : vector<448x4xf32>, vector<4x64xf32>, vector<448x64xf32> -> vector<448x64xf32>
    %80 = arith.addf %66, %79 : vector<448x64xf32>
    %81 = tpu.concatenate %80, %73 in 0 : vector<448x64xf32>, vector<64x64xf32> -> vector<512x64xf32>
    %82 = arith.addf %26, %81 : vector<512x64xf32>
    %c0_99 = arith.constant 0 : index
    %c0_100 = arith.constant 0 : index
    %83 = vector.load %arg5[%c0_99, %c0_100] : memref<1x64xf32, #tpu.memory_space<vmem>>, vector<1x64xf32>
    %84 = vector.broadcast %83 : vector<1x64xf32> to vector<512x64xf32>
    %85 = arith.addf %82, %84 : vector<512x64xf32>
    %86 = vector.extract_strided_slice %85 {offsets = [0, 0], sizes = [512, 16], strides = [1, 1]} : vector<512x64xf32> to vector<512x16xf32>
    %87 = vector.shape_cast %86 : vector<512x16xf32> to vector<8x8x8x16xf32>
    %c0_101 = arith.constant 0 : index
    %c0_102 = arith.constant 0 : index
    %c0_103 = arith.constant 0 : index
    %c0_104 = arith.constant 0 : index
    %c0_105 = arith.constant 0 : index
    %c0_106 = arith.constant 0 : index
    %c0_107 = arith.constant 0 : index
    %88 = vector.load %arg6[%c0_101, %c0_102, %c0_103, %c0_104, %c0_105, %c0_106, %c0_107] : memref<1x8x2x8x2x8x16xf32, #tpu.memory_space<vmem>>, vector<1x8x1x8x1x8x16xf32>
    %89 = vector.shape_cast %88 : vector<1x8x1x8x1x8x16xf32> to vector<8x8x8x16xf32>
    %90 = vector.shape_cast %87 : vector<8x8x8x16xf32> to vector<1x8x1x8x1x8x16xf32>
    tpu.vector_store %arg6[%c0_101, %c0_102, %c0_103, %c0_104, %c0_105, %c0_106, %c0_107], %90 {strides = array<i32>} : memref<1x8x2x8x2x8x16xf32, #tpu.memory_space<vmem>>, vector<1x8x1x8x1x8x16xf32>,
    %91 = vector.extract_strided_slice %85 {offsets = [0, 16], sizes = [512, 16], strides = [1, 1]} : vector<512x64xf32> to vector<512x16xf32>
    %92 = vector.shape_cast %91 : vector<512x16xf32> to vector<8x8x8x16xf32>
    %c0_108 = arith.constant 0 : index
    %c0_109 = arith.constant 0 : index
    %c0_110 = arith.constant 0 : index
    %c0_111 = arith.constant 0 : index
    %c1_112 = arith.constant 1 : index
    %c0_113 = arith.constant 0 : index
    %c0_114 = arith.constant 0 : index
    %93 = vector.load %arg6[%c0_108, %c0_109, %c0_110, %c0_111, %c1_112, %c0_113, %c0_114] : memref<1x8x2x8x2x8x16xf32, #tpu.memory_space<vmem>>, vector<1x8x1x8x1x8x16xf32>
    %94 = vector.shape_cast %93 : vector<1x8x1x8x1x8x16xf32> to vector<8x8x8x16xf32>
    %95 = vector.shape_cast %92 : vector<8x8x8x16xf32> to vector<1x8x1x8x1x8x16xf32>
    tpu.vector_store %arg6[%c0_108, %c0_109, %c0_110, %c0_111, %c1_112, %c0_113, %c0_114], %95 {strides = array<i32>} : memref<1x8x2x8x2x8x16xf32, #tpu.memory_space<vmem>>, vector<1x8x1x8x1x8x16xf32>,
    %96 = vector.extract_strided_slice %85 {offsets = [0, 32], sizes = [512, 16], strides = [1, 1]} : vector<512x64xf32> to vector<512x16xf32>
    %97 = vector.shape_cast %96 : vector<512x16xf32> to vector<8x8x8x16xf32>
    %c0_115 = arith.constant 0 : index
    %c0_116 = arith.constant 0 : index
    %c1_117 = arith.constant 1 : index
    %c0_118 = arith.constant 0 : index
    %c0_119 = arith.constant 0 : index
    %c0_120 = arith.constant 0 : index
    %c0_121 = arith.constant 0 : index
    %98 = vector.load %arg6[%c0_115, %c0_116, %c1_117, %c0_118, %c0_119, %c0_120, %c0_121] : memref<1x8x2x8x2x8x16xf32, #tpu.memory_space<vmem>>, vector<1x8x1x8x1x8x16xf32>
    %99 = vector.shape_cast %98 : vector<1x8x1x8x1x8x16xf32> to vector<8x8x8x16xf32>
    %100 = vector.shape_cast %97 : vector<8x8x8x16xf32> to vector<1x8x1x8x1x8x16xf32>
    tpu.vector_store %arg6[%c0_115, %c0_116, %c1_117, %c0_118, %c0_119, %c0_120, %c0_121], %100 {strides = array<i32>} : memref<1x8x2x8x2x8x16xf32, #tpu.memory_space<vmem>>, vector<1x8x1x8x1x8x16xf32>,
    %101 = vector.extract_strided_slice %85 {offsets = [0, 48], sizes = [512, 16], strides = [1, 1]} : vector<512x64xf32> to vector<512x16xf32>
    %102 = vector.shape_cast %101 : vector<512x16xf32> to vector<8x8x8x16xf32>
    %c0_122 = arith.constant 0 : index
    %c0_123 = arith.constant 0 : index
    %c1_124 = arith.constant 1 : index
    %c0_125 = arith.constant 0 : index
    %c1_126 = arith.constant 1 : index
    %c0_127 = arith.constant 0 : index
    %c0_128 = arith.constant 0 : index
    %103 = vector.load %arg6[%c0_122, %c0_123, %c1_124, %c0_125, %c1_126, %c0_127, %c0_128] : memref<1x8x2x8x2x8x16xf32, #tpu.memory_space<vmem>>, vector<1x8x1x8x1x8x16xf32>
    %104 = vector.shape_cast %103 : vector<1x8x1x8x1x8x16xf32> to vector<8x8x8x16xf32>
    %105 = vector.shape_cast %102 : vector<8x8x8x16xf32> to vector<1x8x1x8x1x8x16xf32>
    tpu.vector_store %arg6[%c0_122, %c0_123, %c1_124, %c0_125, %c1_126, %c0_127, %c0_128], %105 {strides = array<i32>} : memref<1x8x2x8x2x8x16xf32, #tpu.memory_space<vmem>>, vector<1x8x1x8x1x8x16xf32>,
    return
  }
  func.func @transform_0(%arg0: i32, %arg1: i32) -> (i32, i32, i32, i32, i32) {
    %c0_i32 = arith.constant 0 : i32
    %c0_i32_0 = arith.constant 0 : i32
    %c0_i32_1 = arith.constant 0 : i32
    %c0_i32_2 = arith.constant 0 : i32
    return %arg0, %arg1, %c0_i32, %c0_i32_0, %c0_i32_1 : i32, i32, i32, i32, i32
  }
  func.func @transform_1(%arg0: i32, %arg1: i32) -> (i32, i32, i32, i32, i32) {
    %c8_i32 = arith.constant 8 : i32
    %0 = arith.muli %arg1, %c8_i32 : i32
    %c8_i32_0 = arith.constant 8 : i32
    %1 = arith.addi %0, %c8_i32_0 : i32
    %c0_i32 = arith.constant 0 : i32
    %c0_i32_1 = arith.constant 0 : i32
    %c0_i32_2 = arith.constant 0 : i32
    %c0_i32_3 = arith.constant 0 : i32
    return %arg0, %1, %c0_i32, %c0_i32_1, %c0_i32_2 : i32, i32, i32, i32, i32
  }
  func.func @transform_2(%arg0: i32, %arg1: i32) -> (i32, i32, i32) {
    %c0_i32 = arith.constant 0 : i32
    %c0_i32_0 = arith.constant 0 : i32
    %c0_i32_1 = arith.constant 0 : i32
    %c0_i32_2 = arith.constant 0 : i32
    return %c0_i32, %c0_i32_0, %c0_i32_1 : i32, i32, i32
  }
  func.func @transform_3(%arg0: i32, %arg1: i32) -> (i32, i32) {
    %c0_i32 = arith.constant 0 : i32
    %c0_i32_0 = arith.constant 0 : i32
    %c0_i32_1 = arith.constant 0 : i32
    return %c0_i32, %c0_i32_0 : i32, i32
  }
  func.func @transform_4(%arg0: i32, %arg1: i32) -> (i32, i32, i32, i32, i32, i32, i32) {
    %c0_i32 = arith.constant 0 : i32
    %c0_i32_0 = arith.constant 0 : i32
    %c0_i32_1 = arith.constant 0 : i32
    %c0_i32_2 = arith.constant 0 : i32
    %c0_i32_3 = arith.constant 0 : i32
    %c0_i32_4 = arith.constant 0 : i32
    return %arg0, %arg1, %c0_i32, %c0_i32_0, %c0_i32_1, %c0_i32_2, %c0_i32_3 : i32, i32, i32, i32, i32, i32, i32
  }
}

</mosaic_0001>

<bundles_post_ra>
// kernel: tile.9
= control target key start
LH: loop header
LB: loop body
LE: loop exit
PB: predicated region body
PF: predicated region fallthrough
CT: control target
= control target key end

     0   :  { %s67_s10 = smov 56   ;;  %s68_s11 = smov 40   ;;  %vm3_vm0 = vcmask 64512   ;;  %vm9_vm1 = vcmask 523712   ;;  %vm15_vm2 = vcmask 458112   ;;  %vm21_vm3 = vcmask 392512   ;;  %s111_s0 = inlined_call_operand.vmem [shape: f32[8,8], index: 0, kind: input, shape index: {}]   ;;  %s112_s1 = inlined_call_operand.vmem [shape: f32[1,64], index: 1, kind: output, shape index: {}]  }
   0x1   :  { %v53_v0 = vld [vmem:[%s111_s0 + $0x7] sm:$0x1]   ;;  %v55_v1 = vld [vmem:[%s111_s0 + $0x5] sm:$0x1]   ;;  %v57_v2 = vld [vmem:[%s111_s0 + $0x3] sm:$0x1]  }
   0x2   :  { %7 = vrot.lane.b32.xlu0 %v53_v0, %s67_s10  ;;  %19 = vrot.lane.b32.xlu1 %v55_v1, %s68_s11  ;;  %s69_s14 = smov 24   ;;  %v54_v3 = vld [vmem:[%s111_s0 + $0x6] sm:$0x1]   ;;  %v56_v4 = vld [vmem:[%s111_s0 + $0x4] sm:$0x1]   ;;  %s70_s21 = smov 48  }
   0x3   :  { %31 = vrot.lane.b32.xlu2 %v57_v2, %s69_s14  ;;  %v58_v5 = vld [vmem:[%s111_s0 + $0x2] sm:$0x1]   ;;  %s71_s22 = smov 32   ;;  %s72_s23 = smov 16   ;;  %v59_v6 = vld [vmem:[%s111_s0 + $0x1] sm:$0x1]  }
   0x4   :  { %s73_s26 = smov 8   ;;  %v2_v7 = vld [vmem:[%s111_s0] sm:$0x1]   ;;  %vm27_vm4 = vcmask 326912   ;;  %vm33_vm5 = vcmask 261312   ;;  %vm39_vm6 = vcmask 195712  }
   0x5   :  { %4 = vst.msk [vmem:[#allocation0] sm:$0x1] %vm3_vm0, %v2_v7   ;;  %vm45_vm7 = vcmask 130112  }
   0xa   :  { %13 = vrot.lane.b32.xlu0 %v54_v3, %s70_s21  ;;  %25 = vrot.lane.b32.xlu1 %v56_v4, %s71_s22 }
   0xb   :  { %37 = vrot.lane.b32.xlu2 %v58_v5, %s72_s23 }
  0x12   :  { %43 = vrot.lane.b32.xlu0 %v59_v6, %s73_s26 }
  0x5d   :  { %v32_v8 = vpop.permute.xlu2 %31  }
  0x65   :  { %v38_v9 = vpop.permute.xlu2 %37  }
  0x74   :  { %v8_v10 = vpop.permute.xlu0 %7   ;;  %v20_v11 = vpop.permute.xlu1 %19  }
  0x75   :  { %10 = vst.msk [vmem:[#allocation0] sm:$0x1] %vm9_vm1, %v8_v10  }
  0x7c   :  { %v14_v12 = vpop.permute.xlu0 %13   ;;  %v26_v13 = vpop.permute.xlu1 %25  }
  0x7d   :  { %16 = vst.msk [vmem:[#allocation0] sm:$0x1] %vm15_vm2, %v14_v12  }
  0x7e   :  { %22 = vst.msk [vmem:[#allocation0] sm:$0x1] %vm21_vm3, %v20_v11  }
  0x7f   :  { %28 = vst.msk [vmem:[#allocation0] sm:$0x1] %vm27_vm4, %v26_v13  }
  0x80   :  { %34 = vst.msk [vmem:[#allocation0] sm:$0x1] %vm33_vm5, %v32_v8  }
  0x81   :  { %40 = vst.msk [vmem:[#allocation0] sm:$0x1] %vm39_vm6, %v38_v9  }
  0x84   :  { %v44_v14 = vpop.permute.xlu0 %43  }
  0x85   :  { %46 = vst.msk [vmem:[#allocation0] sm:$0x1] %vm45_vm7, %v44_v14  }
  0x8c   :  { %v49_v15 = vld [vmem:[#allocation0] sm:$0x1] }
  0x8d   :  { %52 = vst [vmem:[%s112_s1] sm:$0x1] %v49_v15 }

// kernel: tile.8
= control target key start
LH: loop header
LB: loop body
LE: loop exit
PB: predicated region body
PF: predicated region fallthrough
CT: control target
= control target key end

     0   :  { %2 = vsyncpa [#allocation1], 0  ;;  %s48_s8 = smov [#allocation0]   ;;  %s65_s0 = inlined_call_operand.hbm [shape: f32[8], index: 0, kind: input, shape index: {}]   ;;  %s66_s1 = inlined_call_operand.vmem [shape: f32[8,8], index: 1, kind: output, shape index: {}]  }
   0x1   :  { %s8_s0 = sshll.u32 %s65_s0, 4  ;;  %s10_s9 = sshll.u32 %s48_s8, 4  ;;  %s9_s0 = int_to_ptr.hbm [resolvable:$true] %s8_s0  ;;  %s11_s9 = int_to_ptr.vmem [resolvable:$true] %s10_s9 }
   0x2   :  { %13 = dma.hbm_to_vmem [thread:$0]  %s9_s0, 16, %s11_s9, [#allocation1]  }
   0x3   :  { %46 = dma.done.wait [#allocation1], 16  }
   0x4   :  { %47 = vsyncadd [#allocation1], 4294967280  ;;  %v18_v0 = vld [vmem:[#allocation0] ss:$0 sm:$0xff] }
   0x5   :  { %19 = vst [vmem:[%s66_s1] sm:$0xff] %v18_v0 }
   0x6   :  { %20 = vsyncpa [#allocation1], 1 }

// kernel: conv_transpose3d.1
= control target key start
LH: loop header
LB: loop body
LE: loop exit
PB: predicated region body
PF: predicated region fallthrough
CT: control target
= control target key end

     0   :  { %s6750_s15 = smov 0   ;;  %s6752_s16 = smov 0   ;;  %s9413_s0 = inlined_call_operand.vmem [shape: f32[2,9,9,9,4], index: 0, kind: input, shape index: {}, may-alias: {0,1}]   ;;  %s9414_s1 = inlined_call_operand.vmem [shape: f32[2,9,9,9,4], index: 1, kind: input, shape index: {}, may-alias: {0,1}]   ;;  %s9415_s2 = inlined_call_operand.vmem [shape: f32[8,4,64], index: 2, kind: input, shape index: {}]   ;;  %s9416_s3 = inlined_call_operand.vmem [shape: f32[1,64], index: 3, kind: input, shape index: {}]   ;;  %s9417_s4 = inlined_call_operand.vmem [shape: f32[2,8,2,8,2,8,16], index: 4, kind: output, shape index: {}]  }
   0x1   :  { %s6754_s17 = smov 0  }
   0x2 LB: > { %s26_s18 = sadd.s32 1, %s6716_s16  ;;  %p5562_p0 = scmp.ge.s32.totalorder %s6720_s17, 1  ;;  %s6720_s17 = sphi %s6754_s17, %s14_s17   ;;  %s6716_s16 = sphi %s6752_s16, %s9501_s16   ;;  %s6712_s15 = sphi %s6750_s15, %s9500_s15  }
   0x3   : > { %p28_p1 = scmp.ge.s32.totalorder %s26_s18, 2  ;;  %p220_p2 = scmp.lt.s32.totalorder %s6720_s17, 3 }
   0x5   : > { %s9503_s18 = smov (%p28_p1, %s26_s18), 0  ;;  %p221_p3 = pnand %p5562_p0, %p220_p2 }
   0x7   : > { %224 = sbr.rel (%p221_p3) target bundleno = 1309 (0x51d), region = 36 }
   0xc   : > { %v5567_v0 = vld [vmem:[%s9415_s2 + $0x4] sm:$0xf]  ;;  %vm644_vm0 = vcmask 1043456   ;;  %v384_v1 = vld [vmem:[%s9415_s2] sm:$0xf]  ;;  %p280_p4 = scmp.lt.s32.totalorder %s6712_s15, 1 }
   0xd   : > { %6663 = vmatpush.msk.msra.mxu2 %vm644_vm0, %v5567_v0  ;;  %6664 = vmatpush.msk.msra.mxu3 %vm644_vm0, %v5567_v0  ;;  %v5762_v2 = vld [vmem:[%s9415_s2 + $0x8] sm:$0xf]  ;;  %v5892_v3 = vld [vmem:[%s9415_s2 + $0xc] sm:$0xf]  ;;  %v5958_v4 = vld [vmem:[%s9415_s2 + $0x10] sm:$0xf] }
   0xe   : > { %5633 = vmatpush.msk.msra.mxu1 %vm644_vm0, %v384_v1  ;;  %s9505_s15 = smov (!%p280_p4, %s6712_s15), 1  ;;  %v6015_v5 = vld [vmem:[%s9415_s2 + $0x14] sm:$0xf]  ;;  %5568 = vmatpush.msk.msra.mxu0 %vm644_vm0, %v5567_v0  ;;  %vm451_vm1 = vcmask 31744   ;;  %vm4541_vm2 = vcmask 130048   ;;  %s6723_s27 = smov 96  }
   0xf   : > { %5763 = vmatpush.msk.msrb.mxu2 %vm644_vm0, %v5762_v2  ;;  %5893 = vmatpush.msk.msrb.mxu3 %vm644_vm0, %v5892_v3  ;;  %s6665_s5 = smul.u32 1296, %s9505_s15  ;;  %s6662_s21 = sshll.u32 %s9505_s15, 11 }
  0x10   : > { %6025 = vmatpush.msk.msrb.mxu1 %vm644_vm0, %v5958_v4  ;;  %6016 = vmatpush.msk.msrb.mxu0 %vm644_vm0, %v6015_v5  ;;  %s8232_s26 = scalar_lea.vmem %s9417_s4, %s6662_s21  ;;  %s6722_s15 = smov 80  }
  0x11   : > { %s6802_s8 = scalar_lea.vmem %s9413_s0, %s6665_s5  ;;  %s6661_s11 = sadd.s32 1152, %s6665_s5 }
  0x12   : > { %v433_v6 = vld [vmem:[%s6802_s8 + $0x361] sm:$0xff]  ;;  %v441_v7 = vld [vmem:[%s6802_s8 + $0x3f1] sm:$0xff]  ;;  %s7618_s14 = scalar_lea.vmem %s9414_s1, %s6661_s11  ;;  %s6724_s28 = smov 112  }
  0x13   : > { %v320_v8 = vld [vmem:[%s6802_s8] sm:$0xff]  ;;  %5617 = vmatmul.msk.f32.vlgmr.msra.gmra.mxu2 %vm451_vm1, %v433_v6  ;;  %5625 = vmatmul.msk.f32.vlgmr.msra.gmra.mxu3 %vm451_vm1, %v441_v7  ;;  %v434_v10 = vld [vmem:[%s6802_s8 + $0x371] sm:$0xff] }
  0x14   : > { %v385_v9 = vld [vmem:[%s6802_s8 + $0x1] sm:$0xff]  ;;  %5634 = vmatmul.msk.f32.vlgmr.msra.gmra.mxu1 %vm451_vm1, %v320_v8  ;;  %6090 = vmatpush.msk.msra.mxu2 %vm644_vm0, %v6015_v5  ;;  %v321_v12 = vld [vmem:[%s6802_s8 + $0x10] sm:$0xff] }
  0x15   : > { %5569 = vmatmul.msk.f32.vlgmr.msra.gmra.mxu0 %vm451_vm1, %v385_v9  ;;  %6147 = vmatpush.msk.msra.mxu3 %vm644_vm0, %v5958_v4  ;;  %v442_v11 = vld [vmem:[%s6802_s8 + $0x401] sm:$0xff]  ;;  %v386_v13 = vld [vmem:[%s6802_s8 + $0x11] sm:$0xff] }
  0x16   : > { %v435_v14 = vld [vmem:[%s6802_s8 + $0x381] sm:$0xff]  ;;  %v443_v15 = vld [vmem:[%s6802_s8 + $0x411] sm:$0xff] }
  0x17   : > { %v322_v16 = vld [vmem:[%s6802_s8 + $0x20] sm:$0xff]  ;;  %v436_v18 = vld [vmem:[%s6802_s8 + $0x391] sm:$0xff] }
  0x18   : > { %v387_v17 = vld [vmem:[%s6802_s8 + $0x21] sm:$0xff]  ;;  %v323_v20 = vld [vmem:[%s6802_s8 + $0x30] sm:$0xff] }
  0x19   : > { %v444_v19 = vld [vmem:[%s6802_s8 + $0x421] sm:$0xff]  ;;  %v388_v21 = vld [vmem:[%s6802_s8 + $0x31] sm:$0xff] }
  0x1a   : > { %v437_v22 = vld [vmem:[%s6802_s8 + $0x3a1] sm:$0xff]  ;;  %v445_v23 = vld [vmem:[%s6802_s8 + $0x431] sm:$0xff] }
  0x1b   : > { %5618 = vmatmul.msk.f32.gmra.mxu2 %vm451_vm1, %v434_v10  ;;  %5626 = vmatmul.msk.f32.gmra.mxu3 %vm451_vm1, %v442_v11  ;;  %v324_v24 = vld [vmem:[%s6802_s8 + $0x40] sm:$0xff]  ;;  %v438_v26 = vld [vmem:[%s6802_s8 + $0x3b1] sm:$0xff] }
  0x1c   : > { %5635 = vmatmul.msk.f32.gmra.mxu1 %vm451_vm1, %v321_v12  ;;  %v389_v25 = vld [vmem:[%s6802_s8 + $0x41] sm:$0xff]  ;;  %v325_v28 = vld [vmem:[%s6802_s8 + $0x50] sm:$0xff] }
  0x1d   : > { %5570 = vmatmul.msk.f32.gmra.mxu0 %vm451_vm1, %v386_v13  ;;  %v446_v27 = vld [vmem:[%s6802_s8 + $0x441] sm:$0xff]  ;;  %v390_v29 = vld [vmem:[%s6802_s8 + $0x51] sm:$0xff] }
  0x1e   : > { %v439_v30 = vld [vmem:[%s6802_s8 + $0x3c1] sm:$0xff]  ;;  %v447_v31 = vld [vmem:[%s6802_s8 + $0x451] sm:$0xff] }
  0x1f   : > { %v326_v32 = vld [vmem:[%s6802_s8 + $0x60] sm:$0xff]  ;;  %v440_v34 = vld [vmem:[%s6802_s8 + $0x3d1] sm:$0xff] }
  0x20   : > { %v391_v33 = vld [vmem:[%s6802_s8 + $0x61] sm:$0xff]  ;;  %v327_v36 = vld [vmem:[%s6802_s8 + $0x70] sm:$0xff] }
  0x21   : > { %v448_v35 = vld [vmem:[%s6802_s8 + $0x461] sm:$0xff]  ;;  %v392_v37 = vld [vmem:[%s6802_s8 + $0x71] sm:$0xff] }
  0x22   : > { %v328_v38 = vld [vmem:[%s6802_s8 + $0x90] sm:$0xff]  ;;  %v329_v40 = vld [vmem:[%s6802_s8 + $0xa0] sm:$0xff] }
  0x23   : > { %5619 = vmatmul.msk.f32.gmra.mxu2 %vm451_vm1, %v435_v14  ;;  %5627 = vmatmul.msk.f32.gmra.mxu3 %vm451_vm1, %v443_v15  ;;  %v393_v39 = vld [vmem:[%s6802_s8 + $0x91] sm:$0xff]  ;;  %v394_v41 = vld [vmem:[%s6802_s8 + $0xa1] sm:$0xff] }
  0x24   : > { %5636 = vmatmul.msk.f32.gmra.mxu1 %vm451_vm1, %v322_v16  ;;  %v330_v42 = vld [vmem:[%s6802_s8 + $0xb0] sm:$0xff]  ;;  %v331_v44 = vld [vmem:[%s6802_s8 + $0xc0] sm:$0xff] }
  0x25   : > { %5571 = vmatmul.msk.f32.gmra.mxu0 %vm451_vm1, %v387_v17  ;;  %v395_v43 = vld [vmem:[%s6802_s8 + $0xb1] sm:$0xff]  ;;  %v396_v45 = vld [vmem:[%s6802_s8 + $0xc1] sm:$0xff] }
  0x26   : > { %v332_v46 = vld [vmem:[%s6802_s8 + $0xd0] sm:$0xff]  ;;  %v6901_v48 = vld [vmem:[%s6802_s8 + $0xe0] sm:$0xff] }
  0x27   : > { %v397_v47 = vld [vmem:[%s6802_s8 + $0xd1] sm:$0xff]  ;;  %v6904_v49 = vld [vmem:[%s6802_s8 + $0xe1] sm:$0xff] }
  0x28   : > { %v6913_v50 = vld [vmem:[%s6802_s8 + $0xf0] sm:$0xff]  ;;  %v5705_v52 = vld [vmem:[%s6802_s8 + $0x80] sm:$0xff] }
  0x29   : > { %v6916_v51 = vld [vmem:[%s6802_s8 + $0xf1] sm:$0xff]  ;;  %v5835_v53 = vld [vmem:[%s6802_s8 + $0x81] sm:$0xff] }
  0x2a   : > { %v6927_v54 = vld [vmem:[%s6802_s8 + $0x100] sm:$0xff]  ;;  %v6955_v63 = vld [vmem:[%s6802_s8 + $0x130] sm:$0xff] }
  0x2b   : > { %5620 = vmatmul.msk.f32.gmra.mxu2 %vm451_vm1, %v436_v18  ;;  %5628 = vmatmul.msk.f32.gmra.mxu3 %vm451_vm1, %v444_v19  ;;  %v6930_v55 = vld [vmem:[%s6802_s8 + $0x101] sm:$0xff]  ;;  %v6960_v1 = vld [vmem:[%s6802_s8 + $0x131] sm:$0xff] }
  0x2c   : > { %5637 = vmatmul.msk.f32.gmra.mxu1 %vm451_vm1, %v323_v20  ;;  %v336_v57 = vld [vmem:[%s6802_s8 + $0x120] sm:$0xff]  ;;  %v6995_v11 = vld [vmem:[%s6802_s8 + $0x150] sm:$0xff] }
  0x2d   : > { %5572 = vmatmul.msk.f32.gmra.mxu0 %vm451_vm1, %v388_v21  ;;  %v401_v59 = vld [vmem:[%s6802_s8 + $0x121] sm:$0xff] }
  0x2e   : > { %v6975_v5 = vld [vmem:[%s6802_s8 + $0x140] sm:$0xff] }
  0x2f   : > { %v6980_v7 = vld [vmem:[%s6802_s8 + $0x141] sm:$0xff] }
  0x30   : > { %v7020_v19 = vld [vmem:[%s6802_s8 + $0x161] sm:$0xff] }
  0x33   : > { %5621 = vmatmul.msk.f32.gmra.mxu2 %vm451_vm1, %v437_v22  ;;  %5629 = vmatmul.msk.f32.gmra.mxu3 %vm451_vm1, %v445_v23  ;;  %v7037_v23 = vld [vmem:[%s6802_s8 + $0x170] sm:$0xff] }
  0x34   : > { %5638 = vmatmul.msk.f32.gmra.mxu1 %vm451_vm1, %v324_v24 }
  0x35   : > { %5573 = vmatmul.msk.f32.gmra.mxu0 %vm451_vm1, %v389_v25 }
  0x3b   : > { %5622 = vmatmul.msk.f32.gmra.mxu2 %vm451_vm1, %v438_v26  ;;  %5630 = vmatmul.msk.f32.gmra.mxu3 %vm451_vm1, %v446_v27 }
  0x3c   : > { %5639 = vmatmul.msk.f32.gmra.mxu1 %vm451_vm1, %v325_v28 }
  0x3d   : > { %5574 = vmatmul.msk.f32.gmra.mxu0 %vm451_vm1, %v390_v29 }
  0x43   : > { %5623 = vmatmul.msk.f32.gmra.mxu2 %vm451_vm1, %v439_v30  ;;  %5631 = vmatmul.msk.f32.gmra.mxu3 %vm451_vm1, %v447_v31  ;;  %v7064_v31 = vld [vmem:[%s6802_s8 + $0x181] sm:$0xff] }
  0x44   : > { %5640 = vmatmul.msk.f32.gmra.mxu1 %vm451_vm1, %v326_v32 }
  0x45   : > { %5575 = vmatmul.msk.f32.gmra.mxu0 %vm451_vm1, %v391_v33 }
  0x4b   : > { %5624 = vmatmul.msk.f32.gmra.mxu2 %vm451_vm1, %v440_v34  ;;  %5632 = vmatmul.msk.f32.gmra.mxu3 %vm451_vm1, %v448_v35  ;;  %v5713_v34 = vld [vmem:[%s6802_s8 + $0x110] sm:$0xff] }
  0x4c   : > { %5641 = vmatmul.msk.f32.gmra.mxu1 %vm451_vm1, %v327_v36  ;;  %v5843_v35 = vld [vmem:[%s6802_s8 + $0x111] sm:$0xff] }
  0x4d   : > { %5576 = vmatmul.msk.f32.gmra.mxu0 %vm451_vm1, %v392_v37 }
  0x53   : > { %5764 = vmatmul.msk.f32.vlgmr.msrb.gmra.mxu2 %vm451_vm1, %v321_v12  ;;  %5894 = vmatmul.msk.f32.vlgmr.msrb.gmra.mxu3 %vm451_vm1, %v386_v13  ;;  %v7000_v13 = vld [vmem:[%s6802_s8 + $0x151] sm:$0xff] }
  0x54   : > { %5642 = vmatmul.msk.f32.gmra.mxu1 %vm451_vm1, %v328_v38 }
  0x55   : > { %5577 = vmatmul.msk.f32.gmra.mxu0 %vm451_vm1, %v393_v39  ;;  %v7088_v39 = vld [vmem:[%s6802_s8 + $0x191] sm:$0xff] }
  0x5b   : > { %5765 = vmatmul.msk.f32.gmra.mxu2 %vm451_vm1, %v322_v16  ;;  %5895 = vmatmul.msk.f32.gmra.mxu3 %vm451_vm1, %v387_v17  ;;  %v7015_v17 = vld [vmem:[%s6802_s8 + $0x160] sm:$0xff] }
  0x5c   : > { %5643 = vmatmul.msk.f32.gmra.mxu1 %vm451_vm1, %v329_v40 }
  0x5d   : > { %5578 = vmatmul.msk.f32.gmra.mxu0 %vm451_vm1, %v394_v41 }
  0x63   : > { %5766 = vmatmul.msk.f32.gmra.mxu2 %vm451_vm1, %v323_v20  ;;  %5896 = vmatmul.msk.f32.gmra.mxu3 %vm451_vm1, %v388_v21 }
  0x64   : > { %5644 = vmatmul.msk.f32.gmra.mxu1 %vm451_vm1, %v330_v42 }
  0x65   : > { %5579 = vmatmul.msk.f32.gmra.mxu0 %vm451_vm1, %v395_v43 }
  0x6b   : > { %5767 = vmatmul.msk.f32.gmra.mxu2 %vm451_vm1, %v324_v24  ;;  %5897 = vmatmul.msk.f32.gmra.mxu3 %vm451_vm1, %v389_v25  ;;  %v7042_v25 = vld [vmem:[%s6802_s8 + $0x171] sm:$0xff] }
  0x6c   : > { %5645 = vmatmul.msk.f32.gmra.mxu1 %vm451_vm1, %v331_v44 }
  0x6d   : > { %5580 = vmatmul.msk.f32.gmra.mxu0 %vm451_vm1, %v396_v45 }
  0x73   : > { %5768 = vmatmul.msk.f32.gmra.mxu2 %vm451_vm1, %v325_v28  ;;  %5898 = vmatmul.msk.f32.gmra.mxu3 %vm451_vm1, %v390_v29  ;;  %v7059_v29 = vld [vmem:[%s6802_s8 + $0x180] sm:$0xff] }
  0x74   : > { %5646 = vmatmul.msk.f32.gmra.mxu1 %vm451_vm1, %v332_v46 }
  0x75   : > { %5581 = vmatmul.msk.f32.gmra.mxu0 %vm451_vm1, %v397_v47 }
  0x7b   : > { %5769 = vmatmul.msk.f32.gmra.mxu2 %vm451_vm1, %v326_v32  ;;  %5899 = vmatmul.msk.f32.gmra.mxu3 %vm451_vm1, %v391_v33 }
  0x7c   : > { %5647 = vmatmul.msk.f32.gmra.mxu1 %vm451_vm1, %v6901_v48 }
  0x7d   : > { %5582 = vmatmul.msk.f32.gmra.mxu0 %vm451_vm1, %v6904_v49 }
  0x83   : > { %5770 = vmatmul.msk.f32.gmra.mxu2 %vm451_vm1, %v327_v36  ;;  %5900 = vmatmul.msk.f32.gmra.mxu3 %vm451_vm1, %v392_v37  ;;  %v7083_v37 = vld [vmem:[%s6802_s8 + $0x190] sm:$0xff] }
  0x84   : > { %5648 = vmatmul.msk.f32.gmra.mxu1 %vm451_vm1, %v6913_v50 }
  0x85   : > { %5583 = vmatmul.msk.f32.gmra.mxu0 %vm451_vm1, %v6916_v51 }
  0x8b   : > { %5771 = vmatmul.msk.f32.gmra.mxu2 %vm451_vm1, %v5705_v52  ;;  %5901 = vmatmul.msk.f32.gmra.mxu3 %vm451_vm1, %v5835_v53  ;;  %v7119_v52 = vld [vmem:[%s6802_s8 + $0x1c0] sm:$0xff] }
  0x8c   : > { %5649 = vmatmul.msk.f32.gmra.mxu1 %vm451_vm1, %v6927_v54 }
  0x8d   : > { %5584 = vmatmul.msk.f32.gmra.mxu0 %vm451_vm1, %v6930_v55 }
  0x91   : > { %v6938_v56 = vpop.f32.mrf.mxu1 }
  0x92   : > { %v6941_v58 = vpop.f32.mrf.mxu0 }
  0x93   : > { %5772 = vmatmul.msk.f32.gmra.mxu2 %vm451_vm1, %v329_v40  ;;  %5902 = vmatmul.msk.f32.gmra.mxu3 %vm451_vm1, %v394_v41 }
  0x94   : > { %5650 = vmatmul.msk.f32.gmra.mxu1 %vm451_vm1, %v336_v57 }
  0x95   : > { %5585 = vmatmul.msk.f32.gmra.mxu0 %vm451_vm1, %v401_v59 }
  0x96   : > { %v6948_v60 = vpop.f32.mrf.mxu2  ;;  %v6950_v61 = vpop.f32.mrf.mxu3 }
  0x99   : > { %v6952_v62 = vpop.f32.mrf.mxu1 }
  0x9a   : > { %v6957_v0 = vpop.f32.mrf.mxu0 }
  0x9b   : > { %5773 = vmatmul.msk.f32.gmra.mxu2 %vm451_vm1, %v330_v42  ;;  %5903 = vmatmul.msk.f32.gmra.mxu3 %vm451_vm1, %v395_v43  ;;  %v344_v43 = vld [vmem:[%s6802_s8 + $0x1b0] sm:$0xff] }
  0x9c   : > { %5651 = vmatmul.msk.f32.gmra.mxu1 %vm451_vm1, %v6955_v63 }
  0x9d   : > { %5586 = vmatmul.msk.f32.gmra.mxu0 %vm451_vm1, %v6960_v1 }
  0x9e   : > { %v6968_v2 = vpop.f32.mrf.mxu2  ;;  %v6970_v3 = vpop.f32.mrf.mxu3 }
  0xa1   : > { %v6972_v4 = vpop.f32.mrf.mxu1 }
  0xa2   : > { %v6977_v6 = vpop.f32.mrf.mxu0 }
  0xa3   : > { %5774 = vmatmul.msk.f32.gmra.mxu2 %vm451_vm1, %v331_v44  ;;  %5904 = vmatmul.msk.f32.gmra.mxu3 %vm451_vm1, %v396_v45  ;;  %v409_v45 = vld [vmem:[%s6802_s8 + $0x1b1] sm:$0xff] }
  0xa4   : > { %5652 = vmatmul.msk.f32.gmra.mxu1 %vm451_vm1, %v6975_v5 }
  0xa5   : > { %5587 = vmatmul.msk.f32.gmra.mxu0 %vm451_vm1, %v6980_v7 }
  0xa6   : > { %v6988_v8 = vpop.f32.mrf.mxu2  ;;  %v6990_v9 = vpop.f32.mrf.mxu3 }
  0xa9   : > { %v6992_v10 = vpop.f32.mrf.mxu1 }
  0xaa   : > { %v6997_v12 = vpop.f32.mrf.mxu0 }
  0xab   : > { %5775 = vmatmul.msk.f32.gmra.mxu2 %vm451_vm1, %v332_v46  ;;  %5905 = vmatmul.msk.f32.gmra.mxu3 %vm451_vm1, %v397_v47  ;;  %v1070_v46 = vadd.f32 %v6938_v56, %v6941_v58 }
  0xac   : > { %5653 = vmatmul.msk.f32.gmra.mxu1 %vm451_vm1, %v6995_v11 }
  0xad   : > { %5588 = vmatmul.msk.f32.gmra.mxu0 %vm451_vm1, %v7000_v13 }
  0xae   : > { %v7008_v14 = vpop.f32.mrf.mxu2  ;;  %v7010_v15 = vpop.f32.mrf.mxu3 }
  0xb1   : > { %v7012_v16 = vpop.f32.mrf.mxu1 }
  0xb2   : > { %v7017_v18 = vpop.f32.mrf.mxu0 }
  0xb3   : > { %5776 = vmatmul.msk.f32.gmra.mxu2 %vm451_vm1, %v6901_v48  ;;  %5906 = vmatmul.msk.f32.gmra.mxu3 %vm451_vm1, %v6904_v49 }
  0xb4   : > { %5654 = vmatmul.msk.f32.gmra.mxu1 %vm451_vm1, %v7015_v17 }
  0xb5   : > { %5589 = vmatmul.msk.f32.gmra.mxu0 %vm451_vm1, %v7020_v19 }
  0xb6   : > { %v7030_v20 = vpop.f32.mrf.mxu2  ;;  %v7032_v21 = vpop.f32.mrf.mxu3 }
  0xb9   : > { %v7034_v22 = vpop.f32.mrf.mxu1 }
  0xba   : > { %v7039_v24 = vpop.f32.mrf.mxu0 }
  0xbb   : > { %5777 = vmatmul.msk.f32.gmra.mxu2 %vm451_vm1, %v6913_v50  ;;  %5907 = vmatmul.msk.f32.gmra.mxu3 %vm451_vm1, %v6916_v51 }
  0xbc   : > { %5655 = vmatmul.msk.f32.gmra.mxu1 %vm451_vm1, %v7037_v23 }
  0xbd   : > { %5590 = vmatmul.msk.f32.gmra.mxu0 %vm451_vm1, %v7042_v25 }
  0xbe   : > { %v7052_v26 = vpop.f32.mrf.mxu2  ;;  %v7054_v27 = vpop.f32.mrf.mxu3 }
  0xc1   : > { %v7056_v28 = vpop.f32.mrf.mxu1 }
  0xc2   : > { %v7061_v30 = vpop.f32.mrf.mxu0 }
  0xc3   : > { %5778 = vmatmul.msk.f32.gmra.mxu2 %vm451_vm1, %v6927_v54  ;;  %5908 = vmatmul.msk.f32.gmra.mxu3 %vm451_vm1, %v6930_v55  ;;  %v7124_v54 = vld [vmem:[%s6802_s8 + $0x1c1] sm:$0xff]  ;;  %v1073_v55 = vadd.f32 %v6952_v62, %v6957_v0  ;;  %v1076_v62 = vadd.f32 %v6972_v4, %v6977_v6  ;;  %v1079_v4 = vadd.f32 %v6992_v10, %v6997_v12 }
  0xc4   : > { %5656 = vmatmul.msk.f32.gmra.mxu1 %vm451_vm1, %v7059_v29  ;;  %v1082_v10 = vadd.f32 %v7012_v16, %v7017_v18  ;;  %v1085_v16 = vadd.f32 %v7034_v22, %v7039_v24  ;;  %v1088_v22 = vadd.f32 %v7056_v28, %v7061_v30 }
  0xc5   : > { %5591 = vmatmul.msk.f32.gmra.mxu0 %vm451_vm1, %v7064_v31 }
  0xc6   : > { %v7074_v32 = vpop.f32.mrf.mxu2  ;;  %v7076_v33 = vpop.f32.mrf.mxu3 }
  0xc7   : > { %9418 = vst [vmem:[#allocation2_spill] sm:$0xff] %v7076_v33 }
  0xc9   : > { %v7080_v36 = vpop.f32.mrf.mxu1 }
  0xca   : > { %v7085_v38 = vpop.f32.mrf.mxu0 }
  0xcb   : > { %5779 = vmatmul.msk.f32.gmra.mxu2 %vm451_vm1, %v5713_v34  ;;  %5909 = vmatmul.msk.f32.gmra.mxu3 %vm451_vm1, %v5843_v35  ;;  %v1091_v28 = vadd.f32 %v7080_v36, %v7085_v38 }
  0xcc   : > { %5657 = vmatmul.msk.f32.gmra.mxu1 %vm451_vm1, %v7083_v37 }
  0xcd   : > { %5592 = vmatmul.msk.f32.gmra.mxu0 %vm451_vm1, %v7088_v39 }
  0xce   : > { %v7096_v40 = vpop.f32.mrf.mxu2  ;;  %v7098_v41 = vpop.f32.mrf.mxu3 }
  0xcf   : > { %9419 = vst [vmem:[#allocation3_spill] sm:$0xff] %v7098_v41  ;;  %v6211_v41 = vld [vmem:[%s7618_s14 + $0x80] sm:$0xff] }
  0xd1   : > { %v7100_v42 = vpop.f32.mrf.mxu1 }
  0xd2   : > { %v7103_v44 = vpop.f32.mrf.mxu0 }
  0xd3   : > { %5780 = vmatmul.msk.f32.gmra.mxu2 %vm451_vm1, %v6955_v63  ;;  %5910 = vmatmul.msk.f32.gmra.mxu3 %vm451_vm1, %v6960_v1  ;;  %v7141_v1 = vld [vmem:[%s6802_s8 + $0x1d0] sm:$0xff]  ;;  %v1094_v36 = vadd.f32 %v7100_v42, %v7103_v44 }
  0xd4   : > { %5658 = vmatmul.msk.f32.gmra.mxu1 %vm451_vm1, %v344_v43 }
  0xd5   : > { %5593 = vmatmul.msk.f32.gmra.mxu0 %vm451_vm1, %v409_v45 }
  0xd6   : > { %v1540_v47 = vpop.f32.mrf.mxu2  ;;  %v2074_v48 = vpop.f32.mrf.mxu3 }
  0xd7   : > { %v1732_v49 = vadd.f32 %v1540_v47, %v1070_v46  ;;  %v7168_v46 = vld [vmem:[%s6802_s8 + $0x1e1] sm:$0xff] }
  0xd9   : > { %v7114_v50 = vadd.f32 %v2074_v48, %v1732_v49  ;;  %v7116_v51 = vpop.f32.mrf.mxu1 }
  0xda   : > { %v7121_v53 = vpop.f32.mrf.mxu0 }
  0xdb   : > { %9420 = vst [vmem:[#allocation4_spill] sm:$0xff] %v7114_v50  ;;  %5781 = vmatmul.msk.f32.gmra.mxu2 %vm451_vm1, %v6975_v5  ;;  %5911 = vmatmul.msk.f32.gmra.mxu3 %vm451_vm1, %v6980_v7  ;;  %v7146_v7 = vld [vmem:[%s6802_s8 + $0x1d1] sm:$0xff]  ;;  %v1097_v42 = vadd.f32 %v7116_v51, %v7121_v53 }
  0xdc   : > { %5659 = vmatmul.msk.f32.gmra.mxu1 %vm451_vm1, %v7119_v52 }
  0xdd   : > { %5594 = vmatmul.msk.f32.gmra.mxu0 %vm451_vm1, %v7124_v54 }
  0xde   : > { %v1543_v56 = vpop.f32.mrf.mxu2  ;;  %v2077_v57 = vpop.f32.mrf.mxu3 }
  0xdf   : > { %v1733_v58 = vadd.f32 %v1543_v56, %v1073_v55  ;;  %v7190_v56 = vld [vmem:[%s6802_s8 + $0x1f1] sm:$0xff] }
  0xe1   : > { %v7136_v59 = vadd.f32 %v2077_v57, %v1733_v58  ;;  %v7138_v63 = vpop.f32.mrf.mxu1 }
  0xe2   : > { %v7143_v5 = vpop.f32.mrf.mxu0 }
  0xe3   : > { %9421 = vst [vmem:[#allocation5_spill] sm:$0xff] %v7136_v59  ;;  %5782 = vmatmul.msk.f32.gmra.mxu2 %vm451_vm1, %v6995_v11  ;;  %5912 = vmatmul.msk.f32.gmra.mxu3 %vm451_vm1, %v7000_v13  ;;  %v7163_v11 = vld [vmem:[%s6802_s8 + $0x1e0] sm:$0xff]  ;;  %v1100_v51 = vadd.f32 %v7138_v63, %v7143_v5  ;;  %v7935_v59 = vld [vmem:[%s7618_s14 + $0x70] sm:$0xff] }
  0xe4   : > { %5660 = vmatmul.msk.f32.gmra.mxu1 %vm451_vm1, %v7141_v1 }
  0xe5   : > { %5595 = vmatmul.msk.f32.gmra.mxu0 %vm451_vm1, %v7146_v7 }
  0xe6   : > { %v1546_v0 = vpop.f32.mrf.mxu2  ;;  %v2080_v34 = vpop.f32.mrf.mxu3 }
  0xe7   : > { %v1734_v35 = vadd.f32 %v1546_v0, %v1076_v62 }
  0xe9   : > { %v7158_v43 = vadd.f32 %v2080_v34, %v1734_v35  ;;  %v7160_v45 = vpop.f32.mrf.mxu1  ;;  %v7212_v34 = vld [vmem:[%s6802_s8 + $0x201] sm:$0xff] }
  0xea   : > { %v7165_v13 = vpop.f32.mrf.mxu0 }
  0xeb   : > { %9422 = vst [vmem:[#allocation6_spill] sm:$0xff] %v7158_v43  ;;  %5783 = vmatmul.msk.f32.gmra.mxu2 %vm451_vm1, %v7015_v17  ;;  %5913 = vmatmul.msk.f32.gmra.mxu3 %vm451_vm1, %v7020_v19  ;;  %v7185_v17 = vld [vmem:[%s6802_s8 + $0x1f0] sm:$0xff]  ;;  %v1103_v63 = vadd.f32 %v7160_v45, %v7165_v13  ;;  %v7913_v43 = vld [vmem:[%s7618_s14 + $0x60] sm:$0xff] }
  0xec   : > { %5661 = vmatmul.msk.f32.gmra.mxu1 %vm451_vm1, %v7163_v11 }
  0xed   : > { %5596 = vmatmul.msk.f32.gmra.mxu0 %vm451_vm1, %v7168_v46 }
  0xee   : > { %v1549_v6 = vpop.f32.mrf.mxu2  ;;  %v2083_v47 = vpop.f32.mrf.mxu3 }
  0xef   : > { %v1735_v48 = vadd.f32 %v1549_v6, %v1079_v4 }
  0xf1   : > { %v7180_v49 = vadd.f32 %v2083_v47, %v1735_v48  ;;  %v7182_v55 = vpop.f32.mrf.mxu1  ;;  %v7234_v48 = vld [vmem:[%s6802_s8 + $0x211] sm:$0xff] }
  0xf2   : > { %v7187_v19 = vpop.f32.mrf.mxu0 }
  0xf3   : > { %9423 = vst [vmem:[#allocation7_spill] sm:$0xff] %v7180_v49  ;;  %5784 = vmatmul.msk.f32.gmra.mxu2 %vm451_vm1, %v7037_v23  ;;  %5914 = vmatmul.msk.f32.gmra.mxu3 %vm451_vm1, %v7042_v25  ;;  %v7207_v23 = vld [vmem:[%s6802_s8 + $0x200] sm:$0xff]  ;;  %v1106_v45 = vadd.f32 %v7182_v55, %v7187_v19  ;;  %v7891_v49 = vld [vmem:[%s7618_s14 + $0x50] sm:$0xff] }
  0xf4   : > { %5662 = vmatmul.msk.f32.gmra.mxu1 %vm451_vm1, %v7185_v17 }
  0xf5   : > { %5597 = vmatmul.msk.f32.gmra.mxu0 %vm451_vm1, %v7190_v56 }
  0xf6   : > { %v1552_v12 = vpop.f32.mrf.mxu2  ;;  %v2086_v57 = vpop.f32.mrf.mxu3 }
  0xf7   : > { %v1736_v58 = vadd.f32 %v1552_v12, %v1082_v10 }
  0xf9   : > { %v7202_v62 = vadd.f32 %v2086_v57, %v1736_v58  ;;  %v7204_v0 = vpop.f32.mrf.mxu1  ;;  %v5721_v57 = vld [vmem:[%s6802_s8 + $0x1a0] sm:$0xff] }
  0xfa   : > { %v7209_v25 = vpop.f32.mrf.mxu0  ;;  %v5851_v58 = vld [vmem:[%s6802_s8 + $0x1a1] sm:$0xff] }
  0xfb   : > { %9424 = vst [vmem:[#allocation8_spill] sm:$0xff] %v7202_v62  ;;  %5785 = vmatmul.msk.f32.gmra.mxu2 %vm451_vm1, %v7059_v29  ;;  %5915 = vmatmul.msk.f32.gmra.mxu3 %vm451_vm1, %v7064_v31  ;;  %v7229_v31 = vld [vmem:[%s6802_s8 + $0x210] sm:$0xff]  ;;  %v1109_v55 = vadd.f32 %v7204_v0, %v7209_v25  ;;  %v7869_v62 = vld [vmem:[%s7618_s14 + $0x40] sm:$0xff] }
  0xfc   : > { %5663 = vmatmul.msk.f32.gmra.mxu1 %vm451_vm1, %v7207_v23 }
  0xfd   : > { %5598 = vmatmul.msk.f32.gmra.mxu0 %vm451_vm1, %v7212_v34 }
  0xfe   : > { %v1555_v18 = vpop.f32.mrf.mxu2  ;;  %v2089_v35 = vpop.f32.mrf.mxu3 }
  0xff   : > { %v1737_v4 = vadd.f32 %v1555_v18, %v1085_v16 }
 0x101   : > { %v7224_v6 = vadd.f32 %v2089_v35, %v1737_v4  ;;  %v7226_v29 = vpop.f32.mrf.mxu1  ;;  %v7258_v35 = vld [vmem:[%s6802_s8 + $0x221] sm:$0xff] }
 0x102   : > { %v7231_v47 = vpop.f32.mrf.mxu0 }
 0x103   : > { %9425 = vst [vmem:[#allocation9_spill] sm:$0xff] %v7224_v6  ;;  %5786 = vmatmul.msk.f32.gmra.mxu2 %vm451_vm1, %v7083_v37  ;;  %5916 = vmatmul.msk.f32.gmra.mxu3 %vm451_vm1, %v7088_v39  ;;  %v7253_v39 = vld [vmem:[%s6802_s8 + $0x220] sm:$0xff]  ;;  %v1112_v0 = vadd.f32 %v7226_v29, %v7231_v47  ;;  %v7803_v6 = vld [vmem:[%s7618_s14 + $0x10] sm:$0xff] }
 0x104   : > { %5664 = vmatmul.msk.f32.gmra.mxu1 %vm451_vm1, %v7229_v31 }
 0x105   : > { %5599 = vmatmul.msk.f32.gmra.mxu0 %vm451_vm1, %v7234_v48 }
 0x106   : > { %v1558_v24 = vpop.f32.mrf.mxu2  ;;  %v2092_v10 = vpop.f32.mrf.mxu3 }
 0x107   : > { %v1738_v12 = vadd.f32 %v1558_v24, %v1088_v22 }
 0x109   : > { %v7248_v16 = vadd.f32 %v2092_v10, %v1738_v12  ;;  %v7250_v37 = vpop.f32.mrf.mxu1  ;;  %v352_v12 = vld [vmem:[%s6802_s8 + $0x240] sm:$0xff] }
 0x10a   : > { %v7255_v18 = vpop.f32.mrf.mxu0 }
 0x10b   : > { %9426 = vst [vmem:[#allocation10_spill] sm:$0xff] %v7248_v16  ;;  %5787 = vmatmul.msk.f32.gmra.mxu2 %vm451_vm1, %v5721_v57  ;;  %5917 = vmatmul.msk.f32.gmra.mxu3 %vm451_vm1, %v5851_v58  ;;  %v417_v58 = vld [vmem:[%s6802_s8 + $0x241] sm:$0xff]  ;;  %v1115_v29 = vadd.f32 %v7250_v37, %v7255_v18  ;;  %v7784_v16 = vld [vmem:[%s7618_s14 + $0x71] sm:$0xff] }
 0x10c   : > { %5665 = vmatmul.msk.f32.gmra.mxu1 %vm451_vm1, %v7253_v39 }
 0x10d   : > { %5600 = vmatmul.msk.f32.gmra.mxu0 %vm451_vm1, %v7258_v35 }
 0x10e   : > { %v1561_v30 = vpop.f32.mrf.mxu2  ;;  %v2095_v4 = vpop.f32.mrf.mxu3 }
 0x10f   : > { %v1739_v22 = vadd.f32 %v1561_v30, %v1091_v28 }
 0x111   : > { %v7268_v24 = vadd.f32 %v2095_v4, %v1739_v22  ;;  %v7270_v10 = vpop.f32.mrf.mxu1 }
 0x112   : > { %v7273_v57 = vpop.f32.mrf.mxu0 }
 0x113   : > { %9427 = vst [vmem:[#allocation11_spill] sm:$0xff] %v7268_v24  ;;  %5788 = vmatmul.msk.f32.gmra.mxu2 %vm451_vm1, %v7119_v52  ;;  %5918 = vmatmul.msk.f32.gmra.mxu3 %vm451_vm1, %v7124_v54  ;;  %v7289_v52 = vld [vmem:[%s6802_s8 + $0x250] sm:$0xff]  ;;  %v1118_v37 = vadd.f32 %v7270_v10, %v7273_v57 }
 0x114   : > { %5666 = vmatmul.msk.f32.gmra.mxu1 %vm451_vm1, %v352_v12  ;;  %v7294_v54 = vld [vmem:[%s6802_s8 + $0x251] sm:$0xff] }
 0x115   : > { %5601 = vmatmul.msk.f32.gmra.mxu0 %vm451_vm1, %v417_v58 }
 0x116   : > { %v1564_v38 = vpop.f32.mrf.mxu2  ;;  %v2098_v28 = vpop.f32.mrf.mxu3 }
 0x117   : > { %v1740_v30 = vadd.f32 %v1564_v38, %v1094_v36 }
 0x119   : > { %v7284_v4 = vadd.f32 %v2098_v28, %v1740_v30  ;;  %v7286_v22 = vpop.f32.mrf.mxu1  ;;  %v7316_v28 = vld [vmem:[%s6802_s8 + $0x261] sm:$0xff] }
 0x11a   : > { %v7291_v24 = vpop.f32.mrf.mxu0 }
 0x11b   : > { %9428 = vst [vmem:[#allocation12_spill] sm:$0xff] %v7284_v4  ;;  %5789 = vmatmul.msk.f32.gmra.mxu2 %vm451_vm1, %v7141_v1  ;;  %5919 = vmatmul.msk.f32.gmra.mxu3 %vm451_vm1, %v7146_v7  ;;  %v7311_v1 = vld [vmem:[%s6802_s8 + $0x260] sm:$0xff]  ;;  %v7428_v4 = vld [vmem:[%s6802_s8 + $0x2b1] sm:$0xff]  ;;  %v1121_v10 = vadd.f32 %v7286_v22, %v7291_v24 }
 0x11c   : > { %5667 = vmatmul.msk.f32.gmra.mxu1 %vm451_vm1, %v7289_v52 }
 0x11d   : > { %5602 = vmatmul.msk.f32.gmra.mxu0 %vm451_vm1, %v7294_v54 }
 0x11e   : > { %v1567_v44 = vpop.f32.mrf.mxu2  ;;  %v2101_v12 = vpop.f32.mrf.mxu3 }
 0x11f   : > { %v1741_v58 = vadd.f32 %v1567_v44, %v1097_v42 }
 0x121   : > { %v7306_v36 = vadd.f32 %v2101_v12, %v1741_v58  ;;  %v7308_v38 = vpop.f32.mrf.mxu1  ;;  %v7338_v58 = vld [vmem:[%s6802_s8 + $0x271] sm:$0xff] }
 0x122   : > { %v7313_v7 = vpop.f32.mrf.mxu0 }
 0x123   : > { %9429 = vst [vmem:[#allocation13_spill] sm:$0xff] %v7306_v36  ;;  %5790 = vmatmul.msk.f32.gmra.mxu2 %vm451_vm1, %v7163_v11  ;;  %5920 = vmatmul.msk.f32.gmra.mxu3 %vm451_vm1, %v7168_v46  ;;  %v7333_v11 = vld [vmem:[%s6802_s8 + $0x270] sm:$0xff]  ;;  %v1124_v24 = vadd.f32 %v7308_v38, %v7313_v7 }
 0x124   : > { %5668 = vmatmul.msk.f32.gmra.mxu1 %vm451_vm1, %v7311_v1 }
 0x125   : > { %5603 = vmatmul.msk.f32.gmra.mxu0 %vm451_vm1, %v7316_v28 }
 0x126   : > { %v1570_v53 = vpop.f32.mrf.mxu2  ;;  %v2104_v30 = vpop.f32.mrf.mxu3 }
 0x127   : > { %v1742_v42 = vadd.f32 %v1570_v53, %v1100_v51 }
 0x129   : > { %v7328_v44 = vadd.f32 %v2104_v30, %v1742_v42  ;;  %v7330_v12 = vpop.f32.mrf.mxu1 }
 0x12a   : > { %v7335_v46 = vpop.f32.mrf.mxu0 }
 0x12b   : > { %9430 = vst [vmem:[#allocation14_spill] sm:$0xff] %v7328_v44  ;;  %5791 = vmatmul.msk.f32.gmra.mxu2 %vm451_vm1, %v7185_v17  ;;  %5921 = vmatmul.msk.f32.gmra.mxu3 %vm451_vm1, %v7190_v56  ;;  %v7355_v17 = vld [vmem:[%s6802_s8 + $0x280] sm:$0xff]  ;;  %v1127_v38 = vadd.f32 %v7330_v12, %v7335_v46 }
 0x12c   : > { %5669 = vmatmul.msk.f32.gmra.mxu1 %vm451_vm1, %v7333_v11  ;;  %v7360_v44 = vld [vmem:[%s6802_s8 + $0x281] sm:$0xff] }
 0x12d   : > { %5604 = vmatmul.msk.f32.gmra.mxu0 %vm451_vm1, %v7338_v58 }
 0x12e   : > { %v1573_v5 = vpop.f32.mrf.mxu2  ;;  %v2107_v51 = vpop.f32.mrf.mxu3 }
 0x12f   : > { %v1743_v53 = vadd.f32 %v1573_v5, %v1103_v63 }
 0x131   : > { %v7350_v30 = vadd.f32 %v2107_v51, %v1743_v53  ;;  %v7352_v42 = vpop.f32.mrf.mxu1 }
 0x132   : > { %v7357_v56 = vpop.f32.mrf.mxu0 }
 0x133   : > { %9431 = vst [vmem:[#allocation15_spill] sm:$0xff] %v7350_v30  ;;  %5792 = vmatmul.msk.f32.gmra.mxu2 %vm451_vm1, %v7207_v23  ;;  %5922 = vmatmul.msk.f32.gmra.mxu3 %vm451_vm1, %v7212_v34  ;;  %v7377_v23 = vld [vmem:[%s6802_s8 + $0x290] sm:$0xff]  ;;  %v1130_v12 = vadd.f32 %v7352_v42, %v7357_v56  ;;  %v6212_v42 = vld [vmem:[%s9415_s2 + $0x18] sm:$0xf] }
 0x134   : > { %5670 = vmatmul.msk.f32.gmra.mxu1 %vm451_vm1, %v7355_v17  ;;  %v7382_v30 = vld [vmem:[%s6802_s8 + $0x291] sm:$0xff]  ;;  %6213 = vmatpush.msk.msra.mxu0 %vm644_vm0, %v6212_v42 }
 0x135   : > { %5605 = vmatmul.msk.f32.gmra.mxu0 %vm451_vm1, %v7360_v44  ;;  %6278 = vmatpush.msk.msra.mxu1 %vm644_vm0, %v6212_v42 }
 0x136   : > { %v1576_v13 = vpop.f32.mrf.mxu2  ;;  %v2110_v63 = vpop.f32.mrf.mxu3 }
 0x137   : > { %v1744_v5 = vadd.f32 %v1576_v13, %v1106_v45 }
 0x139   : > { %v7372_v51 = vadd.f32 %v2110_v63, %v1744_v5  ;;  %v7374_v53 = vpop.f32.mrf.mxu1 }
 0x13a   : > { %v7379_v34 = vpop.f32.mrf.mxu0 }
 0x13b   : > { %9432 = vst [vmem:[#allocation16_spill] sm:$0xff] %v7372_v51  ;;  %5793 = vmatmul.msk.f32.gmra.mxu2 %vm451_vm1, %v7229_v31  ;;  %5923 = vmatmul.msk.f32.gmra.mxu3 %vm451_vm1, %v7234_v48  ;;  %v7399_v48 = vld [vmem:[%s6802_s8 + $0x2a0] sm:$0xff]  ;;  %v1133_v56 = vadd.f32 %v7374_v53, %v7379_v34  ;;  %v7579_v53 = vld [vmem:[%s6802_s8 + $0x331] sm:$0xff] }
 0x13c   : > { %5671 = vmatmul.msk.f32.gmra.mxu1 %vm451_vm1, %v7377_v23  ;;  %v7404_v51 = vld [vmem:[%s6802_s8 + $0x2a1] sm:$0xff] }
 0x13d   : > { %5606 = vmatmul.msk.f32.gmra.mxu0 %vm451_vm1, %v7382_v30 }
 0x13e   : > { %v1579_v19 = vpop.f32.mrf.mxu2  ;;  %v2113_v45 = vpop.f32.mrf.mxu3 }
 0x13f   : > { %v1745_v13 = vadd.f32 %v1579_v19, %v1109_v55 }
 0x141   : > { %v7394_v63 = vadd.f32 %v2113_v45, %v1745_v13  ;;  %v7396_v31 = vpop.f32.mrf.mxu1  ;;  %v5729_v45 = vld [vmem:[%s6802_s8 + $0x230] sm:$0xff] }
 0x142   : > { %v7401_v5 = vpop.f32.mrf.mxu0  ;;  %v5859_v13 = vld [vmem:[%s6802_s8 + $0x231] sm:$0xff] }
 0x143   : > { %9433 = vst [vmem:[#allocation17_spill] sm:$0xff] %v7394_v63  ;;  %5794 = vmatmul.msk.f32.gmra.mxu2 %vm451_vm1, %v7253_v39  ;;  %5924 = vmatmul.msk.f32.gmra.mxu3 %vm451_vm1, %v7258_v35  ;;  %v7423_v35 = vld [vmem:[%s6802_s8 + $0x2b0] sm:$0xff]  ;;  %v1136_v34 = vadd.f32 %v7396_v31, %v7401_v5 }
 0x144   : > { %5672 = vmatmul.msk.f32.gmra.mxu1 %vm451_vm1, %v7399_v48 }
 0x145   : > { %5607 = vmatmul.msk.f32.gmra.mxu0 %vm451_vm1, %v7404_v51 }
 0x146   : > { %v1582_v25 = vpop.f32.mrf.mxu2  ;;  %v2116_v55 = vpop.f32.mrf.mxu3 }
 0x147   : > { %v1746_v19 = vadd.f32 %v1582_v25, %v1112_v0 }
 0x149   : > { %v7418_v63 = vadd.f32 %v2116_v55, %v1746_v19  ;;  %v7420_v39 = vpop.f32.mrf.mxu1 }
 0x14a   : > { %v7425_v36 = vpop.f32.mrf.mxu0 }
 0x14b   : > { %9434 = vst [vmem:[#allocation18_spill] sm:$0xff] %v7418_v63  ;;  %5795 = vmatmul.msk.f32.gmra.mxu2 %vm451_vm1, %v5729_v45  ;;  %5925 = vmatmul.msk.f32.gmra.mxu3 %vm451_vm1, %v5859_v13  ;;  %v360_v45 = vld [vmem:[%s6802_s8 + $0x2d0] sm:$0xff]  ;;  %v1139_v31 = vadd.f32 %v7420_v39, %v7425_v36 }
 0x14c   : > { %5673 = vmatmul.msk.f32.gmra.mxu1 %vm451_vm1, %v7423_v35  ;;  %v425_v63 = vld [vmem:[%s6802_s8 + $0x2d1] sm:$0xff] }
 0x14d   : > { %5608 = vmatmul.msk.f32.gmra.mxu0 %vm451_vm1, %v7428_v4 }
 0x14e   : > { %v1585_v47 = vpop.f32.mrf.mxu2  ;;  %v2119_v0 = vpop.f32.mrf.mxu3 }
 0x14f   : > { %v1747_v25 = vadd.f32 %v1585_v47, %v1115_v29 }
 0x151   : > { %v7438_v55 = vadd.f32 %v2119_v0, %v1747_v25  ;;  %v7440_v19 = vpop.f32.mrf.mxu1 }
 0x152   : > { %v7443_v13 = vpop.f32.mrf.mxu0 }
 0x153   : > { %9435 = vst [vmem:[#allocation19_spill] sm:$0xff] %v7438_v55  ;;  %5796 = vmatmul.msk.f32.gmra.mxu2 %vm451_vm1, %v7289_v52  ;;  %5926 = vmatmul.msk.f32.gmra.mxu3 %vm451_vm1, %v7294_v54  ;;  %v7459_v52 = vld [vmem:[%s6802_s8 + $0x2e0] sm:$0xff]  ;;  %v1142_v36 = vadd.f32 %v7440_v19, %v7443_v13 }
 0x154   : > { %5674 = vmatmul.msk.f32.gmra.mxu1 %vm451_vm1, %v360_v45  ;;  %v7464_v54 = vld [vmem:[%s6802_s8 + $0x2e1] sm:$0xff] }
 0x155   : > { %5609 = vmatmul.msk.f32.gmra.mxu0 %vm451_vm1, %v425_v63 }
 0x156   : > { %v1588_v18 = vpop.f32.mrf.mxu2  ;;  %v2122_v29 = vpop.f32.mrf.mxu3 }
 0x157   : > { %v1748_v47 = vadd.f32 %v1588_v18, %v1118_v37 }
 0x159   : > { %v7454_v0 = vadd.f32 %v2122_v29, %v1748_v47  ;;  %v7456_v25 = vpop.f32.mrf.mxu1  ;;  %v7486_v29 = vld [vmem:[%s6802_s8 + $0x2f1] sm:$0xff] }
 0x15a   : > { %v7461_v55 = vpop.f32.mrf.mxu0 }
 0x15b   : > { %9436 = vst [vmem:[#allocation20_spill] sm:$0xff] %v7454_v0  ;;  %5797 = vmatmul.msk.f32.gmra.mxu2 %vm451_vm1, %v7311_v1  ;;  %5927 = vmatmul.msk.f32.gmra.mxu3 %vm451_vm1, %v7316_v28  ;;  %v7481_v1 = vld [vmem:[%s6802_s8 + $0x2f0] sm:$0xff]  ;;  %v7603_v0 = vld [vmem:[%s6802_s8 + $0x341] sm:$0xff]  ;;  %v1145_v19 = vadd.f32 %v7456_v25, %v7461_v55 }
 0x15c   : > { %5675 = vmatmul.msk.f32.gmra.mxu1 %vm451_vm1, %v7459_v52 }
 0x15d   : > { %5610 = vmatmul.msk.f32.gmra.mxu0 %vm451_vm1, %v7464_v54 }
 0x15e   : > { %v1591_v57 = vpop.f32.mrf.mxu2  ;;  %v2125_v63 = vpop.f32.mrf.mxu3 }
 0x15f   : > { %v1749_v45 = vadd.f32 %v1591_v57, %v1121_v10 }
 0x161   : > { %v7476_v37 = vadd.f32 %v2125_v63, %v1749_v45  ;;  %v7478_v18 = vpop.f32.mrf.mxu1  ;;  %v7508_v45 = vld [vmem:[%s6802_s8 + $0x301] sm:$0xff] }
 0x162   : > { %v7483_v28 = vpop.f32.mrf.mxu0 }
 0x163   : > { %9437 = vst [vmem:[#allocation21_spill] sm:$0xff] %v7476_v37  ;;  %5798 = vmatmul.msk.f32.gmra.mxu2 %vm451_vm1, %v7333_v11  ;;  %5928 = vmatmul.msk.f32.gmra.mxu3 %vm451_vm1, %v7338_v58  ;;  %v7503_v11 = vld [vmem:[%s6802_s8 + $0x300] sm:$0xff]  ;;  %v1148_v55 = vadd.f32 %v7478_v18, %v7483_v28 }
 0x164   : > { %5676 = vmatmul.msk.f32.gmra.mxu1 %vm451_vm1, %v7481_v1 }
 0x165   : > { %5611 = vmatmul.msk.f32.gmra.mxu0 %vm451_vm1, %v7486_v29 }
 0x166   : > { %v1594_v22 = vpop.f32.mrf.mxu2  ;;  %v2128_v47 = vpop.f32.mrf.mxu3 }
 0x167   : > { %v1750_v10 = vadd.f32 %v1594_v22, %v1124_v24 }
 0x169   : > { %v7498_v57 = vadd.f32 %v2128_v47, %v1750_v10  ;;  %v7500_v63 = vpop.f32.mrf.mxu1 }
 0x16a   : > { %v7505_v58 = vpop.f32.mrf.mxu0 }
 0x16b   : > { %9438 = vst [vmem:[#allocation22_spill] sm:$0xff] %v7498_v57  ;;  %5799 = vmatmul.msk.f32.gmra.mxu2 %vm451_vm1, %v7355_v17  ;;  %5929 = vmatmul.msk.f32.gmra.mxu3 %vm451_vm1, %v7360_v44  ;;  %v7525_v17 = vld [vmem:[%s6802_s8 + $0x310] sm:$0xff]  ;;  %v1151_v18 = vadd.f32 %v7500_v63, %v7505_v58 }
 0x16c   : > { %5677 = vmatmul.msk.f32.gmra.mxu1 %vm451_vm1, %v7503_v11  ;;  %v7530_v57 = vld [vmem:[%s6802_s8 + $0x311] sm:$0xff] }
 0x16d   : > { %5612 = vmatmul.msk.f32.gmra.mxu0 %vm451_vm1, %v7508_v45 }
 0x16e   : > { %v1597_v7 = vpop.f32.mrf.mxu2  ;;  %v2131_v24 = vpop.f32.mrf.mxu3 }
 0x16f   : > { %v1751_v22 = vadd.f32 %v1597_v7, %v1127_v38 }
 0x171   : > { %v7520_v47 = vadd.f32 %v2131_v24, %v1751_v22  ;;  %v7522_v10 = vpop.f32.mrf.mxu1 }
 0x172   : > { %v7527_v44 = vpop.f32.mrf.mxu0 }
 0x173   : > { %9439 = vst [vmem:[#allocation23_spill] sm:$0xff] %v7520_v47  ;;  %5800 = vmatmul.msk.f32.gmra.mxu2 %vm451_vm1, %v7377_v23  ;;  %5930 = vmatmul.msk.f32.gmra.mxu3 %vm451_vm1, %v7382_v30  ;;  %v7547_v23 = vld [vmem:[%s6802_s8 + $0x320] sm:$0xff]  ;;  %v1154_v63 = vadd.f32 %v7522_v10, %v7527_v44  ;;  %v6343_v10 = vld [vmem:[%s9415_s2 + $0x1c] sm:$0xf] }
 0x174   : > { %5678 = vmatmul.msk.f32.gmra.mxu1 %vm451_vm1, %v7525_v17  ;;  %v7552_v47 = vld [vmem:[%s6802_s8 + $0x321] sm:$0xff] }
 0x175   : > { %5613 = vmatmul.msk.f32.gmra.mxu0 %vm451_vm1, %v7530_v57 }
 0x176   : > { %v1600_v46 = vpop.f32.mrf.mxu2  ;;  %v2134_v38 = vpop.f32.mrf.mxu3 }
 0x177   : > { %v1752_v7 = vadd.f32 %v1600_v46, %v1130_v12 }
 0x179   : > { %v7542_v24 = vadd.f32 %v2134_v38, %v1752_v7  ;;  %v7544_v22 = vpop.f32.mrf.mxu1  ;;  %v7574_v7 = vld [vmem:[%s6802_s8 + $0x330] sm:$0xff] }
 0x17a   : > { %v7549_v30 = vpop.f32.mrf.mxu0 }
 0x17b   : > { %9440 = vst [vmem:[#allocation24_spill] sm:$0xff] %v7542_v24  ;;  %5801 = vmatmul.msk.f32.gmra.mxu2 %vm451_vm1, %v7399_v48  ;;  %5931 = vmatmul.msk.f32.gmra.mxu3 %vm451_vm1, %v7404_v51  ;;  %v1157_v44 = vadd.f32 %v7544_v22, %v7549_v30 }
 0x17c   : > { %5679 = vmatmul.msk.f32.gmra.mxu1 %vm451_vm1, %v7547_v23 }
 0x17d   : > { %5614 = vmatmul.msk.f32.gmra.mxu0 %vm451_vm1, %v7552_v47 }
 0x17e   : > { %v1603_v48 = vpop.f32.mrf.mxu2  ;;  %v2137_v51 = vpop.f32.mrf.mxu3 }
 0x17f   : > { %v1753_v12 = vadd.f32 %v1603_v48, %v1133_v56 }
 0x181   : > { %v7569_v46 = vadd.f32 %v2137_v51, %v1753_v12  ;;  %v7571_v38 = vpop.f32.mrf.mxu1  ;;  %v5737_v51 = vld [vmem:[%s6802_s8 + $0x2c0] sm:$0xff] }
 0x182   : > { %v7576_v24 = vpop.f32.mrf.mxu0  ;;  %v5867_v12 = vld [vmem:[%s6802_s8 + $0x2c1] sm:$0xff] }
 0x183   : > { %9441 = vst [vmem:[#allocation25_spill] sm:$0xff] %v7569_v46  ;;  %5802 = vmatmul.msk.f32.gmra.mxu2 %vm451_vm1, %v7423_v35  ;;  %5932 = vmatmul.msk.f32.gmra.mxu3 %vm451_vm1, %v7428_v4  ;;  %v7598_v4 = vld [vmem:[%s6802_s8 + $0x340] sm:$0xff]  ;;  %v1160_v22 = vadd.f32 %v7571_v38, %v7576_v24 }
 0x184   : > { %5680 = vmatmul.msk.f32.gmra.mxu1 %vm451_vm1, %v7574_v7 }
 0x185   : > { %5615 = vmatmul.msk.f32.gmra.mxu0 %vm451_vm1, %v7579_v53 }
 0x186   : > { %v1606_v42 = vpop.f32.mrf.mxu2  ;;  %v2140_v56 = vpop.f32.mrf.mxu3 }
 0x187   : > { %v1754_v48 = vadd.f32 %v1606_v42, %v1136_v34 }
 0x189   : > { %v7593_v46 = vadd.f32 %v2140_v56, %v1754_v48  ;;  %v7595_v35 = vpop.f32.mrf.mxu1 }
 0x18a   : > { %v7600_v37 = vpop.f32.mrf.mxu0 }
 0x18b   : > { %9442 = vst [vmem:[#allocation26_spill] sm:$0xff] %v7593_v46  ;;  %5803 = vmatmul.msk.f32.gmra.mxu2 %vm451_vm1, %v5737_v51  ;;  %5933 = vmatmul.msk.f32.gmra.mxu3 %vm451_vm1, %v5867_v12  ;;  %v368_v51 = vld [vmem:[%s6802_s8 + $0x360] sm:$0xff]  ;;  %v1163_v24 = vadd.f32 %v7595_v35, %v7600_v37 }
 0x18c   : > { %5681 = vmatmul.msk.f32.gmra.mxu1 %vm451_vm1, %v7598_v4  ;;  %v2397_v46 = vld [vmem:[%s7618_s14 + $0x1] sm:$0xff] }
 0x18d   : > { %5616 = vmatmul.msk.f32.gmra.mxu0 %vm451_vm1, %v7603_v0 }
 0x18e   : > { %v1609_v5 = vpop.f32.mrf.mxu2  ;;  %v2143_v34 = vpop.f32.mrf.mxu3 }
 0x18f   : > { %v1755_v42 = vadd.f32 %v1609_v5, %v1139_v31 }
 0x191   : > { %v7620_v56 = vadd.f32 %v2143_v34, %v1755_v42  ;;  %v7622_v48 = vpop.f32.mrf.mxu1 }
 0x192   : > { %v7625_v12 = vpop.f32.mrf.mxu0 }
 0x193   : > { %9443 = vst [vmem:[#allocation27_spill] sm:$0xff] %v7620_v56  ;;  %5804 = vmatmul.msk.f32.gmra.mxu2 %vm451_vm1, %v7459_v52  ;;  %5934 = vmatmul.msk.f32.gmra.mxu3 %vm451_vm1, %v7464_v54  ;;  %v7641_v52 = vld [vmem:[%s6802_s8 + $0x370] sm:$0xff]  ;;  %v1166_v37 = vadd.f32 %v7622_v48, %v7625_v12 }
 0x194   : > { %5682 = vmatmul.msk.f32.gmra.mxu1 %vm451_vm1, %v368_v51  ;;  %v7646_v54 = vld [vmem:[%s7618_s14 + $0x11] sm:$0xff] }
 0x195   : > { %6017 = vmatmul.msk.f32.vlgmr.msrb.gmra.mxu0 %vm451_vm1, %v2397_v46 }
 0x196   : > { %v1612_v39 = vpop.f32.mrf.mxu2  ;;  %v2146_v31 = vpop.f32.mrf.mxu3  ;;  %6344 = vmatpush.msk.msrb.mxu0 %vm644_vm0, %v6343_v10 }
 0x197   : > { %v1756_v5 = vadd.f32 %v1612_v39, %v1142_v36 }
 0x199   : > { %v7636_v34 = vadd.f32 %v2146_v31, %v1756_v5  ;;  %v7638_v42 = vpop.f32.mrf.mxu1  ;;  %v7668_v31 = vld [vmem:[%s7618_s14 + $0x21] sm:$0xff] }
 0x19a   : > { %v7643_v56 = vpop.f32.mrf.mxu0 }
 0x19b   : > { %9444 = vst [vmem:[#allocation28_spill] sm:$0xff] %v7636_v34  ;;  %5805 = vmatmul.msk.f32.gmra.mxu2 %vm451_vm1, %v7481_v1  ;;  %5935 = vmatmul.msk.f32.gmra.mxu3 %vm451_vm1, %v7486_v29  ;;  %v7663_v1 = vld [vmem:[%s6802_s8 + $0x380] sm:$0xff]  ;;  %v1169_v48 = vadd.f32 %v7638_v42, %v7643_v56 }
 0x19c   : > { %5683 = vmatmul.msk.f32.gmra.mxu1 %vm451_vm1, %v7641_v52 }
 0x19d   : > { %6018 = vmatmul.msk.f32.gmra.mxu0 %vm451_vm1, %v7646_v54 }
 0x19e   : > { %v1615_v13 = vpop.f32.mrf.mxu2  ;;  %v2149_v46 = vpop.f32.mrf.mxu3 }
 0x19f   : > { %v1757_v51 = vadd.f32 %v1615_v13, %v1145_v19 }
 0x1a1   : > { %v7658_v36 = vadd.f32 %v2149_v46, %v1757_v51  ;;  %v7660_v39 = vpop.f32.mrf.mxu1  ;;  %v7690_v51 = vld [vmem:[%s7618_s14 + $0x31] sm:$0xff] }
 0x1a2   : > { %v7665_v29 = vpop.f32.mrf.mxu0 }
 0x1a3   : > { %9445 = vst [vmem:[#allocation29_spill] sm:$0xff] %v7658_v36  ;;  %5806 = vmatmul.msk.f32.gmra.mxu2 %vm451_vm1, %v7503_v11  ;;  %5936 = vmatmul.msk.f32.gmra.mxu3 %vm451_vm1, %v7508_v45  ;;  %v7685_v11 = vld [vmem:[%s6802_s8 + $0x390] sm:$0xff]  ;;  %v7760_v36 = vld [vmem:[%s7618_s14 + $0x61] sm:$0xff]  ;;  %v1172_v56 = vadd.f32 %v7660_v39, %v7665_v29 }
 0x1a4   : > { %5684 = vmatmul.msk.f32.gmra.mxu1 %vm451_vm1, %v7663_v1 }
 0x1a5   : > { %6019 = vmatmul.msk.f32.gmra.mxu0 %vm451_vm1, %v7668_v31 }
 0x1a6   : > { %v1618_v25 = vpop.f32.mrf.mxu2  ;;  %v2152_v5 = vpop.f32.mrf.mxu3 }
 0x1a7   : > { %v1758_v19 = vadd.f32 %v1618_v25, %v1148_v55 }
 0x1a9   : > { %v7680_v13 = vadd.f32 %v2152_v5, %v1758_v19  ;;  %v7682_v46 = vpop.f32.mrf.mxu1 }
 0x1aa   : > { %v7687_v45 = vpop.f32.mrf.mxu0 }
 0x1ab   : > { %9446 = vst [vmem:[#allocation30_spill] sm:$0xff] %v7680_v13  ;;  %5807 = vmatmul.msk.f32.gmra.mxu2 %vm451_vm1, %v7525_v17  ;;  %5937 = vmatmul.msk.f32.gmra.mxu3 %vm451_vm1, %v7530_v57  ;;  %v7707_v17 = vld [vmem:[%s6802_s8 + $0x3a0] sm:$0xff]  ;;  %v1175_v39 = vadd.f32 %v7682_v46, %v7687_v45 }
 0x1ac   : > { %5685 = vmatmul.msk.f32.gmra.mxu1 %vm451_vm1, %v7685_v11  ;;  %v7712_v13 = vld [vmem:[%s7618_s14 + $0x41] sm:$0xff] }
 0x1ad   : > { %6020 = vmatmul.msk.f32.gmra.mxu0 %vm451_vm1, %v7690_v51 }
 0x1ae   : > { %v1621_v28 = vpop.f32.mrf.mxu2  ;;  %v2155_v55 = vpop.f32.mrf.mxu3 }
 0x1af   : > { %v1759_v25 = vadd.f32 %v1621_v28, %v1151_v18 }
 0x1b1   : > { %v7702_v5 = vadd.f32 %v2155_v55, %v1759_v25  ;;  %v7704_v19 = vpop.f32.mrf.mxu1 }
 0x1b2   : > { %v7709_v57 = vpop.f32.mrf.mxu0 }
 0x1b3   : > { %9447 = vst [vmem:[#allocation31_spill] sm:$0xff] %v7702_v5  ;;  %5808 = vmatmul.msk.f32.gmra.mxu2 %vm451_vm1, %v7547_v23  ;;  %5938 = vmatmul.msk.f32.gmra.mxu3 %vm451_vm1, %v7552_v47  ;;  %v7729_v23 = vld [vmem:[%s6802_s8 + $0x3b0] sm:$0xff]  ;;  %v1178_v46 = vadd.f32 %v7704_v19, %v7709_v57 }
 0x1b4   : > { %5686 = vmatmul.msk.f32.gmra.mxu1 %vm451_vm1, %v7707_v17  ;;  %v7734_v5 = vld [vmem:[%s7618_s14 + $0x51] sm:$0xff] }
 0x1b5   : > { %6021 = vmatmul.msk.f32.gmra.mxu0 %vm451_vm1, %v7712_v13 }
 0x1b6   : > { %v1624_v58 = vpop.f32.mrf.mxu2  ;;  %v2158_v18 = vpop.f32.mrf.mxu3 }
 0x1b7   : > { %v1760_v28 = vadd.f32 %v1624_v58, %v1154_v63 }
 0x1b9   : > { %v7724_v55 = vadd.f32 %v2158_v18, %v1760_v28  ;;  %v7726_v25 = vpop.f32.mrf.mxu1  ;;  %v7755_v28 = vld [vmem:[%s6802_s8 + $0x3c0] sm:$0xff] }
 0x1ba   : > { %v7731_v47 = vpop.f32.mrf.mxu0 }
 0x1bb   : > { %9448 = vst [vmem:[#allocation32_spill] sm:$0xff] %v7724_v55  ;;  %5809 = vmatmul.msk.f32.gmra.mxu2 %vm451_vm1, %v7574_v7  ;;  %5939 = vmatmul.msk.f32.gmra.mxu3 %vm451_vm1, %v7579_v53  ;;  %v1181_v19 = vadd.f32 %v7726_v25, %v7731_v47 }
 0x1bc   : > { %5687 = vmatmul.msk.f32.gmra.mxu1 %vm451_vm1, %v7729_v23 }
 0x1bd   : > { %6022 = vmatmul.msk.f32.gmra.mxu0 %vm451_vm1, %v7734_v5 }
 0x1be   : > { %v1627_v63 = vpop.f32.mrf.mxu2  ;;  %v2161_v7 = vpop.f32.mrf.mxu3 }
 0x1bf   : > { %v1761_v53 = vadd.f32 %v1627_v63, %v1157_v44 }
 0x1c1   : > { %v7750_v58 = vadd.f32 %v2161_v7, %v1761_v53  ;;  %v7752_v18 = vpop.f32.mrf.mxu1  ;;  %v5745_v7 = vld [vmem:[%s6802_s8 + $0x350] sm:$0xff] }
 0x1c2   : > { %v7757_v55 = vpop.f32.mrf.mxu0  ;;  %v5875_v53 = vld [vmem:[%s6802_s8 + $0x351] sm:$0xff] }
 0x1c3   : > { %9449 = vst [vmem:[#allocation33_spill] sm:$0xff] %v7750_v58  ;;  %5810 = vmatmul.msk.f32.gmra.mxu2 %vm451_vm1, %v7598_v4  ;;  %5940 = vmatmul.msk.f32.gmra.mxu3 %vm451_vm1, %v7603_v0  ;;  %v7779_v0 = vld [vmem:[%s6802_s8 + $0x3d0] sm:$0xff]  ;;  %v1184_v25 = vadd.f32 %v7752_v18, %v7757_v55 }
 0x1c4   : > { %5688 = vmatmul.msk.f32.gmra.mxu1 %vm451_vm1, %v7755_v28 }
 0x1c5   : > { %6023 = vmatmul.msk.f32.gmra.mxu0 %vm451_vm1, %v7760_v36 }
 0x1c6   : > { %v1630_v30 = vpop.f32.mrf.mxu2  ;;  %v2164_v44 = vpop.f32.mrf.mxu3 }
 0x1c7   : > { %v1762_v63 = vadd.f32 %v1630_v30, %v1160_v22 }
 0x1c9   : > { %v7774_v58 = vadd.f32 %v2164_v44, %v1762_v63  ;;  %v7776_v4 = vpop.f32.mrf.mxu1  ;;  %v5876_v44 = vld [vmem:[%s6802_s8 + $0x371] sm:$0xff] }
 0x1ca   : > { %v7781_v34 = vpop.f32.mrf.mxu0 }
 0x1cb   : > { %9450 = vst [vmem:[#allocation34_spill] sm:$0xff] %v7774_v58  ;;  %5811 = vmatmul.msk.f32.gmra.mxu2 %vm451_vm1, %v5745_v7  ;;  %5941 = vmatmul.msk.f32.gmra.mxu3 %vm451_vm1, %v5875_v53  ;;  %v376_v7 = vld [vmem:[%s6802_s8 + $0x3f0] sm:$0xff]  ;;  %v1187_v55 = vadd.f32 %v7776_v4, %v7781_v34 }
 0x1cc   : > { %5689 = vmatmul.msk.f32.gmra.mxu1 %vm451_vm1, %v7779_v0 }
 0x1cd   : > { %6024 = vmatmul.msk.f32.gmra.mxu0 %vm451_vm1, %v7784_v16 }
 0x1ce   : > { %v1633_v38 = vpop.f32.mrf.mxu2  ;;  %v2167_v22 = vpop.f32.mrf.mxu3 }
 0x1cf   : > { %v1763_v30 = vadd.f32 %v1633_v38, %v1163_v24 }
 0x1d1   : > { %v7795_v63 = vadd.f32 %v2167_v22, %v1763_v30  ;;  %v7797_v58 = vpop.f32.mrf.mxu1  ;;  %v5877_v22 = vld [vmem:[%s6802_s8 + $0x381] sm:$0xff] }
 0x1d2   : > { %v7800_v53 = vpop.f32.mrf.mxu0 }
 0x1d3   : > { %9451 = vst [vmem:[#allocation35_spill] sm:$0xff] %v7795_v63  ;;  %5812 = vmatmul.msk.f32.gmra.mxu2 %vm451_vm1, %v7641_v52  ;;  %5942 = vmatmul.msk.f32.gmra.mxu3 %vm451_vm1, %v5876_v44  ;;  %v7820_v44 = vld [vmem:[%s6802_s8 + $0x400] sm:$0xff] }
 0x1d4   : > { %5690 = vmatmul.msk.f32.gmra.mxu1 %vm451_vm1, %v376_v7  ;;  %v7825_v63 = vld [vmem:[%s7618_s14 + $0x20] sm:$0xff] }
 0x1d5   : > { %6214 = vmatmul.msk.f32.vlgmr.msra.gmra.mxu0 %vm451_vm1, %v7803_v6 }
 0x1d6   : > { %6409 = vmatpush.msk.msra.mxu0 %vm644_vm0, %v6343_v10  ;;  %v1636_v35 = vpop.f32.mrf.mxu2  ;;  %v2170_v24 = vpop.f32.mrf.mxu3 }
 0x1d7   : > { %v1764_v38 = vadd.f32 %v1636_v35, %v1166_v37  ;;  %v5878_v35 = vld [vmem:[%s6802_s8 + $0x391] sm:$0xff] }
 0x1d9   : > { %v7815_v30 = vadd.f32 %v2170_v24, %v1764_v38  ;;  %v7817_v52 = vpop.f32.mrf.mxu1  ;;  %v7842_v38 = vld [vmem:[%s6802_s8 + $0x410] sm:$0xff] }
 0x1da   : > { %v7822_v7 = vpop.f32.mrf.mxu0 }
 0x1db   : > { %9452 = vst [vmem:[#allocation36_spill] sm:$0xff] %v7815_v30  ;;  %5813 = vmatmul.msk.f32.gmra.mxu2 %vm451_vm1, %v7663_v1  ;;  %5943 = vmatmul.msk.f32.gmra.mxu3 %vm451_vm1, %v5877_v22  ;;  %v7847_v30 = vld [vmem:[%s7618_s14 + $0x30] sm:$0xff] }
 0x1dc   : > { %5691 = vmatmul.msk.f32.gmra.mxu1 %vm451_vm1, %v7820_v44 }
 0x1dd   : > { %6215 = vmatmul.msk.f32.gmra.mxu0 %vm451_vm1, %v7825_v63 }
 0x1de   : > { %v1639_v12 = vpop.f32.mrf.mxu2  ;;  %v2173_v10 = vpop.f32.mrf.mxu3 }
 0x1df   : > { %v1765_v37 = vadd.f32 %v1639_v12, %v1169_v48 }
 0x1e1   : > { %v7837_v24 = vadd.f32 %v2173_v10, %v1765_v37  ;;  %v7839_v1 = vpop.f32.mrf.mxu1  ;;  %v5879_v10 = vld [vmem:[%s6802_s8 + $0x3a1] sm:$0xff] }
 0x1e2   : > { %v7844_v22 = vpop.f32.mrf.mxu0 }
 0x1e3   : > { %9453 = vst [vmem:[#allocation37_spill] sm:$0xff] %v7837_v24  ;;  %5814 = vmatmul.msk.f32.gmra.mxu2 %vm451_vm1, %v7685_v11  ;;  %5944 = vmatmul.msk.f32.gmra.mxu3 %vm451_vm1, %v5878_v35  ;;  %v7864_v35 = vld [vmem:[%s6802_s8 + $0x420] sm:$0xff] }
 0x1e4   : > { %5692 = vmatmul.msk.f32.gmra.mxu1 %vm451_vm1, %v7842_v38 }
 0x1e5   : > { %6216 = vmatmul.msk.f32.gmra.mxu0 %vm451_vm1, %v7847_v30 }
 0x1e6   : > { %v1642_v42 = vpop.f32.mrf.mxu2  ;;  %v2176_v48 = vpop.f32.mrf.mxu3 }
 0x1e7   : > { %v1766_v12 = vadd.f32 %v1642_v42, %v1172_v56 }
 0x1e9   : > { %v7859_v37 = vadd.f32 %v2176_v48, %v1766_v12  ;;  %v7861_v11 = vpop.f32.mrf.mxu1  ;;  %v5880_v48 = vld [vmem:[%s6802_s8 + $0x3b1] sm:$0xff] }
 0x1ea   : > { %v7866_v24 = vpop.f32.mrf.mxu0 }
 0x1eb   : > { %9454 = vst [vmem:[#allocation38_spill] sm:$0xff] %v7859_v37  ;;  %5815 = vmatmul.msk.f32.gmra.mxu2 %vm451_vm1, %v7707_v17  ;;  %5945 = vmatmul.msk.f32.gmra.mxu3 %vm451_vm1, %v5879_v10  ;;  %v7886_v10 = vld [vmem:[%s6802_s8 + $0x430] sm:$0xff] }
 0x1ec   : > { %5693 = vmatmul.msk.f32.gmra.mxu1 %vm451_vm1, %v7864_v35 }
 0x1ed   : > { %6217 = vmatmul.msk.f32.gmra.mxu0 %vm451_vm1, %v7869_v62 }
 0x1ee   : > { %v1645_v29 = vpop.f32.mrf.mxu2  ;;  %v2179_v56 = vpop.f32.mrf.mxu3 }
 0x1ef   : > { %v1767_v42 = vadd.f32 %v1645_v29, %v1175_v39 }
 0x1f1   : > { %v7881_v12 = vadd.f32 %v2179_v56, %v1767_v42  ;;  %v7883_v17 = vpop.f32.mrf.mxu1  ;;  %v5881_v56 = vld [vmem:[%s6802_s8 + $0x3c1] sm:$0xff] }
 0x1f2   : > { %v7888_v37 = vpop.f32.mrf.mxu0 }
 0x1f3   : > { %9455 = vst [vmem:[#allocation39_spill] sm:$0xff] %v7881_v12  ;;  %5816 = vmatmul.msk.f32.gmra.mxu2 %vm451_vm1, %v7729_v23  ;;  %5946 = vmatmul.msk.f32.gmra.mxu3 %vm451_vm1, %v5880_v48  ;;  %v7908_v48 = vld [vmem:[%s6802_s8 + $0x440] sm:$0xff] }
 0x1f4   : > { %5694 = vmatmul.msk.f32.gmra.mxu1 %vm451_vm1, %v7886_v10 }
 0x1f5   : > { %6218 = vmatmul.msk.f32.gmra.mxu0 %vm451_vm1, %v7891_v49 }
 0x1f6   : > { %v1648_v45 = vpop.f32.mrf.mxu2  ;;  %v2182_v39 = vpop.f32.mrf.mxu3 }
 0x1f7   : > { %v1768_v29 = vadd.f32 %v1648_v45, %v1178_v46 }
 0x1f9   : > { %v7903_v42 = vadd.f32 %v2182_v39, %v1768_v29  ;;  %v7905_v23 = vpop.f32.mrf.mxu1  ;;  %v5882_v39 = vld [vmem:[%s6802_s8 + $0x3d1] sm:$0xff] }
 0x1fa   : > { %v7910_v12 = vpop.f32.mrf.mxu0 }
 0x1fb   : > { %9456 = vst [vmem:[#allocation40_spill] sm:$0xff] %v7903_v42  ;;  %5817 = vmatmul.msk.f32.gmra.mxu2 %vm451_vm1, %v7755_v28  ;;  %5947 = vmatmul.msk.f32.gmra.mxu3 %vm451_vm1, %v5881_v56  ;;  %v7930_v56 = vld [vmem:[%s6802_s8 + $0x450] sm:$0xff] }
 0x1fc   : > { %5695 = vmatmul.msk.f32.gmra.mxu1 %vm451_vm1, %v7908_v48 }
 0x1fd   : > { %6219 = vmatmul.msk.f32.gmra.mxu0 %vm451_vm1, %v7913_v43 }
 0x1fe   : > { %v1651_v57 = vpop.f32.mrf.mxu2  ;;  %v2185_v46 = vpop.f32.mrf.mxu3 }
 0x1ff   : > { %v1769_v45 = vadd.f32 %v1651_v57, %v1181_v19 }
 0x201   : > { %v7925_v29 = vadd.f32 %v2185_v46, %v1769_v45  ;;  %v7927_v28 = vpop.f32.mrf.mxu1  ;;  %v5753_v46 = vld [vmem:[%s6802_s8 + $0x3e0] sm:$0xff] }
 0x202   : > { %v7932_v42 = vpop.f32.mrf.mxu0  ;;  %v5883_v45 = vld [vmem:[%s6802_s8 + $0x3e1] sm:$0xff] }
 0x203   : > { %9457 = vst [vmem:[#allocation41_spill] sm:$0xff] %v7925_v29  ;;  %5818 = vmatmul.msk.f32.gmra.mxu2 %vm451_vm1, %v7779_v0  ;;  %5948 = vmatmul.msk.f32.gmra.mxu3 %vm451_vm1, %v5882_v39  ;;  %v7953_v39 = vld [vmem:[%s6802_s8 + $0x460] sm:$0xff] }
 0x204   : > { %5696 = vmatmul.msk.f32.gmra.mxu1 %vm451_vm1, %v7930_v56 }
 0x205   : > { %6220 = vmatmul.msk.f32.gmra.mxu0 %vm451_vm1, %v7935_v59 }
 0x206   : > { %v1654_v47 = vpop.f32.mrf.mxu2  ;;  %v2188_v19 = vpop.f32.mrf.mxu3 }
 0x207   : > { %v1770_v57 = vadd.f32 %v1654_v47, %v1184_v25 }
 0x209   : > { %v7948_v29 = vadd.f32 %v2188_v19, %v1770_v57  ;;  %v7950_v0 = vpop.f32.mrf.mxu1  ;;  %v5884_v19 = vld [vmem:[%s6802_s8 + $0x401] sm:$0xff] }
 0x20a   : > { %v7955_v50 = vpop.f32.mrf.mxu0 }
 0x20b   : > { %9458 = vst [vmem:[#allocation42_spill] sm:$0xff] %v7948_v29  ;;  %5819 = vmatmul.msk.f32.gmra.mxu2 %vm451_vm1, %v5753_v46  ;;  %5949 = vmatmul.msk.f32.gmra.mxu3 %vm451_vm1, %v5883_v45  ;;  %v2330_v46 = vld [vmem:[%s7618_s14] sm:$0xff] }
 0x20c   : > { %5697 = vmatmul.msk.f32.gmra.mxu1 %vm451_vm1, %v7953_v39 }
 0x20d   : > { %6221 = vmatmul.msk.f32.gmra.mxu0 %vm451_vm1, %v6211_v41  ;;  %v1190_v41 = vadd.f32 %v7797_v58, %v7800_v53 }
 0x20e   : > { %v1657_v18 = vpop.f32.mrf.mxu2  ;;  %v2191_v25 = vpop.f32.mrf.mxu3 }
 0x20f   : > { %v1771_v47 = vadd.f32 %v1657_v18, %v1187_v55  ;;  %v5885_v55 = vld [vmem:[%s6802_s8 + $0x411] sm:$0xff] }
 0x211   : > { %v7966_v57 = vadd.f32 %v2191_v25, %v1771_v47  ;;  %v7968_v29 = vpop.f32.mrf.mxu1 }
 0x212   : > { %v7971_v33 = vpop.f32.mrf.mxu0 }
 0x213   : > { %5820 = vmatmul.msk.f32.gmra.mxu2 %vm451_vm1, %v7820_v44  ;;  %5950 = vmatmul.msk.f32.gmra.mxu3 %vm451_vm1, %v5884_v19  ;;  %v5886_v19 = vld [vmem:[%s6802_s8 + $0x421] sm:$0xff] }
 0x214   : > { %6026 = vmatmul.msk.f32.vlgmr.msrb.gmra.mxu1 %vm451_vm1, %v2330_v46 }
 0x215   : > { %6345 = vmatmul.msk.f32.vlgmr.msrb.gmra.mxu0 %vm451_vm1, %v7646_v54  ;;  %v1193_v54 = vadd.f32 %v7817_v52, %v7822_v7 }
 0x216   : > { %v1660_v34 = vpop.f32.mrf.mxu2  ;;  %v2194_v4 = vpop.f32.mrf.mxu3 }
 0x217   : > { %v1772_v45 = vadd.f32 %v1660_v34, %v1190_v41  ;;  %v5887_v34 = vld [vmem:[%s6802_s8 + $0x431] sm:$0xff] }
 0x219   : > { %v7982_v18 = vadd.f32 %v2194_v4, %v1772_v45  ;;  %v7984_v25 = vpop.f32.mrf.mxu1 }
 0x21a   : > { %v7986_v44 = vpop.f32.mrf.mxu0 }
 0x21b   : > { %5821 = vmatmul.msk.f32.gmra.mxu2 %vm451_vm1, %v7842_v38  ;;  %5951 = vmatmul.msk.f32.gmra.mxu3 %vm451_vm1, %v5885_v55  ;;  %v5888_v55 = vld [vmem:[%s6802_s8 + $0x441] sm:$0xff] }
 0x21c   : > { %6027 = vmatmul.msk.f32.gmra.mxu1 %vm451_vm1, %v7803_v6  ;;  %v1196_v6 = vadd.f32 %v7839_v1, %v7844_v22 }
 0x21d   : > { %6346 = vmatmul.msk.f32.gmra.mxu0 %vm451_vm1, %v7668_v31 }
 0x21e   : > { %v1663_v58 = vpop.f32.mrf.mxu2  ;;  %v2197_v53 = vpop.f32.mrf.mxu3 }
 0x21f   : > { %v1773_v47 = vadd.f32 %v1663_v58, %v1193_v54 }
 0x221   : > { %v7998_v46 = vadd.f32 %v2197_v53, %v1773_v47  ;;  %v8000_v41 = vpop.f32.mrf.mxu1  ;;  %v5889_v53 = vld [vmem:[%s6802_s8 + $0x451] sm:$0xff] }
 0x222   : > { %v8002_v38 = vpop.f32.mrf.mxu0 }
 0x223   : > { %5822 = vmatmul.msk.f32.gmra.mxu2 %vm451_vm1, %v7864_v35  ;;  %5952 = vmatmul.msk.f32.gmra.mxu3 %vm451_vm1, %v5886_v19 }
 0x224   : > { %6028 = vmatmul.msk.f32.gmra.mxu1 %vm451_vm1, %v7825_v63 }
 0x225   : > { %6347 = vmatmul.msk.f32.gmra.mxu0 %vm451_vm1, %v7690_v51  ;;  %v1199_v51 = vadd.f32 %v7861_v11, %v7866_v24 }
 0x226   : > { %v1666_v31 = vpop.f32.mrf.mxu2  ;;  %v2200_v52 = vpop.f32.mrf.mxu3 }
 0x227   : > { %v1774_v7 = vadd.f32 %v1666_v31, %v1196_v6  ;;  %v5890_v6 = vld [vmem:[%s6802_s8 + $0x461] sm:$0xff] }
 0x229   : > { %v8014_v4 = vadd.f32 %v2200_v52, %v1774_v7  ;;  %v8016_v45 = vpop.f32.mrf.mxu1  ;;  %v5761_v7 = vld [vmem:[%s6802_s8 + $0x470] sm:$0xff] }
 0x22a   : > { %v8018_v35 = vpop.f32.mrf.mxu0 }
 0x22b   : > { %5823 = vmatmul.msk.f32.gmra.mxu2 %vm451_vm1, %v7886_v10  ;;  %5953 = vmatmul.msk.f32.gmra.mxu3 %vm451_vm1, %v5887_v34  ;;  %v5891_v34 = vld [vmem:[%s6802_s8 + $0x471] sm:$0xff] }
 0x22c   : > { %6029 = vmatmul.msk.f32.gmra.mxu1 %vm451_vm1, %v7847_v30 }
 0x22d   : > { %6348 = vmatmul.msk.f32.gmra.mxu0 %vm451_vm1, %v7712_v13  ;;  %v1202_v13 = vadd.f32 %v7883_v17, %v7888_v37 }
 0x22e   : > { %v1669_v63 = vpop.f32.mrf.mxu2  ;;  %v2203_v1 = vpop.f32.mrf.mxu3 }
 0x22f   : > { %v1775_v22 = vadd.f32 %v1669_v63, %v1199_v51 }
 0x231   : > { %v8030_v54 = vadd.f32 %v2203_v1, %v1775_v22  ;;  %v8032_v58 = vpop.f32.mrf.mxu1  ;;  %v6034_v22 = vld [vmem:[%s6802_s8 + $0x91] sm:$0xff] }
 0x232   : > { %v8034_v10 = vpop.f32.mrf.mxu0 }
 0x233   : > { %5824 = vmatmul.msk.f32.gmra.mxu2 %vm451_vm1, %v7908_v48  ;;  %5954 = vmatmul.msk.f32.gmra.mxu3 %vm451_vm1, %v5888_v55  ;;  %v5959_v55 = vld [vmem:[%s6802_s8 + $0x90] sm:$0xff] }
 0x234   : > { %6030 = vmatmul.msk.f32.gmra.mxu1 %vm451_vm1, %v7869_v62  ;;  %v1205_v62 = vadd.f32 %v7905_v23, %v7910_v12 }
 0x235   : > { %6349 = vmatmul.msk.f32.gmra.mxu0 %vm451_vm1, %v7734_v5 }
 0x236   : > { %v1672_v30 = vpop.f32.mrf.mxu2  ;;  %v2206_v24 = vpop.f32.mrf.mxu3 }
 0x237   : > { %v1776_v11 = vadd.f32 %v1672_v30, %v1202_v13 }
 0x239   : > { %v8046_v47 = vadd.f32 %v2206_v24, %v1776_v11  ;;  %v8048_v19 = vpop.f32.mrf.mxu1  ;;  %v5960_v11 = vld [vmem:[%s6802_s8 + $0xa0] sm:$0xff] }
 0x23a   : > { %v8050_v48 = vpop.f32.mrf.mxu0 }
 0x23b   : > { %5825 = vmatmul.msk.f32.gmra.mxu2 %vm451_vm1, %v7930_v56  ;;  %5955 = vmatmul.msk.f32.gmra.mxu3 %vm451_vm1, %v5889_v53 }
 0x23c   : > { %6031 = vmatmul.msk.f32.gmra.mxu1 %vm451_vm1, %v7891_v49  ;;  %v1208_v49 = vadd.f32 %v7927_v28, %v7932_v42 }
 0x23d   : > { %6350 = vmatmul.msk.f32.gmra.mxu0 %vm451_vm1, %v7760_v36 }
 0x23e   : > { %v1675_v5 = vpop.f32.mrf.mxu2  ;;  %v2209_v37 = vpop.f32.mrf.mxu3 }
 0x23f   : > { %v1777_v17 = vadd.f32 %v1675_v5, %v1205_v62 }
 0x241   : > { %v8062_v31 = vadd.f32 %v2209_v37, %v1777_v17  ;;  %v8064_v56 = vpop.f32.mrf.mxu1 }
 0x242   : > { %v8066_v52 = vpop.f32.mrf.mxu0 }
 0x243   : > { %5826 = vmatmul.msk.f32.gmra.mxu2 %vm451_vm1, %v7953_v39  ;;  %5956 = vmatmul.msk.f32.gmra.mxu3 %vm451_vm1, %v5890_v6  ;;  %v5961_v6 = vld [vmem:[%s6802_s8 + $0xb0] sm:$0xff] }
 0x244   : > { %6032 = vmatmul.msk.f32.gmra.mxu1 %vm451_vm1, %v7913_v43  ;;  %v6342_v43 = vld [vmem:[%s7618_s14 + $0x81] sm:$0xff] }
 0x245   : > { %6351 = vmatmul.msk.f32.gmra.mxu0 %vm451_vm1, %v7784_v16  ;;  %v1211_v16 = vadd.f32 %v7950_v0, %v7955_v50  ;;  %v1214_v50 = vadd.f32 %v7968_v29, %v6948_v60  ;;  %v1217_v60 = vadd.f32 %v7984_v25, %v6968_v2  ;;  %v1220_v2 = vadd.f32 %v8000_v41, %v6988_v8 }
 0x246   : > { %v1678_v36 = vpop.f32.mrf.mxu2  ;;  %v2212_v12 = vpop.f32.mrf.mxu3  ;;  %v1223_v8 = vadd.f32 %v8016_v45, %v7008_v14  ;;  %v1226_v14 = vadd.f32 %v8032_v58, %v7030_v20  ;;  %v1229_v20 = vadd.f32 %v8048_v19, %v7052_v26  ;;  %v1232_v26 = vadd.f32 %v8064_v56, %v7074_v32 }
 0x247   : > { %v1778_v23 = vadd.f32 %v1678_v36, %v1208_v49  ;;  %v6036_v49 = vld [vmem:[%s6802_s8 + $0xb1] sm:$0xff] }
 0x249   : > { %v8079_v51 = vadd.f32 %v2212_v12, %v1778_v23  ;;  %v8081_v39 = vpop.f32.mrf.mxu1 }
 0x24a   : > { %v8083_v63 = vpop.f32.mrf.mxu0  ;;  %v1235_v32 = vadd.f32 %v8081_v39, %v7096_v40 }
 0x24b   : > { %5827 = vmatmul.msk.f32.gmra.mxu2 %vm451_vm1, %v5761_v7  ;;  %5957 = vmatmul.msk.f32.gmra.mxu3 %vm451_vm1, %v5891_v34 }
 0x24c   : > { %6033 = vmatmul.msk.f32.gmra.mxu1 %vm451_vm1, %v7935_v59  ;;  %v6035_v59 = vld [vmem:[%s6802_s8 + $0xa1] sm:$0xff] }
 0x24d   : > { %6352 = vmatmul.msk.f32.gmra.mxu0 %vm451_vm1, %v6342_v43  ;;  %v5962_v43 = vld [vmem:[%s6802_s8 + $0xc0] sm:$0xff] }
 0x24e   : > { %v1681_v42 = vpop.f32.mrf.mxu2  ;;  %v2215_v28 = vpop.f32.mrf.mxu3 }
 0x24f   : > { %v1779_v1 = vadd.f32 %v1681_v42, %v1211_v16  ;;  %v6037_v16 = vld [vmem:[%s6802_s8 + $0xc1] sm:$0xff] }
 0x251   : > { %v8095_v13 = vadd.f32 %v2215_v28, %v1779_v1  ;;  %v8097_v30 = vpop.f32.mrf.mxu1 }
 0x252   : > { %v8099_v24 = vpop.f32.mrf.mxu0  ;;  %v1238_v40 = vadd.f32 %v8097_v30, %v6950_v61  ;;  %v6044_v30 = vld [vmem:[%s6802_s8 + $0x141] sm:$0xff] }
 0x253   : > { %6091 = vmatmul.msk.f32.vlgmr.msra.gmra.mxu2 %vm451_vm1, %v6034_v22  ;;  %6148 = vmatmul.msk.f32.vlgmr.msra.gmra.mxu3 %vm451_vm1, %v5959_v55 }
 0x254   : > { %6279 = vmatmul.msk.f32.vlgmr.msra.gmra.mxu1 %vm451_vm1, %v5960_v11 }
 0x255   : > { %6410 = vmatmul.msk.f32.vlgmr.msra.gmra.mxu0 %vm451_vm1, %v6035_v59 }
 0x256   : > { %v1684_v0 = vpop.f32.mrf.mxu2  ;;  %v2218_v53 = vpop.f32.mrf.mxu3 }
 0x257   : > { %v1780_v62 = vadd.f32 %v1684_v0, %v1214_v50 }
 0x259   : > { %v8109_v5 = vadd.f32 %v2218_v53, %v1780_v62  ;;  %v8111_v37 = vpop.f32.mrf.mxu1 }
 0x25a   : > { %v8113_v17 = vpop.f32.mrf.mxu0 }
 0x25b   : > { %6092 = vmatmul.msk.f32.gmra.mxu2 %vm451_vm1, %v6035_v59  ;;  %6149 = vmatmul.msk.f32.gmra.mxu3 %vm451_vm1, %v5960_v11  ;;  %v5963_v11 = vld [vmem:[%s6802_s8 + $0xd0] sm:$0xff] }
 0x25c   : > { %6280 = vmatmul.msk.f32.gmra.mxu1 %vm451_vm1, %v5961_v6  ;;  %v6038_v59 = vld [vmem:[%s6802_s8 + $0xd1] sm:$0xff] }
 0x25d   : > { %6411 = vmatmul.msk.f32.gmra.mxu0 %vm451_vm1, %v6036_v49 }
 0x25e   : > { %v1687_v29 = vpop.f32.mrf.mxu2  ;;  %v2221_v36 = vpop.f32.mrf.mxu3 }
 0x25f   : > { %v1781_v12 = vadd.f32 %v1687_v29, %v1217_v60  ;;  %v6039_v60 = vld [vmem:[%s6802_s8 + $0xe1] sm:$0xff] }
 0x261   : > { %v8123_v23 = vadd.f32 %v2221_v36, %v1781_v12  ;;  %v8125_v7 = vpop.f32.mrf.mxu1 }
 0x262   : > { %v8127_v34 = vpop.f32.mrf.mxu0 }
 0x263   : > { %6093 = vmatmul.msk.f32.gmra.mxu2 %vm451_vm1, %v6036_v49  ;;  %6150 = vmatmul.msk.f32.gmra.mxu3 %vm451_vm1, %v5961_v6  ;;  %v5964_v49 = vld [vmem:[%s6802_s8 + $0xe0] sm:$0xff] }
 0x264   : > { %6281 = vmatmul.msk.f32.gmra.mxu1 %vm451_vm1, %v5962_v43 }
 0x265   : > { %6412 = vmatmul.msk.f32.gmra.mxu0 %vm451_vm1, %v6037_v16 }
 0x266   : > { %v1690_v25 = vpop.f32.mrf.mxu2  ;;  %v2224_v42 = vpop.f32.mrf.mxu3 }
 0x267   : > { %v1782_v28 = vadd.f32 %v1690_v25, %v1220_v2  ;;  %v5965_v2 = vld [vmem:[%s6802_s8 + $0xf0] sm:$0xff] }
 0x268   : > { %v6040_v25 = vld [vmem:[%s6802_s8 + $0xf1] sm:$0xff] }
 0x269   : > { %v8137_v1 = vadd.f32 %v2224_v42, %v1782_v28  ;;  %v8139_v22 = vpop.f32.mrf.mxu1 }
 0x26a   : > { %v8141_v55 = vpop.f32.mrf.mxu0 }
 0x26b   : > { %6094 = vmatmul.msk.f32.gmra.mxu2 %vm451_vm1, %v6037_v16  ;;  %6151 = vmatmul.msk.f32.gmra.mxu3 %vm451_vm1, %v5962_v43 }
 0x26c   : > { %6282 = vmatmul.msk.f32.gmra.mxu1 %vm451_vm1, %v5963_v11 }
 0x26d   : > { %6413 = vmatmul.msk.f32.gmra.mxu0 %vm451_vm1, %v6038_v59 }
 0x26e   : > { %v1693_v41 = vpop.f32.mrf.mxu2  ;;  %v2227_v50 = vpop.f32.mrf.mxu3 }
 0x26f   : > { %v1783_v0 = vadd.f32 %v1693_v41, %v1223_v8  ;;  %v5966_v41 = vld [vmem:[%s6802_s8 + $0x100] sm:$0xff] }
 0x271   : > { %v8151_v53 = vadd.f32 %v2227_v50, %v1783_v0  ;;  %v8153_v62 = vpop.f32.mrf.mxu1  ;;  %v6041_v50 = vld [vmem:[%s6802_s8 + $0x101] sm:$0xff] }
 0x272   : > { %v8155_v6 = vpop.f32.mrf.mxu0 }
 0x273   : > { %6095 = vmatmul.msk.f32.gmra.mxu2 %vm451_vm1, %v6038_v59  ;;  %6152 = vmatmul.msk.f32.gmra.mxu3 %vm451_vm1, %v5963_v11 }
 0x274   : > { %6283 = vmatmul.msk.f32.gmra.mxu1 %vm451_vm1, %v5964_v49 }
 0x275   : > { %6414 = vmatmul.msk.f32.gmra.mxu0 %vm451_vm1, %v6039_v60 }
 0x276   : > { %v1696_v45 = vpop.f32.mrf.mxu2  ;;  %v2230_v29 = vpop.f32.mrf.mxu3 }
 0x277   : > { %v1784_v36 = vadd.f32 %v1696_v45, %v1226_v14 }
 0x279   : > { %v8165_v12 = vadd.f32 %v2230_v29, %v1784_v36  ;;  %v8167_v43 = vpop.f32.mrf.mxu1  ;;  %v6229_v29 = vld [vmem:[%s6802_s8 + $0x110] sm:$0xff] }
 0x27a   : > { %v8169_v16 = vpop.f32.mrf.mxu0  ;;  %v6360_v36 = vld [vmem:[%s6802_s8 + $0x111] sm:$0xff] }
 0x27b   : > { %6096 = vmatmul.msk.f32.gmra.mxu2 %vm451_vm1, %v6039_v60  ;;  %6153 = vmatmul.msk.f32.gmra.mxu3 %vm451_vm1, %v5964_v49 }
 0x27c   : > { %6284 = vmatmul.msk.f32.gmra.mxu1 %vm451_vm1, %v5965_v2 }
 0x27d   : > { %6415 = vmatmul.msk.f32.gmra.mxu0 %vm451_vm1, %v6040_v25 }
 0x27e   : > { %v1699_v58 = vpop.f32.mrf.mxu2  ;;  %v2233_v42 = vpop.f32.mrf.mxu3 }
 0x27f   : > { %v1785_v28 = vadd.f32 %v1699_v58, %v1229_v20  ;;  %v6042_v20 = vld [vmem:[%s6802_s8 + $0x121] sm:$0xff] }
 0x280   : > { %v5967_v58 = vld [vmem:[%s6802_s8 + $0x120] sm:$0xff] }
 0x281   : > { %v8179_v11 = vadd.f32 %v2233_v42, %v1785_v28  ;;  %v8181_v59 = vpop.f32.mrf.mxu1 }
 0x282   : > { %v8183_v8 = vpop.f32.mrf.mxu0 }
 0x283   : > { %6097 = vmatmul.msk.f32.gmra.mxu2 %vm451_vm1, %v6040_v25  ;;  %6154 = vmatmul.msk.f32.gmra.mxu3 %vm451_vm1, %v5965_v2 }
 0x284   : > { %6285 = vmatmul.msk.f32.gmra.mxu1 %vm451_vm1, %v5966_v41 }
 0x285   : > { %6416 = vmatmul.msk.f32.gmra.mxu0 %vm451_vm1, %v6041_v50 }
 0x286   : > { %v1702_v19 = vpop.f32.mrf.mxu2  ;;  %v2236_v0 = vpop.f32.mrf.mxu3 }
 0x287   : > { %v1786_v49 = vadd.f32 %v1702_v19, %v1232_v26  ;;  %v5968_v26 = vld [vmem:[%s6802_s8 + $0x130] sm:$0xff] }
 0x288   : > { %v6043_v19 = vld [vmem:[%s6802_s8 + $0x131] sm:$0xff] }
 0x289   : > { %v8193_v60 = vadd.f32 %v2236_v0, %v1786_v49  ;;  %v8195_v14 = vpop.f32.mrf.mxu1 }
 0x28a   : > { %v8197_v45 = vpop.f32.mrf.mxu0 }
 0x28b   : > { %6098 = vmatmul.msk.f32.gmra.mxu2 %vm451_vm1, %v6041_v50  ;;  %6155 = vmatmul.msk.f32.gmra.mxu3 %vm451_vm1, %v5966_v41 }
 0x28c   : > { %6286 = vmatmul.msk.f32.gmra.mxu1 %vm451_vm1, %v6229_v29 }
 0x28d   : > { %6417 = vmatmul.msk.f32.gmra.mxu0 %vm451_vm1, %v6360_v36 }
 0x28e   : > { %v1705_v56 = vpop.f32.mrf.mxu2  ;;  %v2239_v2 = vpop.f32.mrf.mxu3 }
 0x28f   : > { %v1787_v25 = vadd.f32 %v1705_v56, %v1235_v32  ;;  %v8225_v32 = vld [vmem:[%s9416_s3] ss:$0 sm:$0xff] }
 0x291   : > { %v8209_v42 = vadd.f32 %v2239_v2, %v1787_v25  ;;  %v2519_v28 = vpop.f32.mrf.mxu1  ;;  %v5969_v25 = vld [vmem:[%s6802_s8 + $0x140] sm:$0xff] }
 0x292   : > { %v3912_v50 = vpop.f32.mrf.mxu0  ;;  %v2520_v41 = vadd.f32 %v2519_v28, %v7971_v33 }
 0x293   : > { %6099 = vmatmul.msk.f32.gmra.mxu2 %vm451_vm1, %v6042_v20  ;;  %6156 = vmatmul.msk.f32.gmra.mxu3 %vm451_vm1, %v5967_v58 }
 0x294   : > { %6287 = vmatmul.msk.f32.gmra.mxu1 %vm451_vm1, %v5968_v26  ;;  %v3384_v39 = vadd.f32 %v8099_v24, %v2520_v41 }
 0x295   : > { %6418 = vmatmul.msk.f32.gmra.mxu0 %vm451_vm1, %v6043_v19 }
 0x296   : > { %v1708_v0 = vpop.f32.mrf.mxu2  ;;  %v2242_v49 = vpop.f32.mrf.mxu3  ;;  %v3936_v33 = vadd.f32 %v3912_v50, %v3384_v39 }
 0x297   : > { %v1788_v29 = vadd.f32 %v1708_v0, %v1238_v40  ;;  %v6045_v0 = vld [vmem:[%s6802_s8 + $0x151] sm:$0xff] }
 0x299   : > { %v2322_v36 = vadd.f32 %v2242_v49, %v1788_v29  ;;  %v2522_v56 = vpop.f32.mrf.mxu1  ;;  %v1244_v49 = vadd.f32 %v8125_v7, %v6990_v9 }
 0x29a   : > { %v3915_v2 = vpop.f32.mrf.mxu0  ;;  %v2523_v20 = vadd.f32 %v2522_v56, %v7986_v44  ;;  %v1241_v44 = vadd.f32 %v8111_v37, %v6970_v3 }
 0x29b   : > { %v4465_v61 = vadd.f32 %v3936_v33, %v2322_v36  ;;  %6100 = vmatmul.msk.f32.gmra.mxu2 %vm451_vm1, %v6043_v19  ;;  %6157 = vmatmul.msk.f32.gmra.mxu3 %vm451_vm1, %v5968_v26  ;;  %v5970_v19 = vld [vmem:[%s6802_s8 + $0x150] sm:$0xff] }
 0x29c   : > { %6288 = vmatmul.msk.f32.gmra.mxu1 %vm451_vm1, %v5969_v25  ;;  %v3385_v58 = vadd.f32 %v8113_v17, %v2523_v20  ;;  %v5971_v20 = vld [vmem:[%s6802_s8 + $0x160] sm:$0xff] }
 0x29d   : > { %6419 = vmatmul.msk.f32.gmra.mxu0 %vm451_vm1, %v6044_v30  ;;  %v4533_v24 = vadd.f32 %v8225_v32, %v4465_v61 }
 0x29e   : > { %v1711_v28 = vpop.f32.mrf.mxu2  ;;  %v2245_v50 = vpop.f32.mrf.mxu3  ;;  %v3937_v3 = vadd.f32 %v3915_v2, %v3385_v58 }
 0x29f   : > { %4598 = vst.msk [vmem:[%s8232_s26 + $0x700] sm:$0xff] %vm4541_vm2, %v4533_v24  ;;  %v1789_v41 = vadd.f32 %v1711_v28, %v1241_v44  ;;  %5296 = vrot.lane.b32.xlu1 %v4533_v24, %s6722_s15  ;;  %5039 = vrot.lane.b32.xlu0 %v4533_v24, %s6723_s27  ;;  %v1247_v44 = vadd.f32 %v8139_v22, %v7010_v15 }
 0x2a0   : > { %4782 = vrot.lane.b32.xlu2 %v4533_v24, %s6724_s28 }
 0x2a1   : > { %v2323_v37 = vadd.f32 %v2245_v50, %v1789_v41  ;;  %v2525_v26 = vpop.f32.mrf.mxu1 }
 0x2a2   : > { %v3918_v17 = vpop.f32.mrf.mxu0  ;;  %v2526_v40 = vadd.f32 %v2525_v26, %v8002_v38 }
 0x2a3   : > { %v4466_v39 = vadd.f32 %v3937_v3, %v2323_v37  ;;  %6101 = vmatmul.msk.f32.gmra.mxu2 %vm451_vm1, %v6044_v30  ;;  %6158 = vmatmul.msk.f32.gmra.mxu3 %vm451_vm1, %v5969_v25  ;;  %v6046_v30 = vld [vmem:[%s6802_s8 + $0x161] sm:$0xff]  ;;  %v5972_v37 = vld [vmem:[%s6802_s8 + $0x170] sm:$0xff] }
 0x2a4   : > { %6289 = vmatmul.msk.f32.gmra.mxu1 %vm451_vm1, %v5970_v19  ;;  %v3386_v33 = vadd.f32 %v8127_v34, %v2526_v40 }
 0x2a5   : > { %6420 = vmatmul.msk.f32.gmra.mxu0 %vm451_vm1, %v6045_v0  ;;  %v4534_v29 = vadd.f32 %v8225_v32, %v4466_v39 }
 0x2a6   : > { %v1714_v36 = vpop.f32.mrf.mxu2  ;;  %v2248_v38 = vpop.f32.mrf.mxu3  ;;  %v3938_v2 = vadd.f32 %v3918_v17, %v3386_v33  ;;  %v6047_v17 = vld [vmem:[%s6802_s8 + $0x171] sm:$0xff] }
 0x2a7   : > { %4599 = vst.msk [vmem:[%s8232_s26 + $0x710] sm:$0xff] %vm4541_vm2, %v4534_v29  ;;  %v1790_v56 = vadd.f32 %v1714_v36, %v1244_v49  ;;  %5041 = vrot.lane.b32.xlu1 %v4534_v29, %s6723_s27  ;;  %4784 = vrot.lane.b32.xlu0 %v4534_v29, %s6724_s28  ;;  %v5973_v36 = vld [vmem:[%s6802_s8 + $0x180] sm:$0xff] }
 0x2a8   : > { %5298 = vrot.lane.b32.xlu2 %v4534_v29, %s6722_s15 }
 0x2a9   : > { %v2324_v25 = vadd.f32 %v2248_v38, %v1790_v56  ;;  %v2528_v9 = vpop.f32.mrf.mxu1  ;;  %v6048_v56 = vld [vmem:[%s6802_s8 + $0x181] sm:$0xff] }
 0x2aa   : > { %v3921_v7 = vpop.f32.mrf.mxu0  ;;  %v2529_v34 = vadd.f32 %v2528_v9, %v8018_v35 }
 0x2ab   : > { %v4467_v61 = vadd.f32 %v3938_v2, %v2324_v25  ;;  %6102 = vmatmul.msk.f32.gmra.mxu2 %vm451_vm1, %v6045_v0  ;;  %6159 = vmatmul.msk.f32.gmra.mxu3 %vm451_vm1, %v5970_v19  ;;  %v1250_v19 = vadd.f32 %v8153_v62, %v7032_v21  ;;  %v1253_v2 = vadd.f32 %v8167_v43, %v7054_v27 }
 0x2ac   : > { %6290 = vmatmul.msk.f32.gmra.mxu1 %vm451_vm1, %v5971_v20  ;;  %v3387_v58 = vadd.f32 %v8141_v55, %v2529_v34 }
 0x2ad   : > { %6421 = vmatmul.msk.f32.gmra.mxu0 %vm451_vm1, %v6046_v30  ;;  %v4535_v24 = vadd.f32 %v8225_v32, %v4467_v61 }
 0x2ae   : > { %v1717_v28 = vpop.f32.mrf.mxu2  ;;  %v2251_v35 = vpop.f32.mrf.mxu3  ;;  %v3939_v41 = vadd.f32 %v3921_v7, %v3387_v58  ;;  %v9459_v58 = vld [vmem:[#allocation2_spill] sm:$0xff] }
 0x2af   : > { %4600 = vst.msk [vmem:[%s8232_s26 + $0x720] sm:$0xff] %vm4541_vm2, %v4535_v24  ;;  %v1791_v50 = vadd.f32 %v1717_v28, %v1247_v44  ;;  %4786 = vrot.lane.b32.xlu1 %v4535_v24, %s6724_s28  ;;  %5300 = vrot.lane.b32.xlu0 %v4535_v24, %s6722_s15  ;;  %v1256_v28 = vadd.f32 %v8181_v59, %v9459_v58 }
 0x2b0   : > { %5043 = vrot.lane.b32.xlu2 %v4535_v24, %s6723_s27  ;;  %v6049_v24 = vld [vmem:[%s6802_s8 + $0x191] sm:$0xff] }
 0x2b1   : > { %v2325_v3 = vadd.f32 %v2251_v35, %v1791_v50  ;;  %v2531_v15 = vpop.f32.mrf.mxu1 }
 0x2b2   : > { %v3924_v22 = vpop.f32.mrf.mxu0  ;;  %v2532_v55 = vadd.f32 %v2531_v15, %v8034_v10 }
 0x2b3   : > { %v4468_v26 = vadd.f32 %v3939_v41, %v2325_v3  ;;  %6103 = vmatmul.msk.f32.gmra.mxu2 %vm451_vm1, %v6046_v30  ;;  %6160 = vmatmul.msk.f32.gmra.mxu3 %vm451_vm1, %v5971_v20  ;;  %v5974_v30 = vld [vmem:[%s6802_s8 + $0x190] sm:$0xff] }
 0x2b4   : > { %6291 = vmatmul.msk.f32.gmra.mxu1 %vm451_vm1, %v5972_v37  ;;  %v3388_v39 = vadd.f32 %v8155_v6, %v2532_v55  ;;  %v6237_v55 = vld [vmem:[%s6802_s8 + $0x1a0] sm:$0xff] }
 0x2b5   : > { %6422 = vmatmul.msk.f32.gmra.mxu0 %vm451_vm1, %v6047_v17  ;;  %v4536_v40 = vadd.f32 %v8225_v32, %v4468_v26  ;;  %v6368_v26 = vld [vmem:[%s6802_s8 + $0x1a1] sm:$0xff] }
 0x2b6   : > { %v1720_v0 = vpop.f32.mrf.mxu2  ;;  %v2254_v10 = vpop.f32.mrf.mxu3  ;;  %v3940_v29 = vadd.f32 %v3924_v22, %v3388_v39 }
 0x2b7   : > { %4601 = vst.msk [vmem:[%s8232_s26 + $0x730] sm:$0xff] %vm4541_vm2, %v4536_v40  ;;  %v1792_v49 = vadd.f32 %v1720_v0, %v1250_v19  ;;  %5302 = vrot.lane.b32.xlu1 %v4536_v40, %s6722_s15  ;;  %5045 = vrot.lane.b32.xlu0 %v4536_v40, %s6723_s27  ;;  %v9460_v19 = vld [vmem:[#allocation3_spill] sm:$0xff] }
 0x2b8   : > { %4788 = vrot.lane.b32.xlu2 %v4536_v40, %s6724_s28  ;;  %v1259_v40 = vadd.f32 %v8195_v14, %v9460_v19  ;;  %v5975_v14 = vld [vmem:[%s6802_s8 + $0x1b0] sm:$0xff] }
 0x2b9   : > { %v2326_v33 = vadd.f32 %v2254_v10, %v1792_v49  ;;  %v2534_v21 = vpop.f32.mrf.mxu1 }
 0x2ba   : > { %v3927_v62 = vpop.f32.mrf.mxu0  ;;  %v2535_v6 = vadd.f32 %v2534_v21, %v8050_v48 }
 0x2bb   : > { %v4469_v38 = vadd.f32 %v3940_v29, %v2326_v33  ;;  %6104 = vmatmul.msk.f32.gmra.mxu2 %vm451_vm1, %v6047_v17  ;;  %6161 = vmatmul.msk.f32.gmra.mxu3 %vm451_vm1, %v5972_v37  ;;  %v6050_v29 = vld [vmem:[%s6802_s8 + $0x1b1] sm:$0xff] }
 0x2bc   : > { %6292 = vmatmul.msk.f32.gmra.mxu1 %vm451_vm1, %v5973_v36  ;;  %v3389_v9 = vadd.f32 %v8169_v16, %v2535_v6 }
 0x2bd   : > { %6423 = vmatmul.msk.f32.gmra.mxu0 %vm451_vm1, %v6048_v56  ;;  %v4537_v25 = vadd.f32 %v8225_v32, %v4469_v38  ;;  %v6051_v38 = vld [vmem:[%s6802_s8 + $0x1c1] sm:$0xff] }
 0x2be   : > { %v1723_v7 = vpop.f32.mrf.mxu2  ;;  %v2257_v48 = vpop.f32.mrf.mxu3  ;;  %v3941_v34 = vadd.f32 %v3927_v62, %v3389_v9 }
 0x2bf   : > { %4602 = vst.msk [vmem:[%s8232_s26 + $0x740] sm:$0xff] %vm4541_vm2, %v4537_v25  ;;  %v1793_v20 = vadd.f32 %v1723_v7, %v1253_v2  ;;  %5047 = vrot.lane.b32.xlu1 %v4537_v25, %s6723_s27  ;;  %4790 = vrot.lane.b32.xlu0 %v4537_v25, %s6724_s28 }
 0x2c0   : > { %5304 = vrot.lane.b32.xlu2 %v4537_v25, %s6722_s15 }
 0x2c1   : > { %v2327_v61 = vadd.f32 %v2257_v48, %v1793_v20  ;;  %v2537_v27 = vpop.f32.mrf.mxu1 }
 0x2c2   : > { %v3930_v43 = vpop.f32.mrf.mxu0  ;;  %v2538_v16 = vadd.f32 %v2537_v27, %v8066_v52  ;;  %v6052_v27 = vld [vmem:[%s6802_s8 + $0x1d1] sm:$0xff] }
 0x2c3   : > { %v4470_v44 = vadd.f32 %v3941_v34, %v2327_v61  ;;  %6105 = vmatmul.msk.f32.gmra.mxu2 %vm451_vm1, %v6048_v56  ;;  %6162 = vmatmul.msk.f32.gmra.mxu3 %vm451_vm1, %v5973_v36  ;;  %v5976_v36 = vld [vmem:[%s6802_s8 + $0x1c0] sm:$0xff]  ;;  %v5977_v34 = vld [vmem:[%s6802_s8 + $0x1d0] sm:$0xff] }
 0x2c4   : > { %6293 = vmatmul.msk.f32.gmra.mxu1 %vm451_vm1, %v5974_v30  ;;  %v3390_v52 = vadd.f32 %v8183_v8, %v2538_v16 }
 0x2c5   : > { %6424 = vmatmul.msk.f32.gmra.mxu0 %vm451_vm1, %v6049_v24  ;;  %v8322_v35 = vadd.f32 %v8225_v32, %v4470_v44 }
 0x2c6   : > { %v1726_v50 = vpop.f32.mrf.mxu2  ;;  %v2260_v41 = vpop.f32.mrf.mxu3  ;;  %v3942_v15 = vadd.f32 %v3930_v43, %v3390_v52  ;;  %v9461_v43 = vld [vmem:[#allocation4_spill] sm:$0xff] }
 0x2c7   : > { %4603 = vst.msk [vmem:[%s8232_s26 + $0x750] sm:$0xff] %vm4541_vm2, %v8322_v35  ;;  %v1794_v3 = vadd.f32 %v1726_v50, %v1256_v28  ;;  %4792 = vrot.lane.b32.xlu1 %v8322_v35, %s6724_s28 }
 0x2c8   : > { %5049 = vrot.lane.b32.xlu2 %v8322_v35, %s6723_s27 }
 0x2c9   : > { %v2328_v22 = vadd.f32 %v2260_v41, %v1794_v3  ;;  %v2540_v59 = vpop.f32.mrf.mxu1  ;;  %v5978_v41 = vld [vmem:[%s6802_s8 + $0x1e0] sm:$0xff] }
 0x2ca   : > { %v3933_v37 = vpop.f32.mrf.mxu0  ;;  %v2541_v8 = vadd.f32 %v2540_v59, %v8083_v63 }
 0x2cb   : > { %v4471_v17 = vadd.f32 %v3942_v15, %v2328_v22  ;;  %6106 = vmatmul.msk.f32.gmra.mxu2 %vm451_vm1, %v6049_v24  ;;  %6163 = vmatmul.msk.f32.gmra.mxu3 %vm451_vm1, %v5974_v30  ;;  %v6053_v15 = vld [vmem:[%s6802_s8 + $0x1e1] sm:$0xff]  ;;  %v9462_v22 = vld [vmem:[#allocation5_spill] sm:$0xff] }
 0x2cc   : > { %6294 = vmatmul.msk.f32.gmra.mxu1 %vm451_vm1, %v6237_v55  ;;  %v3391_v0 = vadd.f32 %v8197_v45, %v2541_v8 }
 0x2cd   : > { %6425 = vmatmul.msk.f32.gmra.mxu0 %vm451_vm1, %v6368_v26  ;;  %v8342_v39 = vadd.f32 %v8225_v32, %v4471_v17 }
 0x2ce   : > { %v1729_v63 = vpop.f32.mrf.mxu2  ;;  %v2263_v10 = vpop.f32.mrf.mxu3  ;;  %v3943_v33 = vadd.f32 %v3933_v37, %v3391_v0  ;;  %v5979_v0 = vld [vmem:[%s6802_s8 + $0x1f0] sm:$0xff] }
 0x2cf   : > { %4604 = vst.msk [vmem:[%s8232_s26 + $0x760] sm:$0xff] %vm4541_vm2, %v8342_v39  ;;  %v1795_v49 = vadd.f32 %v1729_v63, %v1259_v40  ;;  %5051 = vrot.lane.b32.xlu0 %v8342_v39, %s6723_s27 }
 0x2d0   : > { %4794 = vrot.lane.b32.xlu2 %v8342_v39, %s6724_s28 }
 0x2d1   : > { %v2329_v21 = vadd.f32 %v2263_v10, %v1795_v49  ;;  %v3634_v62 = vpop.f32.mrf.mxu1  ;;  %v6054_v10 = vld [vmem:[%s6802_s8 + $0x1f1] sm:$0xff]  ;;  %v9463_v49 = vld [vmem:[#allocation6_spill] sm:$0xff] }
 0x2d2   : > { %v4185_v45 = vpop.f32.mrf.mxu0 }
 0x2d3   : > { %v4472_v6 = vadd.f32 %v3943_v33, %v2329_v21  ;;  %6107 = vmatmul.msk.f32.gmra.mxu2 %vm451_vm1, %v6050_v29  ;;  %6164 = vmatmul.msk.f32.gmra.mxu3 %vm451_vm1, %v5975_v14 }
 0x2d4   : > { %6295 = vmatmul.msk.f32.gmra.mxu1 %vm451_vm1, %v5976_v36 }
 0x2d5   : > { %6426 = vmatmul.msk.f32.gmra.mxu0 %vm451_vm1, %v6051_v38  ;;  %v8361_v56 = vadd.f32 %v8225_v32, %v4472_v6 }
 0x2d6   : > { %v2784_v2 = vpop.f32.mrf.mxu2  ;;  %v3137_v25 = vpop.f32.mrf.mxu3 }
 0x2d7   : > { %4605 = vst.msk [vmem:[%s8232_s26 + $0x770] sm:$0xff] %vm4541_vm2, %v8361_v56  ;;  %v3138_v9 = vadd.f32 %v3137_v25, %v2784_v2  ;;  %5053 = vrot.lane.b32.xlu1 %v8361_v56, %s6723_s27  ;;  %4796 = vrot.lane.b32.xlu0 %v8361_v56, %s6724_s28  ;;  %v6055_v25 = vld [vmem:[%s6802_s8 + $0x201] sm:$0xff] }
 0x2d9   : > { %v3802_v7 = vadd.f32 %v3634_v62, %v3138_v9  ;;  %v3637_v48 = vpop.f32.mrf.mxu1  ;;  %v9464_v9 = vld [vmem:[#allocation7_spill] sm:$0xff] }
 0x2da   : > { %v4188_v20 = vpop.f32.mrf.mxu0 }
 0x2db   : > { %v4353_v61 = vadd.f32 %v4185_v45, %v3802_v7  ;;  %6108 = vmatmul.msk.f32.gmra.mxu2 %vm451_vm1, %v6051_v38  ;;  %6165 = vmatmul.msk.f32.gmra.mxu3 %vm451_vm1, %v5976_v36  ;;  %v5980_v38 = vld [vmem:[%s6802_s8 + $0x200] sm:$0xff] }
 0x2dc   : > { %6296 = vmatmul.msk.f32.gmra.mxu1 %vm451_vm1, %v5977_v34 }
 0x2dd   : > { %6427 = vmatmul.msk.f32.gmra.mxu0 %vm451_vm1, %v6052_v27  ;;  %v4409_v30 = vadd.f32 %v4353_v61, %v9461_v43 }
 0x2de   : > { %v2787_v16 = vpop.f32.mrf.mxu2  ;;  %v3140_v44 = vpop.f32.mrf.mxu3 }
 0x2df   : > { %v4477_v24 = vadd.f32 %v8225_v32, %v4409_v30  ;;  %v3141_v58 = vadd.f32 %v3140_v44, %v2787_v16  ;;  %v5981_v16 = vld [vmem:[%s6802_s8 + $0x210] sm:$0xff] }
 0x2e1   : > { %4542 = vst.msk [vmem:[%s8232_s26] sm:$0xff] %vm4541_vm2, %v4477_v24  ;;  %v3803_v28 = vadd.f32 %v3637_v48, %v3141_v58  ;;  %5184 = vrot.lane.b32.xlu2 %v4477_v24, %s6722_s15  ;;  %4927 = vrot.lane.b32.xlu1 %v4477_v24, %s6723_s27  ;;  %v3640_v52 = vpop.f32.mrf.mxu1  ;;  %v6056_v58 = vld [vmem:[%s6802_s8 + $0x211] sm:$0xff] }
 0x2e2   : > { %v4191_v50 = vpop.f32.mrf.mxu0  ;;  %4670 = vrot.lane.b32.xlu0 %v4477_v24, %s6724_s28 }
 0x2e3   : > { %v4354_v3 = vadd.f32 %v4188_v20, %v3803_v28  ;;  %6109 = vmatmul.msk.f32.gmra.mxu2 %vm451_vm1, %v6052_v27  ;;  %6166 = vmatmul.msk.f32.gmra.mxu3 %vm451_vm1, %v5977_v34  ;;  %v9465_v28 = vld [vmem:[#allocation8_spill] sm:$0xff] }
 0x2e4   : > { %6297 = vmatmul.msk.f32.gmra.mxu1 %vm451_vm1, %v5978_v41 }
 0x2e5   : > { %6428 = vmatmul.msk.f32.gmra.mxu0 %vm451_vm1, %v6053_v15  ;;  %v4410_v59 = vadd.f32 %v4354_v3, %v9462_v22 }
 0x2e6   : > { %v2790_v37 = vpop.f32.mrf.mxu2  ;;  %v3143_v55 = vpop.f32.mrf.mxu3 }
 0x2e7   : > { %v4478_v26 = vadd.f32 %v8225_v32, %v4410_v59  ;;  %v3144_v8 = vadd.f32 %v3143_v55, %v2790_v37  ;;  %v5982_v55 = vld [vmem:[%s6802_s8 + $0x220] sm:$0xff] }
 0x2e9   : > { %4543 = vst.msk [vmem:[%s8232_s26 + $0x10] sm:$0xff] %vm4541_vm2, %v4478_v26  ;;  %v3804_v17 = vadd.f32 %v3640_v52, %v3144_v8  ;;  %4929 = vrot.lane.b32.xlu2 %v4478_v26, %s6723_s27  ;;  %v3643_v19 = vpop.f32.mrf.mxu1 }
 0x2ea   : > { %v4194_v40 = vpop.f32.mrf.mxu0  ;;  %4672 = vrot.lane.b32.xlu0 %v4478_v26, %s6724_s28 }
 0x2eb   : > { %v4355_v63 = vadd.f32 %v4191_v50, %v3804_v17  ;;  %6110 = vmatmul.msk.f32.gmra.mxu2 %vm451_vm1, %v6053_v15  ;;  %6167 = vmatmul.msk.f32.gmra.mxu3 %vm451_vm1, %v5978_v41  ;;  %v6057_v17 = vld [vmem:[%s6802_s8 + $0x221] sm:$0xff] }
 0x2ec   : > { %6298 = vmatmul.msk.f32.gmra.mxu1 %vm451_vm1, %v5979_v0 }
 0x2ed   : > { %6429 = vmatmul.msk.f32.gmra.mxu0 %vm451_vm1, %v6054_v10  ;;  %v4411_v29 = vadd.f32 %v4355_v63, %v9463_v49 }
 0x2ee   : > { %v2793_v14 = vpop.f32.mrf.mxu2  ;;  %v3146_v33 = vpop.f32.mrf.mxu3 }
 0x2ef   : > { %v4479_v21 = vadd.f32 %v8225_v32, %v4411_v29  ;;  %v3147_v62 = vadd.f32 %v3146_v33, %v2793_v14  ;;  %v6245_v29 = vld [vmem:[%s6802_s8 + $0x230] sm:$0xff] }
 0x2f1   : > { %4544 = vst.msk [vmem:[%s8232_s26 + $0x20] sm:$0xff] %vm4541_vm2, %v4479_v21  ;;  %v3805_v45 = vadd.f32 %v3643_v19, %v3147_v62  ;;  %4674 = vrot.lane.b32.xlu1 %v4479_v21, %s6724_s28  ;;  %v3646_v36 = vpop.f32.mrf.mxu1  ;;  %v9466_v19 = vld [vmem:[#allocation9_spill] sm:$0xff] }
 0x2f2   : > { %v4197_v6 = vpop.f32.mrf.mxu0  ;;  %5186 = vrot.lane.b32.xlu0 %v4478_v26, %s6722_s15  ;;  %v6376_v62 = vld [vmem:[%s6802_s8 + $0x231] sm:$0xff] }
 0x2f3   : > { %v4356_v2 = vadd.f32 %v4194_v40, %v3805_v45  ;;  %6111 = vmatmul.msk.f32.gmra.mxu2 %vm451_vm1, %v6054_v10  ;;  %6168 = vmatmul.msk.f32.gmra.mxu3 %vm451_vm1, %v5979_v0 }
 0x2f4   : > { %6299 = vmatmul.msk.f32.gmra.mxu1 %vm451_vm1, %v5980_v38 }
 0x2f5   : > { %6430 = vmatmul.msk.f32.gmra.mxu0 %vm451_vm1, %v6055_v25  ;;  %v4412_v7 = vadd.f32 %v4356_v2, %v9464_v9 }
 0x2f6   : > { %v2796_v48 = vpop.f32.mrf.mxu2  ;;  %v3149_v20 = vpop.f32.mrf.mxu3 }
 0x2f7   : > { %v4480_v34 = vadd.f32 %v8225_v32, %v4412_v7  ;;  %v3150_v61 = vadd.f32 %v3149_v20, %v2796_v48  ;;  %v6058_v48 = vld [vmem:[%s6802_s8 + $0x241] sm:$0xff] }
 0x2f8   : > { %v5983_v20 = vld [vmem:[%s6802_s8 + $0x240] sm:$0xff] }
 0x2f9   : > { %4545 = vst.msk [vmem:[%s8232_s26 + $0x30] sm:$0xff] %vm4541_vm2, %v4480_v34  ;;  %v3806_v27 = vadd.f32 %v3646_v36, %v3150_v61  ;;  %5190 = vrot.lane.b32.xlu2 %v4480_v34, %s6722_s15  ;;  %5188 = vrot.lane.b32.xlu1 %v4479_v21, %s6722_s15  ;;  %v3649_v43 = vpop.f32.mrf.mxu1 }
 0x2fa   : > { %v4200_v30 = vpop.f32.mrf.mxu0  ;;  %v4783_v44 = vpop.permute.xlu2 %4782  ;;  %4931 = vrot.lane.b32.xlu0 %v4479_v21, %s6723_s27 }
 0x2fb   : > { %6522 = vst.msk [vmem:[%s8232_s26 + $0x708] sm:$0xff] %vm4541_vm2, %v4783_v44  ;;  %v4357_v24 = vadd.f32 %v4197_v6, %v3806_v27  ;;  %6112 = vmatmul.msk.f32.gmra.mxu2 %vm451_vm1, %v6055_v25  ;;  %6169 = vmatmul.msk.f32.gmra.mxu3 %vm451_vm1, %v5980_v38  ;;  %v9467_v6 = vld [vmem:[#allocation10_spill] sm:$0xff] }
 0x2fc   : > { %6300 = vmatmul.msk.f32.gmra.mxu1 %vm451_vm1, %v5981_v16 }
 0x2fd   : > { %6431 = vmatmul.msk.f32.gmra.mxu0 %vm451_vm1, %v6056_v58  ;;  %v4413_v52 = vadd.f32 %v4357_v24, %v9465_v28  ;;  %v9468_v28 = vld [vmem:[#allocation11_spill] sm:$0xff] }
 0x2fe   : > { %v2799_v50 = vpop.f32.mrf.mxu2  ;;  %v3152_v41 = vpop.f32.mrf.mxu3 }
 0x2ff   : > { %v4481_v3 = vadd.f32 %v8225_v32, %v4413_v52  ;;  %v3153_v15 = vadd.f32 %v3152_v41, %v2799_v50 }
 0x301   : > { %4546 = vst.msk [vmem:[%s8232_s26 + $0x40] sm:$0xff] %vm4541_vm2, %v4481_v3  ;;  %v3807_v22 = vadd.f32 %v3649_v43, %v3153_v15  ;;  %4678 = vrot.lane.b32.xlu2 %v4481_v3, %s6724_s28  ;;  %4676 = vrot.lane.b32.xlu1 %v4480_v34, %s6724_s28  ;;  %v3652_v59 = vpop.f32.mrf.mxu1  ;;  %v5984_v43 = vld [vmem:[%s6802_s8 + $0x250] sm:$0xff] }
 0x302   : > { %v4203_v37 = vpop.f32.mrf.mxu0  ;;  %v5299_v26 = vpop.permute.xlu2 %5298  ;;  %5192 = vrot.lane.b32.xlu0 %v4481_v3, %s6722_s15 }
 0x303   : > { %6651 = vst.msk [vmem:[%s8232_s26 + $0x798] sm:$0xff] %vm4541_vm2, %v5299_v26  ;;  %v4358_v8 = vadd.f32 %v4200_v30, %v3807_v22  ;;  %6113 = vmatmul.msk.f32.gmra.mxu2 %vm451_vm1, %v6056_v58  ;;  %6170 = vmatmul.msk.f32.gmra.mxu3 %vm451_vm1, %v5981_v16  ;;  %v6059_v58 = vld [vmem:[%s6802_s8 + $0x251] sm:$0xff] }
 0x304   : > { %6301 = vmatmul.msk.f32.gmra.mxu1 %vm451_vm1, %v5982_v55 }
 0x305   : > { %6432 = vmatmul.msk.f32.gmra.mxu0 %vm451_vm1, %v6057_v17  ;;  %v4414_v40 = vadd.f32 %v4358_v8, %v9466_v19 }
 0x306   : > { %v2802_v0 = vpop.f32.mrf.mxu2  ;;  %v3155_v63 = vpop.f32.mrf.mxu3 }
 0x307   : > { %v4482_v10 = vadd.f32 %v8225_v32, %v4414_v40  ;;  %v3156_v49 = vadd.f32 %v3155_v63, %v2802_v0  ;;  %v6060_v40 = vld [vmem:[%s6802_s8 + $0x261] sm:$0xff]  ;;  %v9469_v0 = vld [vmem:[#allocation12_spill] sm:$0xff] }
 0x309   : > { %4547 = vst.msk [vmem:[%s8232_s26 + $0x50] sm:$0xff] %vm4541_vm2, %v4482_v10  ;;  %v3808_v14 = vadd.f32 %v3652_v59, %v3156_v49  ;;  %4935 = vrot.lane.b32.xlu2 %v4481_v3, %s6723_s27  ;;  %4933 = vrot.lane.b32.xlu1 %v4480_v34, %s6723_s27  ;;  %v3655_v33 = vpop.f32.mrf.mxu1 }
 0x30a   : > { %v4206_v21 = vpop.f32.mrf.mxu0  ;;  %v5044_v45 = vpop.permute.xlu2 %5043  ;;  %4937 = vrot.lane.b32.xlu0 %v4482_v10, %s6723_s27 }
 0x30b   : > { %6588 = vst.msk [vmem:[%s8232_s26 + $0x7a0] sm:$0xff] %vm4541_vm2, %v5044_v45  ;;  %v4359_v36 = vadd.f32 %v4203_v37, %v3808_v14  ;;  %6114 = vmatmul.msk.f32.gmra.mxu2 %vm451_vm1, %v6057_v17  ;;  %6171 = vmatmul.msk.f32.gmra.mxu3 %vm451_vm1, %v5982_v55  ;;  %v5985_v55 = vld [vmem:[%s6802_s8 + $0x260] sm:$0xff]  ;;  %v5986_v45 = vld [vmem:[%s6802_s8 + $0x270] sm:$0xff] }
 0x30c   : > { %6302 = vmatmul.msk.f32.gmra.mxu1 %vm451_vm1, %v6245_v29 }
 0x30d   : > { %6433 = vmatmul.msk.f32.gmra.mxu0 %vm451_vm1, %v6376_v62  ;;  %v4415_v38 = vadd.f32 %v4359_v36, %v9467_v6 }
 0x30e   : > { %v2805_v2 = vpop.f32.mrf.mxu2  ;;  %v3158_v25 = vpop.f32.mrf.mxu3 }
 0x30f   : > { %v4483_v9 = vadd.f32 %v8225_v32, %v4415_v38  ;;  %v3159_v7 = vadd.f32 %v3158_v25, %v2805_v2  ;;  %v6061_v25 = vld [vmem:[%s6802_s8 + $0x271] sm:$0xff] }
 0x311   : > { %4548 = vst.msk [vmem:[%s8232_s26 + $0x60] sm:$0xff] %vm4541_vm2, %v4483_v9  ;;  %v3809_v34 = vadd.f32 %v3655_v33, %v3159_v7  ;;  %v5297_v61 = vpop.permute.xlu1 %5296  ;;  %v5040_v27 = vpop.permute.xlu0 %5039  ;;  %4680 = vrot.lane.b32.xlu2 %v4482_v10, %s6724_s28  ;;  %5194 = vrot.lane.b32.xlu1 %v4482_v10, %s6722_s15 }
 0x312   : > { %6650 = vst.msk [vmem:[%s8232_s26 + $0x788] sm:$0xff] %vm4541_vm2, %v5297_v61  ;;  %v4789_v30 = vpop.permute.xlu2 %4788  ;;  %4682 = vrot.lane.b32.xlu0 %v4483_v9, %s6724_s28  ;;  %v3658_v16 = vpop.f32.mrf.mxu1 }
 0x313   : > { %6586 = vst.msk [vmem:[%s8232_s26 + $0x780] sm:$0xff] %vm4541_vm2, %v5040_v27  ;;  %v4360_v44 = vadd.f32 %v4206_v21, %v3809_v34  ;;  %6115 = vmatmul.msk.f32.gmra.mxu2 %vm451_vm1, %v6058_v48  ;;  %6172 = vmatmul.msk.f32.gmra.mxu3 %vm451_vm1, %v5983_v20  ;;  %v4209_v24 = vpop.f32.mrf.mxu0 }
 0x314   : > { %6525 = vst.msk [vmem:[%s8232_s26 + $0x738] sm:$0xff] %vm4541_vm2, %v4789_v30  ;;  %6303 = vmatmul.msk.f32.gmra.mxu1 %vm451_vm1, %v5984_v43 }
 0x315   : > { %6434 = vmatmul.msk.f32.gmra.mxu0 %vm451_vm1, %v6059_v58  ;;  %v4416_v52 = vadd.f32 %v4360_v44, %v9468_v28 }
 0x316   : > { %v2808_v50 = vpop.f32.mrf.mxu2  ;;  %v3161_v41 = vpop.f32.mrf.mxu3 }
 0x317   : > { %v4484_v3 = vadd.f32 %v8225_v32, %v4416_v52  ;;  %v3162_v15 = vadd.f32 %v3161_v41, %v2808_v50  ;;  %v6062_v52 = vld [vmem:[%s6802_s8 + $0x281] sm:$0xff] }
 0x318   : > { %v9471_v50 = vld [vmem:[#allocation14_spill] sm:$0xff] }
 0x319   : > { %4549 = vst.msk [vmem:[%s8232_s26 + $0x70] sm:$0xff] %vm4541_vm2, %v4484_v3  ;;  %v3810_v22 = vadd.f32 %v3658_v16, %v3162_v15  ;;  %v5042_v59 = vpop.permute.xlu1 %5041  ;;  %v4785_v37 = vpop.permute.xlu0 %4784  ;;  %5196 = vrot.lane.b32.xlu2 %v4483_v9, %s6722_s15  ;;  %4939 = vrot.lane.b32.xlu1 %v4483_v9, %s6723_s27  ;;  %v9470_v9 = vld [vmem:[#allocation13_spill] sm:$0xff]  ;;  %v5987_v16 = vld [vmem:[%s6802_s8 + $0x280] sm:$0xff] }
 0x31a   : > { %6587 = vst.msk [vmem:[%s8232_s26 + $0x790] sm:$0xff] %vm4541_vm2, %v5042_v59  ;;  %v5305_v26 = vpop.permute.xlu2 %5304  ;;  %5198 = vrot.lane.b32.xlu0 %v4484_v3, %s6722_s15  ;;  %v3661_v8 = vpop.f32.mrf.mxu1 }
 0x31b   : > { %6523 = vst.msk [vmem:[%s8232_s26 + $0x718] sm:$0xff] %vm4541_vm2, %v4785_v37  ;;  %v4361_v17 = vadd.f32 %v4209_v24, %v3810_v22  ;;  %6116 = vmatmul.msk.f32.gmra.mxu2 %vm451_vm1, %v6059_v58  ;;  %6173 = vmatmul.msk.f32.gmra.mxu3 %vm451_vm1, %v5984_v43  ;;  %v4212_v19 = vpop.f32.mrf.mxu0 }
 0x31c   : > { %6654 = vst.msk [vmem:[%s8232_s26 + $0x7c8] sm:$0xff] %vm4541_vm2, %v5305_v26  ;;  %6304 = vmatmul.msk.f32.gmra.mxu1 %vm451_vm1, %v5985_v55 }
 0x31d   : > { %6435 = vmatmul.msk.f32.gmra.mxu0 %vm451_vm1, %v6060_v40  ;;  %v4417_v63 = vadd.f32 %v4361_v17, %v9469_v0  ;;  %v6063_v0 = vld [vmem:[%s6802_s8 + $0x291] sm:$0xff] }
 0x31e   : > { %v2811_v10 = vpop.f32.mrf.mxu2  ;;  %v3164_v49 = vpop.f32.mrf.mxu3 }
 0x31f   : > { %v4485_v29 = vadd.f32 %v8225_v32, %v4417_v63  ;;  %v3165_v14 = vadd.f32 %v3164_v49, %v2811_v10  ;;  %v9472_v63 = vld [vmem:[#allocation15_spill] sm:$0xff] }
 0x321   : > { %4550 = vst.msk [vmem:[%s8232_s26 + $0x100] sm:$0xff] %vm4541_vm2, %v4485_v29  ;;  %v3811_v33 = vadd.f32 %v3661_v8, %v3165_v14  ;;  %v4787_v21 = vpop.permute.xlu1 %4786  ;;  %v5301_v62 = vpop.permute.xlu0 %5300  ;;  %4941 = vrot.lane.b32.xlu2 %v4484_v3, %s6723_s27  ;;  %4684 = vrot.lane.b32.xlu1 %v4484_v3, %s6724_s28  ;;  %v5988_v8 = vld [vmem:[%s6802_s8 + $0x290] sm:$0xff] }
 0x322   : > { %6524 = vst.msk [vmem:[%s8232_s26 + $0x728] sm:$0xff] %vm4541_vm2, %v4787_v21  ;;  %v5050_v36 = vpop.permute.xlu2 %5049  ;;  %4943 = vrot.lane.b32.xlu0 %v4485_v29, %s6723_s27  ;;  %v3664_v6 = vpop.f32.mrf.mxu1 }
 0x323   : > { %6652 = vst.msk [vmem:[%s8232_s26 + $0x7a8] sm:$0xff] %vm4541_vm2, %v5301_v62  ;;  %v4362_v38 = vadd.f32 %v4212_v19, %v3811_v33  ;;  %6117 = vmatmul.msk.f32.gmra.mxu2 %vm451_vm1, %v6060_v40  ;;  %6174 = vmatmul.msk.f32.gmra.mxu3 %vm451_vm1, %v5985_v55  ;;  %v4215_v2 = vpop.f32.mrf.mxu0 }
 0x324   : > { %6591 = vst.msk [vmem:[%s8232_s26 + $0x7d0] sm:$0xff] %vm4541_vm2, %v5050_v36  ;;  %6305 = vmatmul.msk.f32.gmra.mxu1 %vm451_vm1, %v5986_v45 }
 0x325   : > { %6436 = vmatmul.msk.f32.gmra.mxu0 %vm451_vm1, %v6061_v25  ;;  %v4418_v7 = vadd.f32 %v4362_v38, %v9470_v9  ;;  %v9473_v9 = vld [vmem:[#allocation16_spill] sm:$0xff] }
 0x326   : > { %v2814_v48 = vpop.f32.mrf.mxu2  ;;  %v3167_v20 = vpop.f32.mrf.mxu3 }
 0x327   : > { %v4486_v34 = vadd.f32 %v8225_v32, %v4418_v7  ;;  %v3168_v61 = vadd.f32 %v3167_v20, %v2814_v48 }
 0x329   : > { %4551 = vst.msk [vmem:[%s8232_s26 + $0x110] sm:$0xff] %vm4541_vm2, %v4486_v34  ;;  %v3812_v27 = vadd.f32 %v3664_v6, %v3168_v61  ;;  %v5303_v43 = vpop.permute.xlu1 %5302  ;;  %v5046_v30 = vpop.permute.xlu0 %5045  ;;  %4686 = vrot.lane.b32.xlu2 %v4485_v29, %s6724_s28  ;;  %5200 = vrot.lane.b32.xlu1 %v4485_v29, %s6722_s15 }
 0x32a   : > { %6653 = vst.msk [vmem:[%s8232_s26 + $0x7b8] sm:$0xff] %vm4541_vm2, %v5303_v43  ;;  %v4795_v44 = vpop.permute.xlu2 %4794  ;;  %4688 = vrot.lane.b32.xlu0 %v4486_v34, %s6724_s28  ;;  %v3667_v24 = vpop.f32.mrf.mxu1 }
 0x32b   : > { %6589 = vst.msk [vmem:[%s8232_s26 + $0x7b0] sm:$0xff] %vm4541_vm2, %v5046_v30  ;;  %v4363_v58 = vadd.f32 %v4215_v2, %v3812_v27  ;;  %6118 = vmatmul.msk.f32.gmra.mxu2 %vm451_vm1, %v6061_v25  ;;  %6175 = vmatmul.msk.f32.gmra.mxu3 %vm451_vm1, %v5986_v45  ;;  %v4218_v28 = vpop.f32.mrf.mxu0  ;;  %v5989_v45 = vld [vmem:[%s6802_s8 + $0x2a0] sm:$0xff]  ;;  %v5990_v30 = vld [vmem:[%s6802_s8 + $0x2b0] sm:$0xff] }
 0x32c   : > { %6528 = vst.msk [vmem:[%s8232_s26 + $0x768] sm:$0xff] %vm4541_vm2, %v4795_v44  ;;  %6306 = vmatmul.msk.f32.gmra.mxu1 %vm451_vm1, %v5987_v16  ;;  %v6064_v25 = vld [vmem:[%s6802_s8 + $0x2a1] sm:$0xff] }
 0x32d   : > { %6437 = vmatmul.msk.f32.gmra.mxu0 %vm451_vm1, %v6062_v52  ;;  %v4419_v41 = vadd.f32 %v4363_v58, %v9471_v50 }
 0x32e   : > { %v2817_v3 = vpop.f32.mrf.mxu2  ;;  %v3170_v15 = vpop.f32.mrf.mxu3 }
 0x32f   : > { %v4487_v22 = vadd.f32 %v8225_v32, %v4419_v41  ;;  %v3171_v59 = vadd.f32 %v3170_v15, %v2817_v3 }
 0x331   : > { %4552 = vst.msk [vmem:[%s8232_s26 + $0x120] sm:$0xff] %vm4541_vm2, %v4487_v22  ;;  %v3813_v37 = vadd.f32 %v3667_v24, %v3171_v59  ;;  %v5048_v55 = vpop.permute.xlu1 %5047  ;;  %v4791_v26 = vpop.permute.xlu0 %4790  ;;  %5202 = vrot.lane.b32.xlu2 %v4486_v34, %s6722_s15  ;;  %4945 = vrot.lane.b32.xlu1 %v4486_v34, %s6723_s27  ;;  %v6253_v59 = vld [vmem:[%s6802_s8 + $0x2c0] sm:$0xff] }
 0x332   : > { %6590 = vst.msk [vmem:[%s8232_s26 + $0x7c0] sm:$0xff] %vm4541_vm2, %v5048_v55  ;;  %5204 = vrot.lane.b32.xlu0 %v4487_v22, %s6722_s15  ;;  %v3670_v17 = vpop.f32.mrf.mxu1 }
 0x333   : > { %6526 = vst.msk [vmem:[%s8232_s26 + $0x748] sm:$0xff] %vm4541_vm2, %v4791_v26  ;;  %v4364_v19 = vadd.f32 %v4218_v28, %v3813_v37  ;;  %6119 = vmatmul.msk.f32.gmra.mxu2 %vm451_vm1, %v6062_v52  ;;  %6176 = vmatmul.msk.f32.gmra.mxu3 %vm451_vm1, %v5987_v16  ;;  %v4221_v40 = vpop.f32.mrf.mxu0  ;;  %v6065_v28 = vld [vmem:[%s6802_s8 + $0x2b1] sm:$0xff] }
 0x334   : > { %6307 = vmatmul.msk.f32.gmra.mxu1 %vm451_vm1, %v5988_v8  ;;  %v9474_v52 = vld [vmem:[#allocation17_spill] sm:$0xff] }
 0x335   : > { %6438 = vmatmul.msk.f32.gmra.mxu0 %vm451_vm1, %v6063_v0  ;;  %v4420_v10 = vadd.f32 %v4364_v19, %v9472_v63 }
 0x336   : > { %v2820_v49 = vpop.f32.mrf.mxu2  ;;  %v3173_v29 = vpop.f32.mrf.mxu3 }
 0x337   : > { %v4488_v14 = vadd.f32 %v8225_v32, %v4420_v10  ;;  %v3174_v33 = vadd.f32 %v3173_v29, %v2820_v49 }
 0x339   : > { %4553 = vst.msk [vmem:[%s8232_s26 + $0x130] sm:$0xff] %vm4541_vm2, %v4488_v14  ;;  %v3814_v21 = vadd.f32 %v3670_v17, %v3174_v33  ;;  %v4793_v62 = vpop.permute.xlu1 %4792  ;;  %4947 = vrot.lane.b32.xlu2 %v4487_v22, %s6723_s27  ;;  %4690 = vrot.lane.b32.xlu1 %v4487_v22, %s6724_s28  ;;  %v6066_v33 = vld [vmem:[%s6802_s8 + $0x2d1] sm:$0xff] }
 0x33a   : > { %6527 = vst.msk [vmem:[%s8232_s26 + $0x758] sm:$0xff] %vm4541_vm2, %v4793_v62  ;;  %4949 = vrot.lane.b32.xlu0 %v4488_v14, %s6723_s27  ;;  %v3673_v36 = vpop.f32.mrf.mxu1 }
 0x33b   : > { %v4365_v6 = vadd.f32 %v4221_v40, %v3814_v21  ;;  %6120 = vmatmul.msk.f32.gmra.mxu2 %vm451_vm1, %v6063_v0  ;;  %6177 = vmatmul.msk.f32.gmra.mxu3 %vm451_vm1, %v5988_v8  ;;  %v5185_v38 = vpop.permute.xlu2 %5184  ;;  %v4224_v2 = vpop.f32.mrf.mxu0  ;;  %v6384_v8 = vld [vmem:[%s6802_s8 + $0x2c1] sm:$0xff]  ;;  %v5991_v21 = vld [vmem:[%s6802_s8 + $0x2d0] sm:$0xff] }
 0x33c   : > { %6594 = vst.msk [vmem:[%s8232_s26 + $0x88] sm:$0xff] %vm4541_vm2, %v5185_v38  ;;  %6308 = vmatmul.msk.f32.gmra.mxu1 %vm451_vm1, %v5989_v45  ;;  %v9475_v0 = vld [vmem:[#allocation18_spill] sm:$0xff] }
 0x33d   : > { %6439 = vmatmul.msk.f32.gmra.mxu0 %vm451_vm1, %v6064_v25  ;;  %v4421_v7 = vadd.f32 %v4365_v6, %v9473_v9 }
 0x33e   : > { %v2823_v48 = vpop.f32.mrf.mxu2  ;;  %v3176_v20 = vpop.f32.mrf.mxu3 }
 0x33f   : > { %v4489_v34 = vadd.f32 %v8225_v32, %v4421_v7  ;;  %v3177_v61 = vadd.f32 %v3176_v20, %v2823_v48  ;;  %v9476_v7 = vld [vmem:[#allocation19_spill] sm:$0xff] }
 0x341   : > { %4554 = vst.msk [vmem:[%s8232_s26 + $0x140] sm:$0xff] %vm4541_vm2, %v4489_v34  ;;  %v3815_v27 = vadd.f32 %v3673_v36, %v3177_v61  ;;  %v5052_v43 = vpop.permute.xlu0 %5051  ;;  %4692 = vrot.lane.b32.xlu2 %v4488_v14, %s6724_s28  ;;  %5206 = vrot.lane.b32.xlu1 %v4488_v14, %s6722_s15  ;;  %v8629_v61 = vld [vmem:[%s9416_s3] ss:$0 sm:$0xff] }
 0x342   : > { %6592 = vst.msk [vmem:[%s8232_s26 + $0x7e0] sm:$0xff] %vm4541_vm2, %v5052_v43  ;;  %4694 = vrot.lane.b32.xlu0 %v4489_v34, %s6724_s28  ;;  %v3676_v16 = vpop.f32.mrf.mxu1 }
 0x343   : > { %v4366_v44 = vadd.f32 %v4224_v2, %v3815_v27  ;;  %6121 = vmatmul.msk.f32.gmra.mxu2 %vm451_vm1, %v6064_v25  ;;  %6178 = vmatmul.msk.f32.gmra.mxu3 %vm451_vm1, %v5989_v45  ;;  %v4930_v24 = vpop.permute.xlu2 %4929  ;;  %v4227_v58 = vpop.f32.mrf.mxu0  ;;  %v5992_v45 = vld [vmem:[%s6802_s8 + $0x2e0] sm:$0xff] }
 0x344   : > { %6531 = vst.msk [vmem:[%s8232_s26 + $0x90] sm:$0xff] %vm4541_vm2, %v4930_v24  ;;  %6309 = vmatmul.msk.f32.gmra.mxu1 %vm451_vm1, %v5990_v30  ;;  %v6067_v2 = vld [vmem:[%s6802_s8 + $0x2e1] sm:$0xff] }
 0x345   : > { %6440 = vmatmul.msk.f32.gmra.mxu0 %vm451_vm1, %v6065_v28  ;;  %v4422_v50 = vadd.f32 %v4366_v44, %v9474_v52 }
 0x346   : > { %v2826_v41 = vpop.f32.mrf.mxu2  ;;  %v3179_v3 = vpop.f32.mrf.mxu3 }
 0x347   : > { %v4490_v15 = vadd.f32 %v8225_v32, %v4422_v50  ;;  %v3180_v22 = vadd.f32 %v3179_v3, %v2826_v41  ;;  %v9477_v41 = vld [vmem:[#allocation20_spill] sm:$0xff] }
 0x349   : > { %4555 = vst.msk [vmem:[%s8232_s26 + $0x150] sm:$0xff] %vm4541_vm2, %v4490_v15  ;;  %v3816_v37 = vadd.f32 %v3676_v16, %v3180_v22  ;;  %v5054_v55 = vpop.permute.xlu1 %5053  ;;  %v4797_v26 = vpop.permute.xlu0 %4796  ;;  %5208 = vrot.lane.b32.xlu2 %v4489_v34, %s6722_s15  ;;  %4951 = vrot.lane.b32.xlu1 %v4489_v34, %s6723_s27  ;;  %v5993_v16 = vld [vmem:[%s6802_s8 + $0x2f0] sm:$0xff] }
 0x34a   : > { %6593 = vst.msk [vmem:[%s8232_s26 + $0x7f0] sm:$0xff] %vm4541_vm2, %v5054_v55  ;;  %5210 = vrot.lane.b32.xlu0 %v4490_v15, %s6722_s15  ;;  %v3679_v17 = vpop.f32.mrf.mxu1 }
 0x34b   : > { %6529 = vst.msk [vmem:[%s8232_s26 + $0x778] sm:$0xff] %vm4541_vm2, %v4797_v26  ;;  %v4367_v19 = vadd.f32 %v4227_v58, %v3816_v37  ;;  %6122 = vmatmul.msk.f32.gmra.mxu2 %vm451_vm1, %v6065_v28  ;;  %6179 = vmatmul.msk.f32.gmra.mxu3 %vm451_vm1, %v5990_v30  ;;  %v4230_v40 = vpop.f32.mrf.mxu0  ;;  %v6068_v28 = vld [vmem:[%s6802_s8 + $0x2f1] sm:$0xff]  ;;  %v5994_v26 = vld [vmem:[%s6802_s8 + $0x300] sm:$0xff] }
 0x34c   : > { %6310 = vmatmul.msk.f32.gmra.mxu1 %vm451_vm1, %v6253_v59 }
 0x34d   : > { %6441 = vmatmul.msk.f32.gmra.mxu0 %vm451_vm1, %v6384_v8  ;;  %v4423_v63 = vadd.f32 %v4367_v19, %v9475_v0  ;;  %v6069_v0 = vld [vmem:[%s6802_s8 + $0x301] sm:$0xff] }
 0x34e   : > { %v2829_v10 = vpop.f32.mrf.mxu2  ;;  %v3182_v49 = vpop.f32.mrf.mxu3 }
 0x34f   : > { %v4491_v29 = vadd.f32 %v8225_v32, %v4423_v63  ;;  %v3183_v14 = vadd.f32 %v3182_v49, %v2829_v10  ;;  %v9478_v49 = vld [vmem:[#allocation21_spill] sm:$0xff] }
 0x351   : > { %4556 = vst.msk [vmem:[%s8232_s26 + $0x160] sm:$0xff] %vm4541_vm2, %v4491_v29  ;;  %v3817_v62 = vadd.f32 %v3679_v17, %v3183_v14  ;;  %4953 = vrot.lane.b32.xlu2 %v4490_v15, %s6723_s27  ;;  %4696 = vrot.lane.b32.xlu1 %v4490_v15, %s6724_s28 }
 0x352   : > { %4955 = vrot.lane.b32.xlu0 %v4491_v29, %s6723_s27  ;;  %v3682_v36 = vpop.f32.mrf.mxu1 }
 0x353   : > { %v4368_v6 = vadd.f32 %v4230_v40, %v3817_v62  ;;  %6123 = vmatmul.msk.f32.gmra.mxu2 %vm451_vm1, %v6066_v33  ;;  %6180 = vmatmul.msk.f32.gmra.mxu3 %vm451_vm1, %v5991_v21  ;;  %v5191_v32 = vpop.permute.xlu2 %5190  ;;  %v4928_v38 = vpop.permute.xlu1 %4927 }
 0x354   : > { %6597 = vst.msk [vmem:[%s8232_s26 + $0xb8] sm:$0xff] %vm4541_vm2, %v5191_v32  ;;  %v4671_v25 = vpop.permute.xlu0 %4670  ;;  %v4233_v9 = vpop.f32.mrf.mxu0  ;;  %6311 = vmatmul.msk.f32.gmra.mxu1 %vm451_vm1, %v5992_v45 }
 0x355   : > { %6442 = vmatmul.msk.f32.gmra.mxu0 %vm451_vm1, %v6067_v2  ;;  %v4424_v48 = vadd.f32 %v4368_v6, %v9476_v7  ;;  %6530 = vst.msk [vmem:[%s8232_s26 + $0x80] sm:$0xff] %vm4541_vm2, %v4928_v38 }
 0x356   : > { %6466 = vst.msk [vmem:[%s8232_s26 + $0x8] sm:$0xff] %vm4541_vm2, %v4671_v25  ;;  %v2832_v20 = vpop.f32.mrf.mxu2  ;;  %v3185_v34 = vpop.f32.mrf.mxu3  ;;  %v6070_v25 = vld [vmem:[%s6802_s8 + $0x311] sm:$0xff] }
 0x357   : > { %v4492_v27 = vadd.f32 %v8629_v61, %v4424_v48  ;;  %v3186_v43 = vadd.f32 %v3185_v34, %v2832_v20  ;;  %v9479_v48 = vld [vmem:[#allocation22_spill] sm:$0xff] }
 0x359   : > { %4557 = vst.msk [vmem:[%s8232_s26 + $0x170] sm:$0xff] %vm4541_vm2, %v4492_v27  ;;  %v3818_v30 = vadd.f32 %v3682_v36, %v3186_v43  ;;  %4698 = vrot.lane.b32.xlu2 %v4491_v29, %s6724_s28  ;;  %5212 = vrot.lane.b32.xlu1 %v4491_v29, %s6722_s15  ;;  %v5995_v36 = vld [vmem:[%s6802_s8 + $0x310] sm:$0xff] }
 0x35a   : > { %4700 = vrot.lane.b32.xlu0 %v4492_v27, %s6724_s28  ;;  %v3685_v44 = vpop.f32.mrf.mxu1 }
 0x35b   : > { %v4369_v24 = vadd.f32 %v4233_v9, %v3818_v30  ;;  %6124 = vmatmul.msk.f32.gmra.mxu2 %vm451_vm1, %v6067_v2  ;;  %6181 = vmatmul.msk.f32.gmra.mxu3 %vm451_vm1, %v5992_v45  ;;  %v4679_v58 = vpop.permute.xlu2 %4678 }
 0x35c   : > { %6470 = vst.msk [vmem:[%s8232_s26 + $0x48] sm:$0xff] %vm4541_vm2, %v4679_v58  ;;  %v4673_v52 = vpop.permute.xlu0 %4672  ;;  %v4236_v50 = vpop.f32.mrf.mxu0  ;;  %6312 = vmatmul.msk.f32.gmra.mxu1 %vm451_vm1, %v5993_v16 }
 0x35d   : > { %6443 = vmatmul.msk.f32.gmra.mxu0 %vm451_vm1, %v6068_v28  ;;  %v4425_v3 = vadd.f32 %v4369_v24, %v9477_v41  ;;  %6467 = vst.msk [vmem:[%s8232_s26 + $0x18] sm:$0xff] %vm4541_vm2, %v4673_v52 }
 0x35e   : > { %v2835_v15 = vpop.f32.mrf.mxu2  ;;  %v3188_v22 = vpop.f32.mrf.mxu3 }
 0x35f   : > { %v4493_v59 = vadd.f32 %v8629_v61, %v4425_v3  ;;  %v3189_v37 = vadd.f32 %v3188_v22, %v2835_v15  ;;  %v9480_v15 = vld [vmem:[#allocation23_spill] sm:$0xff] }
 0x361   : > { %4558 = vst.msk [vmem:[%s8232_s26 + $0x200] sm:$0xff] %vm4541_vm2, %v4493_v59  ;;  %v3819_v55 = vadd.f32 %v3685_v44, %v3189_v37  ;;  %5214 = vrot.lane.b32.xlu2 %v4492_v27, %s6722_s15  ;;  %4957 = vrot.lane.b32.xlu1 %v4492_v27, %s6723_s27  ;;  %v5996_v44 = vld [vmem:[%s6802_s8 + $0x320] sm:$0xff] }
 0x362   : > { %5216 = vrot.lane.b32.xlu0 %v4493_v59, %s6722_s15  ;;  %v3688_v8 = vpop.f32.mrf.mxu1 }
 0x363   : > { %v4370_v17 = vadd.f32 %v4236_v50, %v3819_v55  ;;  %6125 = vmatmul.msk.f32.gmra.mxu2 %vm451_vm1, %v6068_v28  ;;  %6182 = vmatmul.msk.f32.gmra.mxu3 %vm451_vm1, %v5993_v16  ;;  %v4936_v19 = vpop.permute.xlu2 %4935  ;;  %v4675_v40 = vpop.permute.xlu1 %4674  ;;  %v6071_v50 = vld [vmem:[%s6802_s8 + $0x321] sm:$0xff] }
 0x364   : > { %6534 = vst.msk [vmem:[%s8232_s26 + $0xc0] sm:$0xff] %vm4541_vm2, %v4936_v19  ;;  %v5187_v63 = vpop.permute.xlu0 %5186  ;;  %v4239_v10 = vpop.f32.mrf.mxu0  ;;  %6313 = vmatmul.msk.f32.gmra.mxu1 %vm451_vm1, %v5994_v26 }
 0x365   : > { %6444 = vmatmul.msk.f32.gmra.mxu0 %vm451_vm1, %v6069_v0  ;;  %v4426_v29 = vadd.f32 %v4370_v17, %v9478_v49  ;;  %6468 = vst.msk [vmem:[%s8232_s26 + $0x28] sm:$0xff] %vm4541_vm2, %v4675_v40  ;;  %v5997_v17 = vld [vmem:[%s6802_s8 + $0x330] sm:$0xff] }
 0x366   : > { %6595 = vst.msk [vmem:[%s8232_s26 + $0x98] sm:$0xff] %vm4541_vm2, %v5187_v63  ;;  %v2838_v14 = vpop.f32.mrf.mxu2  ;;  %v3191_v33 = vpop.f32.mrf.mxu3 }
 0x367   : > { %v4494_v21 = vadd.f32 %v8629_v61, %v4426_v29  ;;  %v3192_v62 = vadd.f32 %v3191_v33, %v2838_v14  ;;  %v9481_v14 = vld [vmem:[#allocation24_spill] sm:$0xff] }
 0x369   : > { %4559 = vst.msk [vmem:[%s8232_s26 + $0x210] sm:$0xff] %vm4541_vm2, %v4494_v21  ;;  %v3820_v45 = vadd.f32 %v3688_v8, %v3192_v62  ;;  %4959 = vrot.lane.b32.xlu2 %v4493_v59, %s6723_s27  ;;  %4702 = vrot.lane.b32.xlu1 %v4493_v59, %s6724_s28 }
 0x36a   : > { %4961 = vrot.lane.b32.xlu0 %v4494_v21, %s6723_s27  ;;  %v3691_v6 = vpop.f32.mrf.mxu1 }
 0x36b   : > { %v4371_v32 = vadd.f32 %v4239_v10, %v3820_v45  ;;  %6126 = vmatmul.msk.f32.gmra.mxu2 %vm451_vm1, %v6069_v0  ;;  %6183 = vmatmul.msk.f32.gmra.mxu3 %vm451_vm1, %v5994_v26  ;;  %v4681_v38 = vpop.permute.xlu2 %4680  ;;  %v5189_v2 = vpop.permute.xlu1 %5188  ;;  %v6072_v10 = vld [vmem:[%s6802_s8 + $0x331] sm:$0xff] }
 0x36c   : > { %6471 = vst.msk [vmem:[%s8232_s26 + $0x58] sm:$0xff] %vm4541_vm2, %v4681_v38  ;;  %v4932_v9 = vpop.permute.xlu0 %4931  ;;  %v4242_v7 = vpop.f32.mrf.mxu0  ;;  %6314 = vmatmul.msk.f32.gmra.mxu1 %vm451_vm1, %v5995_v36 }
 0x36d   : > { %6445 = vmatmul.msk.f32.gmra.mxu0 %vm451_vm1, %v6070_v25  ;;  %v4427_v20 = vadd.f32 %v4371_v32, %v9479_v48  ;;  %6596 = vst.msk [vmem:[%s8232_s26 + $0xa8] sm:$0xff] %vm4541_vm2, %v5189_v2  ;;  %v5998_v32 = vld [vmem:[%s6802_s8 + $0x340] sm:$0xff] }
 0x36e   : > { %6532 = vst.msk [vmem:[%s8232_s26 + $0xa0] sm:$0xff] %vm4541_vm2, %v4932_v9  ;;  %v2841_v34 = vpop.f32.mrf.mxu2  ;;  %v3194_v27 = vpop.f32.mrf.mxu3 }
 0x36f   : > { %v4495_v43 = vadd.f32 %v8629_v61, %v4427_v20  ;;  %v3195_v30 = vadd.f32 %v3194_v27, %v2841_v34  ;;  %v9482_v34 = vld [vmem:[#allocation25_spill] sm:$0xff] }
 0x371   : > { %4560 = vst.msk [vmem:[%s8232_s26 + $0x220] sm:$0xff] %vm4541_vm2, %v4495_v43  ;;  %v3821_v16 = vadd.f32 %v3691_v6, %v3195_v30  ;;  %4704 = vrot.lane.b32.xlu2 %v4494_v21, %s6724_s28  ;;  %5218 = vrot.lane.b32.xlu1 %v4494_v21, %s6722_s15 }
 0x372   : > { %4706 = vrot.lane.b32.xlu0 %v4495_v43, %s6724_s28  ;;  %v3694_v24 = vpop.f32.mrf.mxu1 }
 0x373   : > { %v4372_v58 = vadd.f32 %v4242_v7, %v3821_v16  ;;  %6127 = vmatmul.msk.f32.gmra.mxu2 %vm451_vm1, %v6070_v25  ;;  %6184 = vmatmul.msk.f32.gmra.mxu3 %vm451_vm1, %v5995_v36  ;;  %v5197_v28 = vpop.permute.xlu2 %5196  ;;  %v4677_v52 = vpop.permute.xlu1 %4676  ;;  %v6073_v7 = vld [vmem:[%s6802_s8 + $0x341] sm:$0xff] }
 0x374   : > { %6600 = vst.msk [vmem:[%s8232_s26 + $0xe8] sm:$0xff] %vm4541_vm2, %v5197_v28  ;;  %v5193_v41 = vpop.permute.xlu0 %5192  ;;  %v4245_v3 = vpop.f32.mrf.mxu0  ;;  %6315 = vmatmul.msk.f32.gmra.mxu1 %vm451_vm1, %v5996_v44  ;;  %v6392_v28 = vld [vmem:[%s6802_s8 + $0x351] sm:$0xff] }
 0x375   : > { %6446 = vmatmul.msk.f32.gmra.mxu0 %vm451_vm1, %v6071_v50  ;;  %v4428_v22 = vadd.f32 %v4372_v58, %v9480_v15  ;;  %6469 = vst.msk [vmem:[%s8232_s26 + $0x38] sm:$0xff] %vm4541_vm2, %v4677_v52 }
 0x376   : > { %6598 = vst.msk [vmem:[%s8232_s26 + $0xc8] sm:$0xff] %vm4541_vm2, %v5193_v41  ;;  %v2844_v59 = vpop.f32.mrf.mxu2  ;;  %v3197_v37 = vpop.f32.mrf.mxu3 }
 0x377   : > { %v4496_v55 = vadd.f32 %v8629_v61, %v4428_v22  ;;  %v3198_v26 = vadd.f32 %v3197_v37, %v2844_v59  ;;  %v9483_v59 = vld [vmem:[#allocation26_spill] sm:$0xff] }
 0x379   : > { %4561 = vst.msk [vmem:[%s8232_s26 + $0x230] sm:$0xff] %vm4541_vm2, %v4496_v55  ;;  %v3822_v8 = vadd.f32 %v3694_v24, %v3198_v26  ;;  %5220 = vrot.lane.b32.xlu2 %v4495_v43, %s6722_s15  ;;  %4963 = vrot.lane.b32.xlu1 %v4495_v43, %s6723_s27  ;;  %v6261_v24 = vld [vmem:[%s6802_s8 + $0x350] sm:$0xff] }
 0x37a   : > { %5222 = vrot.lane.b32.xlu0 %v4496_v55, %s6722_s15  ;;  %v3697_v19 = vpop.f32.mrf.mxu1 }
 0x37b   : > { %v4373_v40 = vadd.f32 %v4245_v3, %v3822_v8  ;;  %6128 = vmatmul.msk.f32.gmra.mxu2 %vm451_vm1, %v6071_v50  ;;  %6185 = vmatmul.msk.f32.gmra.mxu3 %vm451_vm1, %v5996_v44  ;;  %v4942_v0 = vpop.permute.xlu2 %4941  ;;  %v4934_v63 = vpop.permute.xlu1 %4933 }
 0x37c   : > { %6537 = vst.msk [vmem:[%s8232_s26 + $0xf0] sm:$0xff] %vm4541_vm2, %v4942_v0  ;;  %v4938_v49 = vpop.permute.xlu0 %4937  ;;  %v4248_v29 = vpop.f32.mrf.mxu0  ;;  %6316 = vmatmul.msk.f32.gmra.mxu1 %vm451_vm1, %v5997_v17 }
 0x37d   : > { %6447 = vmatmul.msk.f32.gmra.mxu0 %vm451_vm1, %v6072_v10  ;;  %v4429_v33 = vadd.f32 %v4373_v40, %v9481_v14  ;;  %6533 = vst.msk [vmem:[%s8232_s26 + $0xb0] sm:$0xff] %vm4541_vm2, %v4934_v63  ;;  %v5999_v40 = vld [vmem:[%s6802_s8 + $0x360] sm:$0xff]  ;;  %v6000_v63 = vld [vmem:[%s6802_s8 + $0x370] sm:$0xff] }
 0x37e   : > { %6535 = vst.msk [vmem:[%s8232_s26 + $0xd0] sm:$0xff] %vm4541_vm2, %v4938_v49  ;;  %v2847_v21 = vpop.f32.mrf.mxu2  ;;  %v3200_v62 = vpop.f32.mrf.mxu3 }
 0x37f   : > { %v4497_v45 = vadd.f32 %v8629_v61, %v4429_v33  ;;  %v3201_v36 = vadd.f32 %v3200_v62, %v2847_v21  ;;  %v6075_v33 = vld [vmem:[%s6802_s8 + $0x371] sm:$0xff] }
 0x381   : > { %4562 = vst.msk [vmem:[%s8232_s26 + $0x240] sm:$0xff] %vm4541_vm2, %v4497_v45  ;;  %v3823_v6 = vadd.f32 %v3697_v19, %v3201_v36  ;;  %4965 = vrot.lane.b32.xlu2 %v4496_v55, %s6723_s27  ;;  %4708 = vrot.lane.b32.xlu1 %v4496_v55, %s6724_s28  ;;  %v6074_v19 = vld [vmem:[%s6802_s8 + $0x361] sm:$0xff] }
 0x382   : > { %4967 = vrot.lane.b32.xlu0 %v4497_v45, %s6723_s27  ;;  %v3700_v38 = vpop.f32.mrf.mxu1 }
 0x383   : > { %v4374_v2 = vadd.f32 %v4248_v29, %v3823_v6  ;;  %6129 = vmatmul.msk.f32.gmra.mxu2 %vm451_vm1, %v6072_v10  ;;  %6186 = vmatmul.msk.f32.gmra.mxu3 %vm451_vm1, %v5997_v17  ;;  %v4687_v25 = vpop.permute.xlu2 %4686  ;;  %v5195_v9 = vpop.permute.xlu1 %5194 }
 0x384   : > { %6474 = vst.msk [vmem:[%s8232_s26 + $0x108] sm:$0xff] %vm4541_vm2, %v4687_v25  ;;  %v4683_v48 = vpop.permute.xlu0 %4682  ;;  %v4251_v20 = vpop.f32.mrf.mxu0  ;;  %6317 = vmatmul.msk.f32.gmra.mxu1 %vm451_vm1, %v5998_v32 }
 0x385   : > { %6448 = vmatmul.msk.f32.gmra.mxu0 %vm451_vm1, %v6073_v7  ;;  %v4430_v27 = vadd.f32 %v4374_v2, %v9482_v34  ;;  %6599 = vst.msk [vmem:[%s8232_s26 + $0xd8] sm:$0xff] %vm4541_vm2, %v5195_v9  ;;  %v6001_v9 = vld [vmem:[%s6802_s8 + $0x380] sm:$0xff] }
 0x386   : > { %6472 = vst.msk [vmem:[%s8232_s26 + $0x68] sm:$0xff] %vm4541_vm2, %v4683_v48  ;;  %v2850_v43 = vpop.f32.mrf.mxu2  ;;  %v3203_v30 = vpop.f32.mrf.mxu3 }
 0x387   : > { %v4498_v16 = vadd.f32 %v8629_v61, %v4430_v27  ;;  %v3204_v44 = vadd.f32 %v3203_v30, %v2850_v43  ;;  %v6076_v27 = vld [vmem:[%s6802_s8 + $0x381] sm:$0xff] }
 0x389   : > { %4563 = vst.msk [vmem:[%s8232_s26 + $0x250] sm:$0xff] %vm4541_vm2, %v4498_v16  ;;  %v3824_v58 = vadd.f32 %v3700_v38, %v3204_v44  ;;  %4710 = vrot.lane.b32.xlu2 %v4497_v45, %s6724_s28  ;;  %5224 = vrot.lane.b32.xlu1 %v4497_v45, %s6722_s15  ;;  %v9484_v45 = vld [vmem:[#allocation27_spill] sm:$0xff] }
 0x38a   : > { %4712 = vrot.lane.b32.xlu0 %v4498_v16, %s6724_s28  ;;  %v3703_v52 = vpop.f32.mrf.mxu1 }
 0x38b   : > { %v4375_v50 = vadd.f32 %v4251_v20, %v3824_v58  ;;  %6130 = vmatmul.msk.f32.gmra.mxu2 %vm451_vm1, %v6073_v7  ;;  %6187 = vmatmul.msk.f32.gmra.mxu3 %vm451_vm1, %v5998_v32  ;;  %v5203_v41 = vpop.permute.xlu2 %5202  ;;  %v4940_v3 = vpop.permute.xlu1 %4939 }
 0x38c   : > { %6603 = vst.msk [vmem:[%s8232_s26 + $0x198] sm:$0xff] %vm4541_vm2, %v5203_v41  ;;  %v5199_v15 = vpop.permute.xlu0 %5198  ;;  %v4254_v22 = vpop.f32.mrf.mxu0  ;;  %6318 = vmatmul.msk.f32.gmra.mxu1 %vm451_vm1, %v6261_v24  ;;  %v6002_v41 = vld [vmem:[%s6802_s8 + $0x390] sm:$0xff] }
 0x38d   : > { %6449 = vmatmul.msk.f32.gmra.mxu0 %vm451_vm1, %v6392_v28  ;;  %v4431_v37 = vadd.f32 %v4375_v50, %v9483_v59  ;;  %6536 = vst.msk [vmem:[%s8232_s26 + $0xe0] sm:$0xff] %vm4541_vm2, %v4940_v3 }
 0x38e   : > { %6601 = vst.msk [vmem:[%s8232_s26 + $0xf8] sm:$0xff] %vm4541_vm2, %v5199_v15  ;;  %v2853_v55 = vpop.f32.mrf.mxu2  ;;  %v3206_v26 = vpop.f32.mrf.mxu3 }
 0x38f   : > { %v4499_v8 = vadd.f32 %v8629_v61, %v4431_v37  ;;  %v3207_v17 = vadd.f32 %v3206_v26, %v2853_v55  ;;  %v6077_v37 = vld [vmem:[%s6802_s8 + $0x391] sm:$0xff] }
 0x391   : > { %4564 = vst.msk [vmem:[%s8232_s26 + $0x260] sm:$0xff] %vm4541_vm2, %v4499_v8  ;;  %v3825_v0 = vadd.f32 %v3703_v52, %v3207_v17  ;;  %5226 = vrot.lane.b32.xlu2 %v4498_v16, %s6722_s15  ;;  %4969 = vrot.lane.b32.xlu1 %v4498_v16, %s6723_s27  ;;  %v9485_v16 = vld [vmem:[#allocation28_spill] sm:$0xff] }
 0x392   : > { %5228 = vrot.lane.b32.xlu0 %v4499_v8, %s6722_s15  ;;  %v3706_v10 = vpop.f32.mrf.mxu1 }
 0x393   : > { %v4376_v49 = vadd.f32 %v4254_v22, %v3825_v0  ;;  %6131 = vmatmul.msk.f32.gmra.mxu2 %vm451_vm1, %v6074_v19  ;;  %6188 = vmatmul.msk.f32.gmra.mxu3 %vm451_vm1, %v5999_v40  ;;  %v4948_v29 = vpop.permute.xlu2 %4947  ;;  %v4685_v14 = vpop.permute.xlu1 %4684 }
 0x394   : > { %6540 = vst.msk [vmem:[%s8232_s26 + $0x1a0] sm:$0xff] %vm4541_vm2, %v4948_v29  ;;  %v4944_v21 = vpop.permute.xlu0 %4943  ;;  %v4257_v62 = vpop.f32.mrf.mxu0  ;;  %6319 = vmatmul.msk.f32.gmra.mxu1 %vm451_vm1, %v6000_v63 }
 0x395   : > { %6450 = vmatmul.msk.f32.gmra.mxu0 %vm451_vm1, %v6075_v33  ;;  %v4432_v36 = vadd.f32 %v4376_v49, %v9484_v45  ;;  %6473 = vst.msk [vmem:[%s8232_s26 + $0x78] sm:$0xff] %vm4541_vm2, %v4685_v14  ;;  %v6003_v49 = vld [vmem:[%s6802_s8 + $0x3a0] sm:$0xff] }
 0x396   : > { %6538 = vst.msk [vmem:[%s8232_s26 + $0x180] sm:$0xff] %vm4541_vm2, %v4944_v21  ;;  %v2856_v6 = vpop.f32.mrf.mxu2  ;;  %v3209_v32 = vpop.f32.mrf.mxu3 }
 0x397   : > { %v4500_v38 = vadd.f32 %v8629_v61, %v4432_v36  ;;  %v3210_v2 = vadd.f32 %v3209_v32, %v2856_v6  ;;  %v9487_v6 = vld [vmem:[#allocation30_spill] sm:$0xff] }
 0x399   : > { %4565 = vst.msk [vmem:[%s8232_s26 + $0x270] sm:$0xff] %vm4541_vm2, %v4500_v38  ;;  %v3826_v25 = vadd.f32 %v3706_v10, %v3210_v2  ;;  %4971 = vrot.lane.b32.xlu2 %v4499_v8, %s6723_s27  ;;  %4714 = vrot.lane.b32.xlu1 %v4499_v8, %s6724_s28  ;;  %v9486_v8 = vld [vmem:[#allocation29_spill] sm:$0xff] }
 0x39a   : > { %4973 = vrot.lane.b32.xlu0 %v4500_v38, %s6723_s27  ;;  %v3709_v7 = vpop.f32.mrf.mxu1 }
 0x39b   : > { %v4377_v48 = vadd.f32 %v4257_v62, %v3826_v25  ;;  %6132 = vmatmul.msk.f32.gmra.mxu2 %vm451_vm1, %v6075_v33  ;;  %6189 = vmatmul.msk.f32.gmra.mxu3 %vm451_vm1, %v6000_v63  ;;  %v4693_v20 = vpop.permute.xlu2 %4692  ;;  %v5201_v34 = vpop.permute.xlu1 %5200  ;;  %v6078_v62 = vld [vmem:[%s6802_s8 + $0x3a1] sm:$0xff] }
 0x39c   : > { %6477 = vst.msk [vmem:[%s8232_s26 + $0x138] sm:$0xff] %vm4541_vm2, %v4693_v20  ;;  %v4689_v43 = vpop.permute.xlu0 %4688  ;;  %v4260_v30 = vpop.f32.mrf.mxu0  ;;  %6320 = vmatmul.msk.f32.gmra.mxu1 %vm451_vm1, %v6001_v9 }
 0x39d   : > { %6451 = vmatmul.msk.f32.gmra.mxu0 %vm451_vm1, %v6076_v27  ;;  %v4433_v44 = vadd.f32 %v4377_v48, %v9485_v16  ;;  %6602 = vst.msk [vmem:[%s8232_s26 + $0x188] sm:$0xff] %vm4541_vm2, %v5201_v34  ;;  %v6004_v48 = vld [vmem:[%s6802_s8 + $0x3b0] sm:$0xff] }
 0x39e   : > { %6475 = vst.msk [vmem:[%s8232_s26 + $0x118] sm:$0xff] %vm4541_vm2, %v4689_v43  ;;  %v2859_v24 = vpop.f32.mrf.mxu2  ;;  %v3212_v58 = vpop.f32.mrf.mxu3 }
 0x39f   : > { %v4501_v28 = vadd.f32 %v8629_v61, %v4433_v44  ;;  %v3213_v52 = vadd.f32 %v3212_v58, %v2859_v24  ;;  %v9488_v24 = vld [vmem:[#allocation31_spill] sm:$0xff] }
 0x3a1   : > { %4566 = vst.msk [vmem:[%s8232_s26 + $0x300] sm:$0xff] %vm4541_vm2, %v4501_v28  ;;  %v3827_v50 = vadd.f32 %v3709_v7, %v3213_v52  ;;  %4716 = vrot.lane.b32.xlu2 %v4500_v38, %s6724_s28  ;;  %5230 = vrot.lane.b32.xlu1 %v4500_v38, %s6722_s15 }
 0x3a2   : > { %4718 = vrot.lane.b32.xlu0 %v4501_v28, %s6724_s28  ;;  %v3712_v3 = vpop.f32.mrf.mxu1 }
 0x3a3   : > { %v4378_v15 = vadd.f32 %v4260_v30, %v3827_v50  ;;  %6133 = vmatmul.msk.f32.gmra.mxu2 %vm451_vm1, %v6076_v27  ;;  %6190 = vmatmul.msk.f32.gmra.mxu3 %vm451_vm1, %v6001_v9  ;;  %v5209_v22 = vpop.permute.xlu2 %5208  ;;  %v4946_v59 = vpop.permute.xlu1 %4945  ;;  %v6079_v30 = vld [vmem:[%s6802_s8 + $0x3b1] sm:$0xff] }
 0x3a4   : > { %6606 = vst.msk [vmem:[%s8232_s26 + $0x1c8] sm:$0xff] %vm4541_vm2, %v5209_v22  ;;  %v5205_v55 = vpop.permute.xlu0 %5204  ;;  %v4263_v26 = vpop.f32.mrf.mxu0  ;;  %6321 = vmatmul.msk.f32.gmra.mxu1 %vm451_vm1, %v6002_v41 }
 0x3a5   : > { %6452 = vmatmul.msk.f32.gmra.mxu0 %vm451_vm1, %v6077_v37  ;;  %v4434_v17 = vadd.f32 %v4378_v15, %v9486_v8  ;;  %6539 = vst.msk [vmem:[%s8232_s26 + $0x190] sm:$0xff] %vm4541_vm2, %v4946_v59  ;;  %v6005_v15 = vld [vmem:[%s6802_s8 + $0x3c0] sm:$0xff] }
 0x3a6   : > { %6604 = vst.msk [vmem:[%s8232_s26 + $0x1a8] sm:$0xff] %vm4541_vm2, %v5205_v55  ;;  %v2862_v19 = vpop.f32.mrf.mxu2  ;;  %v3215_v40 = vpop.f32.mrf.mxu3 }
 0x3a7   : > { %v4502_v0 = vadd.f32 %v8629_v61, %v4434_v17  ;;  %v3216_v63 = vadd.f32 %v3215_v40, %v2862_v19  ;;  %v9489_v19 = vld [vmem:[#allocation32_spill] sm:$0xff] }
 0x3a9   : > { %4567 = vst.msk [vmem:[%s8232_s26 + $0x310] sm:$0xff] %vm4541_vm2, %v4502_v0  ;;  %v3828_v10 = vadd.f32 %v3712_v3, %v3216_v63  ;;  %5232 = vrot.lane.b32.xlu2 %v4501_v28, %s6722_s15  ;;  %4975 = vrot.lane.b32.xlu1 %v4501_v28, %s6723_s27 }
 0x3aa   : > { %5234 = vrot.lane.b32.xlu0 %v4502_v0, %s6722_s15  ;;  %v3715_v29 = vpop.f32.mrf.mxu1 }
 0x3ab   : > { %v4379_v14 = vadd.f32 %v4263_v26, %v3828_v10  ;;  %6134 = vmatmul.msk.f32.gmra.mxu2 %vm451_vm1, %v6077_v37  ;;  %6191 = vmatmul.msk.f32.gmra.mxu3 %vm451_vm1, %v6002_v41  ;;  %v4954_v33 = vpop.permute.xlu2 %4953  ;;  %v4691_v21 = vpop.permute.xlu1 %4690  ;;  %v6080_v26 = vld [vmem:[%s6802_s8 + $0x3c1] sm:$0xff] }
 0x3ac   : > { %6543 = vst.msk [vmem:[%s8232_s26 + $0x1d0] sm:$0xff] %vm4541_vm2, %v4954_v33  ;;  %v4950_v45 = vpop.permute.xlu0 %4949  ;;  %v4266_v36 = vpop.f32.mrf.mxu0  ;;  %6322 = vmatmul.msk.f32.gmra.mxu1 %vm451_vm1, %v6003_v49 }
 0x3ad   : > { %6453 = vmatmul.msk.f32.gmra.mxu0 %vm451_vm1, %v6078_v62  ;;  %v4435_v32 = vadd.f32 %v4379_v14, %v9487_v6  ;;  %6476 = vst.msk [vmem:[%s8232_s26 + $0x128] sm:$0xff] %vm4541_vm2, %v4691_v21  ;;  %v6006_v14 = vld [vmem:[%s6802_s8 + $0x3d0] sm:$0xff] }
 0x3ae   : > { %6541 = vst.msk [vmem:[%s8232_s26 + $0x1b0] sm:$0xff] %vm4541_vm2, %v4950_v45  ;;  %v2865_v38 = vpop.f32.mrf.mxu2  ;;  %v3218_v2 = vpop.f32.mrf.mxu3 }
 0x3af   : > { %v4503_v25 = vadd.f32 %v8629_v61, %v4435_v32  ;;  %v3219_v9 = vadd.f32 %v3218_v2, %v2865_v38  ;;  %v9490_v38 = vld [vmem:[#allocation33_spill] sm:$0xff] }
 0x3b1   : > { %4568 = vst.msk [vmem:[%s8232_s26 + $0x320] sm:$0xff] %vm4541_vm2, %v4503_v25  ;;  %v3829_v7 = vadd.f32 %v3715_v29, %v3219_v9  ;;  %4977 = vrot.lane.b32.xlu2 %v4502_v0, %s6723_s27  ;;  %4720 = vrot.lane.b32.xlu1 %v4502_v0, %s6724_s28 }
 0x3b2   : > { %4979 = vrot.lane.b32.xlu0 %v4503_v25, %s6723_s27  ;;  %v3718_v20 = vpop.f32.mrf.mxu1 }
 0x3b3   : > { %v4380_v34 = vadd.f32 %v4266_v36, %v3829_v7  ;;  %6135 = vmatmul.msk.f32.gmra.mxu2 %vm451_vm1, %v6078_v62  ;;  %6192 = vmatmul.msk.f32.gmra.mxu3 %vm451_vm1, %v6003_v49  ;;  %v4699_v27 = vpop.permute.xlu2 %4698  ;;  %v5207_v43 = vpop.permute.xlu1 %5206  ;;  %v6081_v36 = vld [vmem:[%s6802_s8 + $0x3d1] sm:$0xff] }
 0x3b4   : > { %6480 = vst.msk [vmem:[%s8232_s26 + $0x168] sm:$0xff] %vm4541_vm2, %v4699_v27  ;;  %v4695_v16 = vpop.permute.xlu0 %4694  ;;  %v4269_v44 = vpop.f32.mrf.mxu0  ;;  %6323 = vmatmul.msk.f32.gmra.mxu1 %vm451_vm1, %v6004_v48  ;;  %v6400_v27 = vld [vmem:[%s6802_s8 + $0x3e1] sm:$0xff] }
 0x3b5   : > { %6454 = vmatmul.msk.f32.gmra.mxu0 %vm451_vm1, %v6079_v30  ;;  %v4436_v58 = vadd.f32 %v4380_v34, %v9488_v24  ;;  %6605 = vst.msk [vmem:[%s8232_s26 + $0x1b8] sm:$0xff] %vm4541_vm2, %v5207_v43 }
 0x3b6   : > { %6478 = vst.msk [vmem:[%s8232_s26 + $0x148] sm:$0xff] %vm4541_vm2, %v4695_v16  ;;  %v2868_v28 = vpop.f32.mrf.mxu2  ;;  %v3221_v52 = vpop.f32.mrf.mxu3 }
 0x3b7   : > { %v4504_v50 = vadd.f32 %v8629_v61, %v4436_v58  ;;  %v3222_v41 = vadd.f32 %v3221_v52, %v2868_v28  ;;  %v9491_v28 = vld [vmem:[#allocation34_spill] sm:$0xff] }
 0x3b9   : > { %4569 = vst.msk [vmem:[%s8232_s26 + $0x330] sm:$0xff] %vm4541_vm2, %v4504_v50  ;;  %v3830_v3 = vadd.f32 %v3718_v20, %v3222_v41  ;;  %4722 = vrot.lane.b32.xlu2 %v4503_v25, %s6724_s28  ;;  %5236 = vrot.lane.b32.xlu1 %v4503_v25, %s6722_s15  ;;  %v6269_v20 = vld [vmem:[%s6802_s8 + $0x3e0] sm:$0xff] }
 0x3ba   : > { %4724 = vrot.lane.b32.xlu0 %v4504_v50, %s6724_s28  ;;  %v3721_v22 = vpop.f32.mrf.mxu1 }
 0x3bb   : > { %v4381_v59 = vadd.f32 %v4269_v44, %v3830_v3  ;;  %6136 = vmatmul.msk.f32.gmra.mxu2 %vm451_vm1, %v6079_v30  ;;  %6193 = vmatmul.msk.f32.gmra.mxu3 %vm451_vm1, %v6004_v48  ;;  %v5215_v37 = vpop.permute.xlu2 %5214  ;;  %v4952_v55 = vpop.permute.xlu1 %4951 }
 0x3bc   : > { %6609 = vst.msk [vmem:[%s8232_s26 + $0x1f8] sm:$0xff] %vm4541_vm2, %v5215_v37  ;;  %v5211_v8 = vpop.permute.xlu0 %5210  ;;  %v4272_v17 = vpop.f32.mrf.mxu0  ;;  %6324 = vmatmul.msk.f32.gmra.mxu1 %vm451_vm1, %v6005_v15 }
 0x3bd   : > { %6455 = vmatmul.msk.f32.gmra.mxu0 %vm451_vm1, %v6080_v26  ;;  %v4437_v40 = vadd.f32 %v4381_v59, %v9489_v19  ;;  %6542 = vst.msk [vmem:[%s8232_s26 + $0x1c0] sm:$0xff] %vm4541_vm2, %v4952_v55  ;;  %v6007_v59 = vld [vmem:[%s6802_s8 + $0x3f0] sm:$0xff]  ;;  %v6008_v55 = vld [vmem:[%s6802_s8 + $0x400] sm:$0xff] }
 0x3be   : > { %6607 = vst.msk [vmem:[%s8232_s26 + $0x1d8] sm:$0xff] %vm4541_vm2, %v5211_v8  ;;  %v2871_v0 = vpop.f32.mrf.mxu2  ;;  %v3224_v63 = vpop.f32.mrf.mxu3 }
 0x3bf   : > { %v4505_v10 = vadd.f32 %v8629_v61, %v4437_v40  ;;  %v3225_v49 = vadd.f32 %v3224_v63, %v2871_v0  ;;  %v6083_v40 = vld [vmem:[%s6802_s8 + $0x401] sm:$0xff] }
 0x3c1   : > { %4570 = vst.msk [vmem:[%s8232_s26 + $0x340] sm:$0xff] %vm4541_vm2, %v4505_v10  ;;  %v3831_v29 = vadd.f32 %v3721_v22, %v3225_v49  ;;  %5238 = vrot.lane.b32.xlu2 %v4504_v50, %s6722_s15  ;;  %4981 = vrot.lane.b32.xlu1 %v4504_v50, %s6723_s27  ;;  %v6082_v22 = vld [vmem:[%s6802_s8 + $0x3f1] sm:$0xff] }
 0x3c2   : > { %5240 = vrot.lane.b32.xlu0 %v4505_v10, %s6722_s15  ;;  %v3724_v33 = vpop.f32.mrf.mxu1 }
 0x3c3   : > { %v4382_v21 = vadd.f32 %v4272_v17, %v3831_v29  ;;  %6137 = vmatmul.msk.f32.gmra.mxu2 %vm451_vm1, %v6080_v26  ;;  %6194 = vmatmul.msk.f32.gmra.mxu3 %vm451_vm1, %v6005_v15  ;;  %v4960_v62 = vpop.permute.xlu2 %4959  ;;  %v4697_v45 = vpop.permute.xlu1 %4696 }
 0x3c4   : > { %6546 = vst.msk [vmem:[%s8232_s26 + $0x280] sm:$0xff] %vm4541_vm2, %v4960_v62  ;;  %v4956_v6 = vpop.permute.xlu0 %4955  ;;  %v4275_v32 = vpop.f32.mrf.mxu0  ;;  %6325 = vmatmul.msk.f32.gmra.mxu1 %vm451_vm1, %v6006_v14 }
 0x3c5   : > { %6456 = vmatmul.msk.f32.gmra.mxu0 %vm451_vm1, %v6081_v36  ;;  %v4438_v2 = vadd.f32 %v4382_v21, %v9490_v38  ;;  %6479 = vst.msk [vmem:[%s8232_s26 + $0x158] sm:$0xff] %vm4541_vm2, %v4697_v45  ;;  %v6009_v45 = vld [vmem:[%s6802_s8 + $0x410] sm:$0xff] }
 0x3c6   : > { %6544 = vst.msk [vmem:[%s8232_s26 + $0x1e0] sm:$0xff] %vm4541_vm2, %v4956_v6  ;;  %v2874_v25 = vpop.f32.mrf.mxu2  ;;  %v3227_v9 = vpop.f32.mrf.mxu3 }
 0x3c7   : > { %v4506_v7 = vadd.f32 %v8629_v61, %v4438_v2  ;;  %v3228_v48 = vadd.f32 %v3227_v9, %v2874_v25  ;;  %v6084_v2 = vld [vmem:[%s6802_s8 + $0x411] sm:$0xff] }
 0x3c9   : > { %4571 = vst.msk [vmem:[%s8232_s26 + $0x350] sm:$0xff] %vm4541_vm2, %v4506_v7  ;;  %v3832_v34 = vadd.f32 %v3724_v33, %v3228_v48  ;;  %4983 = vrot.lane.b32.xlu2 %v4505_v10, %s6723_s27  ;;  %4726 = vrot.lane.b32.xlu1 %v4505_v10, %s6724_s28  ;;  %v9492_v10 = vld [vmem:[#allocation35_spill] sm:$0xff] }
 0x3ca   : > { %4985 = vrot.lane.b32.xlu0 %v4506_v7, %s6723_s27  ;;  %v3727_v43 = vpop.f32.mrf.mxu1 }
 0x3cb   : > { %v4383_v30 = vadd.f32 %v4275_v32, %v3832_v34  ;;  %6138 = vmatmul.msk.f32.gmra.mxu2 %vm451_vm1, %v6081_v36  ;;  %6195 = vmatmul.msk.f32.gmra.mxu3 %vm451_vm1, %v6006_v14  ;;  %v4705_v16 = vpop.permute.xlu2 %4704  ;;  %v5213_v44 = vpop.permute.xlu1 %5212 }
 0x3cc   : > { %6483 = vst.msk [vmem:[%s8232_s26 + $0x218] sm:$0xff] %vm4541_vm2, %v4705_v16  ;;  %v4701_v24 = vpop.permute.xlu0 %4700  ;;  %v4278_v58 = vpop.f32.mrf.mxu0  ;;  %6326 = vmatmul.msk.f32.gmra.mxu1 %vm451_vm1, %v6269_v20  ;;  %v6010_v16 = vld [vmem:[%s6802_s8 + $0x420] sm:$0xff] }
 0x3cd   : > { %6457 = vmatmul.msk.f32.gmra.mxu0 %vm451_vm1, %v6400_v27  ;;  %v4439_v52 = vadd.f32 %v4383_v30, %v9491_v28  ;;  %6608 = vst.msk [vmem:[%s8232_s26 + $0x1e8] sm:$0xff] %vm4541_vm2, %v5213_v44 }
 0x3ce   : > { %6481 = vst.msk [vmem:[%s8232_s26 + $0x178] sm:$0xff] %vm4541_vm2, %v4701_v24  ;;  %v2877_v50 = vpop.f32.mrf.mxu2  ;;  %v3230_v41 = vpop.f32.mrf.mxu3 }
 0x3cf   : > { %v4507_v3 = vadd.f32 %v8629_v61, %v4439_v52  ;;  %v3231_v15 = vadd.f32 %v3230_v41, %v2877_v50  ;;  %v6085_v52 = vld [vmem:[%s6802_s8 + $0x421] sm:$0xff] }
 0x3d1   : > { %4572 = vst.msk [vmem:[%s8232_s26 + $0x360] sm:$0xff] %vm4541_vm2, %v4507_v3  ;;  %v3833_v37 = vadd.f32 %v3727_v43, %v3231_v15  ;;  %4728 = vrot.lane.b32.xlu2 %v4506_v7, %s6724_s28  ;;  %5242 = vrot.lane.b32.xlu1 %v4506_v7, %s6722_s15  ;;  %v9493_v7 = vld [vmem:[#allocation36_spill] sm:$0xff] }
 0x3d2   : > { %4730 = vrot.lane.b32.xlu0 %v4507_v3, %s6724_s28  ;;  %v3730_v26 = vpop.f32.mrf.mxu1 }
 0x3d3   : > { %v4384_v8 = vadd.f32 %v4278_v58, %v3833_v37  ;;  %6139 = vmatmul.msk.f32.gmra.mxu2 %vm451_vm1, %v6082_v22  ;;  %6196 = vmatmul.msk.f32.gmra.mxu3 %vm451_vm1, %v6007_v59  ;;  %v5221_v17 = vpop.permute.xlu2 %5220  ;;  %v4958_v19 = vpop.permute.xlu1 %4957 }
 0x3d4   : > { %6612 = vst.msk [vmem:[%s8232_s26 + $0x2a8] sm:$0xff] %vm4541_vm2, %v5221_v17  ;;  %v5217_v0 = vpop.permute.xlu0 %5216  ;;  %v4281_v63 = vpop.f32.mrf.mxu0  ;;  %6327 = vmatmul.msk.f32.gmra.mxu1 %vm451_vm1, %v6008_v55 }
 0x3d5   : > { %6458 = vmatmul.msk.f32.gmra.mxu0 %vm451_vm1, %v6083_v40  ;;  %v4440_v49 = vadd.f32 %v4384_v8, %v9492_v10  ;;  %6545 = vst.msk [vmem:[%s8232_s26 + $0x1f0] sm:$0xff] %vm4541_vm2, %v4958_v19  ;;  %v6011_v8 = vld [vmem:[%s6802_s8 + $0x430] sm:$0xff] }
 0x3d6   : > { %6610 = vst.msk [vmem:[%s8232_s26 + $0x288] sm:$0xff] %vm4541_vm2, %v5217_v0  ;;  %v2880_v29 = vpop.f32.mrf.mxu2  ;;  %v3233_v14 = vpop.f32.mrf.mxu3 }
 0x3d7   : > { %v4508_v33 = vadd.f32 %v8629_v61, %v4440_v49  ;;  %v3234_v21 = vadd.f32 %v3233_v14, %v2880_v29  ;;  %v9495_v29 = vld [vmem:[#allocation38_spill] sm:$0xff] }
 0x3d9   : > { %4573 = vst.msk [vmem:[%s8232_s26 + $0x370] sm:$0xff] %vm4541_vm2, %v4508_v33  ;;  %v3834_v62 = vadd.f32 %v3730_v26, %v3234_v21  ;;  %5244 = vrot.lane.b32.xlu2 %v4507_v3, %s6722_s15  ;;  %4987 = vrot.lane.b32.xlu1 %v4507_v3, %s6723_s27  ;;  %v9494_v3 = vld [vmem:[#allocation37_spill] sm:$0xff] }
 0x3da   : > { %5246 = vrot.lane.b32.xlu0 %v4508_v33, %s6722_s15  ;;  %v3733_v36 = vpop.f32.mrf.mxu1 }
 0x3db   : > { %v4385_v6 = vadd.f32 %v4281_v63, %v3834_v62  ;;  %6140 = vmatmul.msk.f32.gmra.mxu2 %vm451_vm1, %v6083_v40  ;;  %6197 = vmatmul.msk.f32.gmra.mxu3 %vm451_vm1, %v6008_v55  ;;  %v4966_v32 = vpop.permute.xlu2 %4965  ;;  %v4703_v38 = vpop.permute.xlu1 %4702  ;;  %v6086_v63 = vld [vmem:[%s6802_s8 + $0x431] sm:$0xff] }
 0x3dc   : > { %6549 = vst.msk [vmem:[%s8232_s26 + $0x2b0] sm:$0xff] %vm4541_vm2, %v4966_v32  ;;  %v4962_v25 = vpop.permute.xlu0 %4961  ;;  %v4284_v9 = vpop.f32.mrf.mxu0  ;;  %6328 = vmatmul.msk.f32.gmra.mxu1 %vm451_vm1, %v6009_v45 }
 0x3dd   : > { %6459 = vmatmul.msk.f32.gmra.mxu0 %vm451_vm1, %v6084_v2  ;;  %v4441_v48 = vadd.f32 %v4385_v6, %v9493_v7  ;;  %6482 = vst.msk [vmem:[%s8232_s26 + $0x208] sm:$0xff] %vm4541_vm2, %v4703_v38  ;;  %v6012_v6 = vld [vmem:[%s6802_s8 + $0x440] sm:$0xff] }
 0x3de   : > { %6547 = vst.msk [vmem:[%s8232_s26 + $0x290] sm:$0xff] %vm4541_vm2, %v4962_v25  ;;  %v2883_v20 = vpop.f32.mrf.mxu2  ;;  %v3236_v34 = vpop.f32.mrf.mxu3 }
 0x3df   : > { %v4509_v27 = vadd.f32 %v8629_v61, %v4441_v48  ;;  %v3237_v43 = vadd.f32 %v3236_v34, %v2883_v20  ;;  %v9496_v20 = vld [vmem:[#allocation39_spill] sm:$0xff] }
 0x3e1   : > { %4574 = vst.msk [vmem:[%s8232_s26 + $0x400] sm:$0xff] %vm4541_vm2, %v4509_v27  ;;  %v3835_v30 = vadd.f32 %v3733_v36, %v3237_v43  ;;  %4989 = vrot.lane.b32.xlu2 %v4508_v33, %s6723_s27  ;;  %4732 = vrot.lane.b32.xlu1 %v4508_v33, %s6724_s28 }
 0x3e2   : > { %4991 = vrot.lane.b32.xlu0 %v4509_v27, %s6723_s27  ;;  %v3736_v44 = vpop.f32.mrf.mxu1 }
 0x3e3   : > { %v4386_v24 = vadd.f32 %v4284_v9, %v3835_v30  ;;  %6141 = vmatmul.msk.f32.gmra.mxu2 %vm451_vm1, %v6084_v2  ;;  %6198 = vmatmul.msk.f32.gmra.mxu3 %vm451_vm1, %v6009_v45  ;;  %v4711_v58 = vpop.permute.xlu2 %4710  ;;  %v5219_v28 = vpop.permute.xlu1 %5218  ;;  %v6087_v9 = vld [vmem:[%s6802_s8 + $0x441] sm:$0xff] }
 0x3e4   : > { %6486 = vst.msk [vmem:[%s8232_s26 + $0x248] sm:$0xff] %vm4541_vm2, %v4711_v58  ;;  %v4707_v50 = vpop.permute.xlu0 %4706  ;;  %v4287_v41 = vpop.f32.mrf.mxu0  ;;  %6329 = vmatmul.msk.f32.gmra.mxu1 %vm451_vm1, %v6010_v16 }
 0x3e5   : > { %6460 = vmatmul.msk.f32.gmra.mxu0 %vm451_vm1, %v6085_v52  ;;  %v4442_v15 = vadd.f32 %v4386_v24, %v9494_v3  ;;  %6611 = vst.msk [vmem:[%s8232_s26 + $0x298] sm:$0xff] %vm4541_vm2, %v5219_v28  ;;  %v6013_v24 = vld [vmem:[%s6802_s8 + $0x450] sm:$0xff] }
 0x3e6   : > { %6484 = vst.msk [vmem:[%s8232_s26 + $0x228] sm:$0xff] %vm4541_vm2, %v4707_v50  ;;  %v2886_v22 = vpop.f32.mrf.mxu2  ;;  %v3239_v59 = vpop.f32.mrf.mxu3  ;;  %v6088_v50 = vld [vmem:[%s6802_s8 + $0x451] sm:$0xff] }
 0x3e7   : > { %v4510_v37 = vadd.f32 %v8629_v61, %v4442_v15  ;;  %v3240_v55 = vadd.f32 %v3239_v59, %v2886_v22  ;;  %v9497_v15 = vld [vmem:[#allocation40_spill] sm:$0xff] }
 0x3e9   : > { %4575 = vst.msk [vmem:[%s8232_s26 + $0x410] sm:$0xff] %vm4541_vm2, %v4510_v37  ;;  %v3836_v26 = vadd.f32 %v3736_v44, %v3240_v55  ;;  %4734 = vrot.lane.b32.xlu2 %v4509_v27, %s6724_s28  ;;  %5248 = vrot.lane.b32.xlu1 %v4509_v27, %s6722_s15  ;;  %v9035_v55 = vld [vmem:[%s9416_s3] ss:$0 sm:$0xff] }
 0x3ea   : > { %4736 = vrot.lane.b32.xlu0 %v4510_v37, %s6724_s28  ;;  %v3739_v17 = vpop.f32.mrf.mxu1 }
 0x3eb   : > { %v4387_v19 = vadd.f32 %v4287_v41, %v3836_v26  ;;  %6142 = vmatmul.msk.f32.gmra.mxu2 %vm451_vm1, %v6085_v52  ;;  %6199 = vmatmul.msk.f32.gmra.mxu3 %vm451_vm1, %v6010_v16  ;;  %v5227_v40 = vpop.permute.xlu2 %5226  ;;  %v4964_v0 = vpop.permute.xlu1 %4963 }
 0x3ec   : > { %6615 = vst.msk [vmem:[%s8232_s26 + $0x2d8] sm:$0xff] %vm4541_vm2, %v5227_v40  ;;  %v5223_v10 = vpop.permute.xlu0 %5222  ;;  %v4290_v49 = vpop.f32.mrf.mxu0  ;;  %6330 = vmatmul.msk.f32.gmra.mxu1 %vm451_vm1, %v6011_v8 }
 0x3ed   : > { %6461 = vmatmul.msk.f32.gmra.mxu0 %vm451_vm1, %v6086_v63  ;;  %v4443_v14 = vadd.f32 %v4387_v19, %v9495_v29  ;;  %6548 = vst.msk [vmem:[%s8232_s26 + $0x2a0] sm:$0xff] %vm4541_vm2, %v4964_v0  ;;  %v6014_v19 = vld [vmem:[%s6802_s8 + $0x460] sm:$0xff] }
 0x3ee   : > { %6613 = vst.msk [vmem:[%s8232_s26 + $0x2b8] sm:$0xff] %vm4541_vm2, %v5223_v10  ;;  %v2889_v33 = vpop.f32.mrf.mxu2  ;;  %v3242_v21 = vpop.f32.mrf.mxu3 }
 0x3ef   : > { %v4511_v62 = vadd.f32 %v8629_v61, %v4443_v14  ;;  %v3243_v45 = vadd.f32 %v3242_v21, %v2889_v33  ;;  %v9498_v33 = vld [vmem:[#allocation41_spill] sm:$0xff] }
 0x3f1   : > { %4576 = vst.msk [vmem:[%s8232_s26 + $0x420] sm:$0xff] %vm4541_vm2, %v4511_v62  ;;  %v3837_v36 = vadd.f32 %v3739_v17, %v3243_v45  ;;  %5250 = vrot.lane.b32.xlu2 %v4510_v37, %s6722_s15  ;;  %4993 = vrot.lane.b32.xlu1 %v4510_v37, %s6723_s27 }
 0x3f2   : > { %5252 = vrot.lane.b32.xlu0 %v4511_v62, %s6722_s15  ;;  %v3742_v32 = vpop.f32.mrf.mxu1 }
 0x3f3   : > { %v4388_v38 = vadd.f32 %v4290_v49, %v3837_v36  ;;  %6143 = vmatmul.msk.f32.gmra.mxu2 %vm451_vm1, %v6086_v63  ;;  %6200 = vmatmul.msk.f32.gmra.mxu3 %vm451_vm1, %v6011_v8  ;;  %v4972_v2 = vpop.permute.xlu2 %4971  ;;  %v4709_v25 = vpop.permute.xlu1 %4708  ;;  %v6089_v49 = vld [vmem:[%s6802_s8 + $0x461] sm:$0xff] }
 0x3f4   : > { %6552 = vst.msk [vmem:[%s8232_s26 + $0x2e0] sm:$0xff] %vm4541_vm2, %v4972_v2  ;;  %v4968_v7 = vpop.permute.xlu0 %4967  ;;  %v4293_v48 = vpop.f32.mrf.mxu0  ;;  %6331 = vmatmul.msk.f32.gmra.mxu1 %vm451_vm1, %v6012_v6  ;;  %v6408_v2 = vld [vmem:[%s6802_s8 + $0x471] sm:$0xff] }
 0x3f5   : > { %6462 = vmatmul.msk.f32.gmra.mxu0 %vm451_vm1, %v6087_v9  ;;  %v4444_v34 = vadd.f32 %v4388_v38, %v9496_v20  ;;  %6485 = vst.msk [vmem:[%s8232_s26 + $0x238] sm:$0xff] %vm4541_vm2, %v4709_v25 }
 0x3f6   : > { %6550 = vst.msk [vmem:[%s8232_s26 + $0x2c0] sm:$0xff] %vm4541_vm2, %v4968_v7  ;;  %v2892_v27 = vpop.f32.mrf.mxu2  ;;  %v3245_v43 = vpop.f32.mrf.mxu3 }
 0x3f7   : > { %v4512_v30 = vadd.f32 %v8629_v61, %v4444_v34  ;;  %v3246_v16 = vadd.f32 %v3245_v43, %v2892_v27  ;;  %v9499_v27 = vld [vmem:[#allocation42_spill] sm:$0xff] }
 0x3f9   : > { %4577 = vst.msk [vmem:[%s8232_s26 + $0x430] sm:$0xff] %vm4541_vm2, %v4512_v30  ;;  %v3838_v44 = vadd.f32 %v3742_v32, %v3246_v16  ;;  %4995 = vrot.lane.b32.xlu2 %v4511_v62, %s6723_s27  ;;  %4738 = vrot.lane.b32.xlu1 %v4511_v62, %s6724_s28  ;;  %v6277_v32 = vld [vmem:[%s6802_s8 + $0x470] sm:$0xff] }
 0x3fa   : > { %4997 = vrot.lane.b32.xlu0 %v4512_v30, %s6723_s27  ;;  %v3745_v58 = vpop.f32.mrf.mxu1 }
 0x3fb   : > { %v4389_v28 = vadd.f32 %v4293_v48, %v3838_v44  ;;  %6144 = vmatmul.msk.f32.gmra.mxu2 %vm451_vm1, %v6087_v9  ;;  %6201 = vmatmul.msk.f32.gmra.mxu3 %vm451_vm1, %v6012_v6  ;;  %v4717_v61 = vpop.permute.xlu2 %4716  ;;  %v5225_v52 = vpop.permute.xlu1 %5224 }
 0x3fc   : > { %6489 = vst.msk [vmem:[%s8232_s26 + $0x278] sm:$0xff] %vm4541_vm2, %v4717_v61  ;;  %v4713_v41 = vpop.permute.xlu0 %4712  ;;  %v4296_v3 = vpop.f32.mrf.mxu0  ;;  %6332 = vmatmul.msk.f32.gmra.mxu1 %vm451_vm1, %v6013_v24 }
 0x3fd   : > { %6463 = vmatmul.msk.f32.gmra.mxu0 %vm451_vm1, %v6088_v50  ;;  %v4445_v22 = vadd.f32 %v4389_v28, %v9497_v15  ;;  %6614 = vst.msk [vmem:[%s8232_s26 + $0x2c8] sm:$0xff] %vm4541_vm2, %v5225_v52 }
 0x3fe   : > { %6487 = vst.msk [vmem:[%s8232_s26 + $0x258] sm:$0xff] %vm4541_vm2, %v4713_v41  ;;  %v2895_v59 = vpop.f32.mrf.mxu2  ;;  %v3248_v37 = vpop.f32.mrf.mxu3 }
 0x3ff   : > { %v4513_v26 = vadd.f32 %v9035_v55, %v4445_v22  ;;  %v3249_v8 = vadd.f32 %v3248_v37, %v2895_v59 }
 0x401   : > { %4578 = vst.msk [vmem:[%s8232_s26 + $0x440] sm:$0xff] %vm4541_vm2, %v4513_v26  ;;  %v3839_v17 = vadd.f32 %v3745_v58, %v3249_v8  ;;  %4740 = vrot.lane.b32.xlu2 %v4512_v30, %s6724_s28  ;;  %5254 = vrot.lane.b32.xlu1 %v4512_v30, %s6722_s15 }
 0x402   : > { %4742 = vrot.lane.b32.xlu0 %v4513_v26, %s6724_s28  ;;  %v3748_v40 = vpop.f32.mrf.mxu1 }
 0x403   : > { %v4390_v0 = vadd.f32 %v4296_v3, %v3839_v17  ;;  %6145 = vmatmul.msk.f32.gmra.mxu2 %vm451_vm1, %v6088_v50  ;;  %6202 = vmatmul.msk.f32.gmra.mxu3 %vm451_vm1, %v6013_v24  ;;  %v5233_v63 = vpop.permute.xlu2 %5232  ;;  %v4970_v10 = vpop.permute.xlu1 %4969 }
 0x404   : > { %6618 = vst.msk [vmem:[%s8232_s26 + $0x388] sm:$0xff] %vm4541_vm2, %v5233_v63  ;;  %v5229_v29 = vpop.permute.xlu0 %5228  ;;  %v4299_v14 = vpop.f32.mrf.mxu0  ;;  %6333 = vmatmul.msk.f32.gmra.mxu1 %vm451_vm1, %v6014_v19 }
 0x405   : > { %6464 = vmatmul.msk.f32.gmra.mxu0 %vm451_vm1, %v6089_v49  ;;  %v4446_v21 = vadd.f32 %v4390_v0, %v9498_v33  ;;  %6551 = vst.msk [vmem:[%s8232_s26 + $0x2d0] sm:$0xff] %vm4541_vm2, %v4970_v10 }
 0x406   : > { %6616 = vst.msk [vmem:[%s8232_s26 + $0x2e8] sm:$0xff] %vm4541_vm2, %v5229_v29  ;;  %v2898_v62 = vpop.f32.mrf.mxu2  ;;  %v3251_v45 = vpop.f32.mrf.mxu3 }
 0x407   : > { %v4514_v36 = vadd.f32 %v9035_v55, %v4446_v21  ;;  %v3252_v6 = vadd.f32 %v3251_v45, %v2898_v62 }
 0x409   : > { %4579 = vst.msk [vmem:[%s8232_s26 + $0x450] sm:$0xff] %vm4541_vm2, %v4514_v36  ;;  %v3840_v38 = vadd.f32 %v3748_v40, %v3252_v6  ;;  %5256 = vrot.lane.b32.xlu2 %v4513_v26, %s6722_s15  ;;  %4999 = vrot.lane.b32.xlu1 %v4513_v26, %s6723_s27 }
 0x40a   : > { %5258 = vrot.lane.b32.xlu0 %v4514_v36, %s6722_s15  ;;  %v3751_v25 = vpop.f32.mrf.mxu1 }
 0x40b   : > { %v4391_v9 = vadd.f32 %v4299_v14, %v3840_v38  ;;  %6146 = vmatmul.msk.f32.gmra.mxu2 %vm451_vm1, %v6089_v49  ;;  %6203 = vmatmul.msk.f32.gmra.mxu3 %vm451_vm1, %v6014_v19  ;;  %v4978_v7 = vpop.permute.xlu2 %4977  ;;  %v4715_v48 = vpop.permute.xlu1 %4714 }
 0x40c   : > { %6555 = vst.msk [vmem:[%s8232_s26 + $0x390] sm:$0xff] %vm4541_vm2, %v4978_v7  ;;  %v4974_v20 = vpop.permute.xlu0 %4973  ;;  %v4302_v34 = vpop.f32.mrf.mxu0  ;;  %6334 = vmatmul.msk.f32.gmra.mxu1 %vm451_vm1, %v6277_v32 }
 0x40d   : > { %6465 = vmatmul.msk.f32.gmra.mxu0 %vm451_vm1, %v6408_v2  ;;  %v4447_v43 = vadd.f32 %v4391_v9, %v9499_v27  ;;  %6488 = vst.msk [vmem:[%s8232_s26 + $0x268] sm:$0xff] %vm4541_vm2, %v4715_v48 }
 0x40e   : > { %6553 = vst.msk [vmem:[%s8232_s26 + $0x2f0] sm:$0xff] %vm4541_vm2, %v4974_v20  ;;  %v2901_v30 = vpop.f32.mrf.mxu2  ;;  %v3254_v16 = vpop.f32.mrf.mxu3 }
 0x40f   : > { %v4515_v44 = vadd.f32 %v9035_v55, %v4447_v43  ;;  %v3255_v24 = vadd.f32 %v3254_v16, %v2901_v30 }
 0x411   : > { %4580 = vst.msk [vmem:[%s8232_s26 + $0x460] sm:$0xff] %vm4541_vm2, %v4515_v44  ;;  %v3841_v58 = vadd.f32 %v3751_v25, %v3255_v24  ;;  %5001 = vrot.lane.b32.xlu2 %v4514_v36, %s6723_s27  ;;  %4744 = vrot.lane.b32.xlu1 %v4514_v36, %s6724_s28 }
 0x412   : > { %5003 = vrot.lane.b32.xlu0 %v4515_v44, %s6723_s27  ;;  %v3754_v28 = vpop.f32.mrf.mxu1 }
 0x413   : > { %v4392_v61 = vadd.f32 %v4302_v34, %v3841_v58  ;;  %v4723_v52 = vpop.permute.xlu2 %4722  ;;  %v5231_v50 = vpop.permute.xlu1 %5230 }
 0x414   : > { %6492 = vst.msk [vmem:[%s8232_s26 + $0x328] sm:$0xff] %vm4541_vm2, %v4723_v52  ;;  %v4719_v41 = vpop.permute.xlu0 %4718  ;;  %v4305_v3 = vpop.f32.mrf.mxu0 }
 0x415   : > { %v4448_v15 = vadd.f32 %v4392_v61, %v7966_v57  ;;  %6617 = vst.msk [vmem:[%s8232_s26 + $0x2f8] sm:$0xff] %vm4541_vm2, %v5231_v50 }
 0x416   : > { %6490 = vst.msk [vmem:[%s8232_s26 + $0x308] sm:$0xff] %vm4541_vm2, %v4719_v41  ;;  %v2904_v22 = vpop.f32.mrf.mxu2  ;;  %v3257_v59 = vpop.f32.mrf.mxu3 }
 0x417   : > { %v4516_v37 = vadd.f32 %v9035_v55, %v4448_v15  ;;  %v3258_v26 = vadd.f32 %v3257_v59, %v2904_v22 }
 0x419   : > { %4581 = vst.msk [vmem:[%s8232_s26 + $0x470] sm:$0xff] %vm4541_vm2, %v4516_v37  ;;  %v3842_v8 = vadd.f32 %v3754_v28, %v3258_v26  ;;  %4746 = vrot.lane.b32.xlu2 %v4515_v44, %s6724_s28  ;;  %5260 = vrot.lane.b32.xlu1 %v4515_v44, %s6722_s15 }
 0x41a   : > { %4748 = vrot.lane.b32.xlu0 %v4516_v37, %s6724_s28  ;;  %v3757_v57 = vpop.f32.mrf.mxu1 }
 0x41b   : > { %v4393_v17 = vadd.f32 %v4305_v3, %v3842_v8  ;;  %v5239_v19 = vpop.permute.xlu2 %5238  ;;  %v4976_v40 = vpop.permute.xlu1 %4975 }
 0x41c   : > { %6621 = vst.msk [vmem:[%s8232_s26 + $0x3b8] sm:$0xff] %vm4541_vm2, %v5239_v19  ;;  %v5235_v0 = vpop.permute.xlu0 %5234  ;;  %v4308_v63 = vpop.f32.mrf.mxu0 }
 0x41d   : > { %v4449_v10 = vadd.f32 %v4393_v17, %v7982_v18  ;;  %6554 = vst.msk [vmem:[%s8232_s26 + $0x380] sm:$0xff] %vm4541_vm2, %v4976_v40 }
 0x41e   : > { %6619 = vst.msk [vmem:[%s8232_s26 + $0x398] sm:$0xff] %vm4541_vm2, %v5235_v0  ;;  %v2907_v49 = vpop.f32.mrf.mxu2  ;;  %v3260_v29 = vpop.f32.mrf.mxu3 }
 0x41f   : > { %v4517_v14 = vadd.f32 %v9035_v55, %v4449_v10  ;;  %v3261_v33 = vadd.f32 %v3260_v29, %v2907_v49 }
 0x421   : > { %4582 = vst.msk [vmem:[%s8232_s26 + $0x500] sm:$0xff] %vm4541_vm2, %v4517_v14  ;;  %v3843_v21 = vadd.f32 %v3757_v57, %v3261_v33  ;;  %5262 = vrot.lane.b32.xlu2 %v4516_v37, %s6722_s15  ;;  %5005 = vrot.lane.b32.xlu1 %v4516_v37, %s6723_s27 }
 0x422   : > { %5264 = vrot.lane.b32.xlu0 %v4517_v14, %s6722_s15  ;;  %v3760_v18 = vpop.f32.mrf.mxu1 }
 0x423   : > { %v4394_v62 = vadd.f32 %v4308_v63, %v3843_v21  ;;  %v4984_v45 = vpop.permute.xlu2 %4983  ;;  %v4721_v36 = vpop.permute.xlu1 %4720 }
 0x424   : > { %6558 = vst.msk [vmem:[%s8232_s26 + $0x3c0] sm:$0xff] %vm4541_vm2, %v4984_v45  ;;  %v4980_v6 = vpop.permute.xlu0 %4979  ;;  %v4311_v32 = vpop.f32.mrf.mxu0 }
 0x425   : > { %v4450_v38 = vadd.f32 %v4394_v62, %v7998_v46  ;;  %6491 = vst.msk [vmem:[%s8232_s26 + $0x318] sm:$0xff] %vm4541_vm2, %v4721_v36 }
 0x426   : > { %6556 = vst.msk [vmem:[%s8232_s26 + $0x3a0] sm:$0xff] %vm4541_vm2, %v4980_v6  ;;  %v2910_v2 = vpop.f32.mrf.mxu2  ;;  %v3263_v25 = vpop.f32.mrf.mxu3 }
 0x427   : > { %v4518_v9 = vadd.f32 %v9035_v55, %v4450_v38  ;;  %v3264_v7 = vadd.f32 %v3263_v25, %v2910_v2 }
 0x429   : > { %4583 = vst.msk [vmem:[%s8232_s26 + $0x510] sm:$0xff] %vm4541_vm2, %v4518_v9  ;;  %v3844_v48 = vadd.f32 %v3760_v18, %v3264_v7  ;;  %5007 = vrot.lane.b32.xlu2 %v4517_v14, %s6723_s27  ;;  %4750 = vrot.lane.b32.xlu1 %v4517_v14, %s6724_s28 }
 0x42a   : > { %5009 = vrot.lane.b32.xlu0 %v4518_v9, %s6723_s27  ;;  %v3763_v46 = vpop.f32.mrf.mxu1 }
 0x42b   : > { %v4395_v20 = vadd.f32 %v4311_v32, %v3844_v48  ;;  %v4729_v34 = vpop.permute.xlu2 %4728  ;;  %v5237_v27 = vpop.permute.xlu1 %5236 }
 0x42c   : > { %6495 = vst.msk [vmem:[%s8232_s26 + $0x358] sm:$0xff] %vm4541_vm2, %v4729_v34  ;;  %v4725_v43 = vpop.permute.xlu0 %4724  ;;  %v4314_v30 = vpop.f32.mrf.mxu0 }
 0x42d   : > { %v4451_v16 = vadd.f32 %v4395_v20, %v8014_v4  ;;  %6620 = vst.msk [vmem:[%s8232_s26 + $0x3a8] sm:$0xff] %vm4541_vm2, %v5237_v27 }
 0x42e   : > { %6493 = vst.msk [vmem:[%s8232_s26 + $0x338] sm:$0xff] %vm4541_vm2, %v4725_v43  ;;  %v2913_v44 = vpop.f32.mrf.mxu2  ;;  %v3266_v24 = vpop.f32.mrf.mxu3 }
 0x42f   : > { %v4519_v58 = vadd.f32 %v9035_v55, %v4451_v16  ;;  %v3267_v28 = vadd.f32 %v3266_v24, %v2913_v44 }
 0x431   : > { %4584 = vst.msk [vmem:[%s8232_s26 + $0x520] sm:$0xff] %vm4541_vm2, %v4519_v58  ;;  %v3845_v61 = vadd.f32 %v3763_v46, %v3267_v28  ;;  %4752 = vrot.lane.b32.xlu2 %v4518_v9, %s6724_s28  ;;  %5266 = vrot.lane.b32.xlu1 %v4518_v9, %s6722_s15 }
 0x432   : > { %4754 = vrot.lane.b32.xlu0 %v4519_v58, %s6724_s28  ;;  %v3766_v4 = vpop.f32.mrf.mxu1 }
 0x433   : > { %v4396_v52 = vadd.f32 %v4314_v30, %v3845_v61  ;;  %v5245_v50 = vpop.permute.xlu2 %5244  ;;  %v4982_v41 = vpop.permute.xlu1 %4981 }
 0x434   : > { %6624 = vst.msk [vmem:[%s8232_s26 + $0x3e8] sm:$0xff] %vm4541_vm2, %v5245_v50  ;;  %v5241_v3 = vpop.permute.xlu0 %5240  ;;  %v4317_v15 = vpop.f32.mrf.mxu0 }
 0x435   : > { %v4452_v22 = vadd.f32 %v4396_v52, %v8030_v54  ;;  %6557 = vst.msk [vmem:[%s8232_s26 + $0x3b0] sm:$0xff] %vm4541_vm2, %v4982_v41 }
 0x436   : > { %6622 = vst.msk [vmem:[%s8232_s26 + $0x3c8] sm:$0xff] %vm4541_vm2, %v5241_v3  ;;  %v2916_v59 = vpop.f32.mrf.mxu2  ;;  %v3269_v37 = vpop.f32.mrf.mxu3 }
 0x437   : > { %v4520_v26 = vadd.f32 %v9035_v55, %v4452_v22  ;;  %v3270_v8 = vadd.f32 %v3269_v37, %v2916_v59 }
 0x439   : > { %4585 = vst.msk [vmem:[%s8232_s26 + $0x530] sm:$0xff] %vm4541_vm2, %v4520_v26  ;;  %v3846_v57 = vadd.f32 %v3766_v4, %v3270_v8  ;;  %5268 = vrot.lane.b32.xlu2 %v4519_v58, %s6722_s15  ;;  %5011 = vrot.lane.b32.xlu1 %v4519_v58, %s6723_s27 }
 0x43a   : > { %5270 = vrot.lane.b32.xlu0 %v4520_v26, %s6722_s15  ;;  %v3769_v54 = vpop.f32.mrf.mxu1 }
 0x43b   : > { %v4397_v17 = vadd.f32 %v4317_v15, %v3846_v57  ;;  %v4990_v19 = vpop.permute.xlu2 %4989  ;;  %v4727_v40 = vpop.permute.xlu1 %4726 }
 0x43c   : > { %6561 = vst.msk [vmem:[%s8232_s26 + $0x3f0] sm:$0xff] %vm4541_vm2, %v4990_v19  ;;  %v4986_v0 = vpop.permute.xlu0 %4985  ;;  %v4320_v63 = vpop.f32.mrf.mxu0 }
 0x43d   : > { %v4453_v10 = vadd.f32 %v4397_v17, %v8046_v47  ;;  %6494 = vst.msk [vmem:[%s8232_s26 + $0x348] sm:$0xff] %vm4541_vm2, %v4727_v40 }
 0x43e   : > { %6559 = vst.msk [vmem:[%s8232_s26 + $0x3d0] sm:$0xff] %vm4541_vm2, %v4986_v0  ;;  %v2919_v49 = vpop.f32.mrf.mxu2  ;;  %v3272_v29 = vpop.f32.mrf.mxu3 }
 0x43f   : > { %v4521_v14 = vadd.f32 %v9035_v55, %v4453_v10  ;;  %v3273_v33 = vadd.f32 %v3272_v29, %v2919_v49 }
 0x441   : > { %4586 = vst.msk [vmem:[%s8232_s26 + $0x540] sm:$0xff] %vm4541_vm2, %v4521_v14  ;;  %v3847_v21 = vadd.f32 %v3769_v54, %v3273_v33  ;;  %5013 = vrot.lane.b32.xlu2 %v4520_v26, %s6723_s27  ;;  %4756 = vrot.lane.b32.xlu1 %v4520_v26, %s6724_s28 }
 0x442   : > { %5015 = vrot.lane.b32.xlu0 %v4521_v14, %s6723_s27  ;;  %v3772_v47 = vpop.f32.mrf.mxu1 }
 0x443   : > { %v4398_v18 = vadd.f32 %v4320_v63, %v3847_v21  ;;  %v4735_v62 = vpop.permute.xlu2 %4734  ;;  %v5243_v45 = vpop.permute.xlu1 %5242 }
 0x444   : > { %6498 = vst.msk [vmem:[%s8232_s26 + $0x408] sm:$0xff] %vm4541_vm2, %v4735_v62  ;;  %v4731_v36 = vpop.permute.xlu0 %4730  ;;  %v4323_v6 = vpop.f32.mrf.mxu0 }
 0x445   : > { %v4454_v32 = vadd.f32 %v4398_v18, %v8062_v31  ;;  %6623 = vst.msk [vmem:[%s8232_s26 + $0x3d8] sm:$0xff] %vm4541_vm2, %v5243_v45 }
 0x446   : > { %6496 = vst.msk [vmem:[%s8232_s26 + $0x368] sm:$0xff] %vm4541_vm2, %v4731_v36  ;;  %v2922_v38 = vpop.f32.mrf.mxu2  ;;  %v3275_v2 = vpop.f32.mrf.mxu3 }
 0x447   : > { %v4522_v25 = vadd.f32 %v9035_v55, %v4454_v32  ;;  %v3276_v9 = vadd.f32 %v3275_v2, %v2922_v38 }
 0x449   : > { %4587 = vst.msk [vmem:[%s8232_s26 + $0x550] sm:$0xff] %vm4541_vm2, %v4522_v25  ;;  %v3848_v7 = vadd.f32 %v3772_v47, %v3276_v9  ;;  %4758 = vrot.lane.b32.xlu2 %v4521_v14, %s6724_s28  ;;  %5272 = vrot.lane.b32.xlu1 %v4521_v14, %s6722_s15 }
 0x44a   : > { %4760 = vrot.lane.b32.xlu0 %v4522_v25, %s6724_s28  ;;  %v3775_v31 = vpop.f32.mrf.mxu1 }
 0x44b   : > { %v4399_v48 = vadd.f32 %v4323_v6, %v3848_v7  ;;  %v5251_v46 = vpop.permute.xlu2 %5250  ;;  %v4988_v20 = vpop.permute.xlu1 %4987 }
 0x44c   : > { %6627 = vst.msk [vmem:[%s8232_s26 + $0x498] sm:$0xff] %vm4541_vm2, %v5251_v46  ;;  %v5247_v34 = vpop.permute.xlu0 %5246  ;;  %v4326_v27 = vpop.f32.mrf.mxu0 }
 0x44d   : > { %v4455_v43 = vadd.f32 %v4399_v48, %v8079_v51  ;;  %6560 = vst.msk [vmem:[%s8232_s26 + $0x3e0] sm:$0xff] %vm4541_vm2, %v4988_v20 }
 0x44e   : > { %6625 = vst.msk [vmem:[%s8232_s26 + $0x3f8] sm:$0xff] %vm4541_vm2, %v5247_v34  ;;  %v2925_v30 = vpop.f32.mrf.mxu2  ;;  %v3278_v16 = vpop.f32.mrf.mxu3 }
 0x44f   : > { %v4523_v44 = vadd.f32 %v9035_v55, %v4455_v43  ;;  %v3279_v24 = vadd.f32 %v3278_v16, %v2925_v30 }
 0x451   : > { %4588 = vst.msk [vmem:[%s8232_s26 + $0x560] sm:$0xff] %vm4541_vm2, %v4523_v44  ;;  %v3849_v58 = vadd.f32 %v3775_v31, %v3279_v24  ;;  %5274 = vrot.lane.b32.xlu2 %v4522_v25, %s6722_s15  ;;  %5017 = vrot.lane.b32.xlu1 %v4522_v25, %s6723_s27 }
 0x452   : > { %5276 = vrot.lane.b32.xlu0 %v4523_v44, %s6722_s15  ;;  %v3778_v51 = vpop.f32.mrf.mxu1 }
 0x453   : > { %v4400_v28 = vadd.f32 %v4326_v27, %v3849_v58  ;;  %v4996_v61 = vpop.permute.xlu2 %4995  ;;  %v4733_v4 = vpop.permute.xlu1 %4732 }
 0x454   : > { %6564 = vst.msk [vmem:[%s8232_s26 + $0x4a0] sm:$0xff] %vm4541_vm2, %v4996_v61  ;;  %v4992_v52 = vpop.permute.xlu0 %4991  ;;  %v4329_v50 = vpop.f32.mrf.mxu0 }
 0x455   : > { %v4456_v41 = vadd.f32 %v4400_v28, %v8095_v13  ;;  %6497 = vst.msk [vmem:[%s8232_s26 + $0x378] sm:$0xff] %vm4541_vm2, %v4733_v4 }
 0x456   : > { %6562 = vst.msk [vmem:[%s8232_s26 + $0x480] sm:$0xff] %vm4541_vm2, %v4992_v52  ;;  %v2928_v3 = vpop.f32.mrf.mxu2  ;;  %v3281_v15 = vpop.f32.mrf.mxu3 }
 0x457   : > { %v4524_v22 = vadd.f32 %v9035_v55, %v4456_v41  ;;  %v3282_v59 = vadd.f32 %v3281_v15, %v2928_v3 }
 0x459   : > { %4589 = vst.msk [vmem:[%s8232_s26 + $0x570] sm:$0xff] %vm4541_vm2, %v4524_v22  ;;  %v3850_v37 = vadd.f32 %v3778_v51, %v3282_v59  ;;  %5019 = vrot.lane.b32.xlu2 %v4523_v44, %s6723_s27  ;;  %4762 = vrot.lane.b32.xlu1 %v4523_v44, %s6724_s28 }
 0x45a   : > { %5021 = vrot.lane.b32.xlu0 %v4524_v22, %s6723_s27  ;;  %v3781_v13 = vpop.f32.mrf.mxu1 }
 0x45b   : > { %v4401_v26 = vadd.f32 %v4329_v50, %v3850_v37  ;;  %v4741_v8 = vpop.permute.xlu2 %4740  ;;  %v5249_v57 = vpop.permute.xlu1 %5248 }
 0x45c   : > { %6501 = vst.msk [vmem:[%s8232_s26 + $0x438] sm:$0xff] %vm4541_vm2, %v4741_v8  ;;  %v4737_v54 = vpop.permute.xlu0 %4736  ;;  %v4332_v17 = vpop.f32.mrf.mxu0 }
 0x45d   : > { %v4457_v19 = vadd.f32 %v4401_v26, %v8109_v5  ;;  %6626 = vst.msk [vmem:[%s8232_s26 + $0x488] sm:$0xff] %vm4541_vm2, %v5249_v57 }
 0x45e   : > { %6499 = vst.msk [vmem:[%s8232_s26 + $0x418] sm:$0xff] %vm4541_vm2, %v4737_v54  ;;  %v2931_v40 = vpop.f32.mrf.mxu2  ;;  %v3284_v0 = vpop.f32.mrf.mxu3 }
 0x45f   : > { %v4525_v63 = vadd.f32 %v9035_v55, %v4457_v19  ;;  %v3285_v10 = vadd.f32 %v3284_v0, %v2931_v40 }
 0x461   : > { %4590 = vst.msk [vmem:[%s8232_s26 + $0x600] sm:$0xff] %vm4541_vm2, %v4525_v63  ;;  %v3851_v49 = vadd.f32 %v3781_v13, %v3285_v10  ;;  %4764 = vrot.lane.b32.xlu2 %v4524_v22, %s6724_s28  ;;  %5278 = vrot.lane.b32.xlu1 %v4524_v22, %s6722_s15 }
 0x462   : > { %4766 = vrot.lane.b32.xlu0 %v4525_v63, %s6724_s28  ;;  %v3784_v5 = vpop.f32.mrf.mxu1 }
 0x463   : > { %v4402_v29 = vadd.f32 %v4332_v17, %v3851_v49  ;;  %v5257_v14 = vpop.permute.xlu2 %5256  ;;  %v4994_v33 = vpop.permute.xlu1 %4993 }
 0x464   : > { %6630 = vst.msk [vmem:[%s8232_s26 + $0x4c8] sm:$0xff] %vm4541_vm2, %v5257_v14  ;;  %v5253_v21 = vpop.permute.xlu0 %5252  ;;  %v4335_v47 = vpop.f32.mrf.mxu0 }
 0x465   : > { %v4458_v18 = vadd.f32 %v4402_v29, %v8123_v23  ;;  %6563 = vst.msk [vmem:[%s8232_s26 + $0x490] sm:$0xff] %vm4541_vm2, %v4994_v33 }
 0x466   : > { %6628 = vst.msk [vmem:[%s8232_s26 + $0x4a8] sm:$0xff] %vm4541_vm2, %v5253_v21  ;;  %v2934_v62 = vpop.f32.mrf.mxu2  ;;  %v3287_v45 = vpop.f32.mrf.mxu3 }
 0x467   : > { %v4526_v36 = vadd.f32 %v9035_v55, %v4458_v18  ;;  %v3288_v6 = vadd.f32 %v3287_v45, %v2934_v62 }
 0x469   : > { %4591 = vst.msk [vmem:[%s8232_s26 + $0x610] sm:$0xff] %vm4541_vm2, %v4526_v36  ;;  %v3852_v32 = vadd.f32 %v3784_v5, %v3288_v6  ;;  %5280 = vrot.lane.b32.xlu2 %v4525_v63, %s6722_s15  ;;  %5023 = vrot.lane.b32.xlu1 %v4525_v63, %s6723_s27 }
 0x46a   : > { %5282 = vrot.lane.b32.xlu0 %v4526_v36, %s6722_s15  ;;  %v3787_v23 = vpop.f32.mrf.mxu1 }
 0x46b   : > { %v4403_v38 = vadd.f32 %v4335_v47, %v3852_v32  ;;  %v5002_v2 = vpop.permute.xlu2 %5001  ;;  %v4739_v25 = vpop.permute.xlu1 %4738 }
 0x46c   : > { %6567 = vst.msk [vmem:[%s8232_s26 + $0x4d0] sm:$0xff] %vm4541_vm2, %v5002_v2  ;;  %v4998_v9 = vpop.permute.xlu0 %4997  ;;  %v4338_v7 = vpop.f32.mrf.mxu0 }
 0x46d   : > { %v4459_v31 = vadd.f32 %v4403_v38, %v8137_v1  ;;  %6500 = vst.msk [vmem:[%s8232_s26 + $0x428] sm:$0xff] %vm4541_vm2, %v4739_v25 }
 0x46e   : > { %6565 = vst.msk [vmem:[%s8232_s26 + $0x4b0] sm:$0xff] %vm4541_vm2, %v4998_v9  ;;  %v2937_v48 = vpop.f32.mrf.mxu2  ;;  %v3290_v46 = vpop.f32.mrf.mxu3 }
 0x46f   : > { %v4527_v20 = vadd.f32 %v9035_v55, %v4459_v31  ;;  %v3291_v34 = vadd.f32 %v3290_v46, %v2937_v48 }
 0x471   : > { %4592 = vst.msk [vmem:[%s8232_s26 + $0x620] sm:$0xff] %vm4541_vm2, %v4527_v20  ;;  %v3853_v27 = vadd.f32 %v3787_v23, %v3291_v34  ;;  %5025 = vrot.lane.b32.xlu2 %v4526_v36, %s6723_s27  ;;  %4768 = vrot.lane.b32.xlu1 %v4526_v36, %s6724_s28 }
 0x472   : > { %5027 = vrot.lane.b32.xlu0 %v4527_v20, %s6723_s27  ;;  %v3790_v1 = vpop.f32.mrf.mxu1 }
 0x473   : > { %v4404_v43 = vadd.f32 %v4338_v7, %v3853_v27  ;;  %v4747_v30 = vpop.permute.xlu2 %4746  ;;  %v5255_v16 = vpop.permute.xlu1 %5254 }
 0x474   : > { %6504 = vst.msk [vmem:[%s8232_s26 + $0x468] sm:$0xff] %vm4541_vm2, %v4747_v30  ;;  %v4743_v44 = vpop.permute.xlu0 %4742  ;;  %v4341_v24 = vpop.f32.mrf.mxu0 }
 0x475   : > { %v4460_v58 = vadd.f32 %v4404_v43, %v8151_v53  ;;  %6629 = vst.msk [vmem:[%s8232_s26 + $0x4b8] sm:$0xff] %vm4541_vm2, %v5255_v16 }
 0x476   : > { %6502 = vst.msk [vmem:[%s8232_s26 + $0x448] sm:$0xff] %vm4541_vm2, %v4743_v44  ;;  %v2940_v51 = vpop.f32.mrf.mxu2  ;;  %v3293_v28 = vpop.f32.mrf.mxu3 }
 0x477   : > { %v4528_v61 = vadd.f32 %v9035_v55, %v4460_v58  ;;  %v3294_v4 = vadd.f32 %v3293_v28, %v2940_v51 }
 0x479   : > { %4593 = vst.msk [vmem:[%s8232_s26 + $0x630] sm:$0xff] %vm4541_vm2, %v4528_v61  ;;  %v3854_v52 = vadd.f32 %v3790_v1, %v3294_v4  ;;  %4770 = vrot.lane.b32.xlu2 %v4527_v20, %s6724_s28  ;;  %5284 = vrot.lane.b32.xlu1 %v4527_v20, %s6722_s15 }
 0x47a   : > { %4772 = vrot.lane.b32.xlu0 %v4528_v61, %s6724_s28  ;;  %v3793_v53 = vpop.f32.mrf.mxu1 }
 0x47b   : > { %v4405_v50 = vadd.f32 %v4341_v24, %v3854_v52  ;;  %v5263_v41 = vpop.permute.xlu2 %5262  ;;  %v5000_v3 = vpop.permute.xlu1 %4999 }
 0x47c   : > { %6633 = vst.msk [vmem:[%s8232_s26 + $0x4f8] sm:$0xff] %vm4541_vm2, %v5263_v41  ;;  %v5259_v15 = vpop.permute.xlu0 %5258  ;;  %v4344_v22 = vpop.f32.mrf.mxu0 }
 0x47d   : > { %v4461_v59 = vadd.f32 %v4405_v50, %v8165_v12  ;;  %6566 = vst.msk [vmem:[%s8232_s26 + $0x4c0] sm:$0xff] %vm4541_vm2, %v5000_v3 }
 0x47e   : > { %6631 = vst.msk [vmem:[%s8232_s26 + $0x4d8] sm:$0xff] %vm4541_vm2, %v5259_v15  ;;  %v2943_v37 = vpop.f32.mrf.mxu2  ;;  %v3296_v13 = vpop.f32.mrf.mxu3 }
 0x47f   : > { %v4529_v26 = vadd.f32 %v9035_v55, %v4461_v59  ;;  %v3297_v8 = vadd.f32 %v3296_v13, %v2943_v37 }
 0x481   : > { %4594 = vst.msk [vmem:[%s8232_s26 + $0x640] sm:$0xff] %vm4541_vm2, %v4529_v26  ;;  %v3855_v57 = vadd.f32 %v3793_v53, %v3297_v8  ;;  %5286 = vrot.lane.b32.xlu2 %v4528_v61, %s6722_s15  ;;  %5029 = vrot.lane.b32.xlu1 %v4528_v61, %s6723_s27 }
 0x482   : > { %5288 = vrot.lane.b32.xlu0 %v4529_v26, %s6722_s15  ;;  %v3796_v12 = vpop.f32.mrf.mxu1 }
 0x483   : > { %v4406_v54 = vadd.f32 %v4344_v22, %v3855_v57  ;;  %v5008_v17 = vpop.permute.xlu2 %5007  ;;  %v4745_v19 = vpop.permute.xlu1 %4744 }
 0x484   : > { %6570 = vst.msk [vmem:[%s8232_s26 + $0x580] sm:$0xff] %vm4541_vm2, %v5008_v17  ;;  %v5004_v40 = vpop.permute.xlu0 %5003  ;;  %v4347_v63 = vpop.f32.mrf.mxu0 }
 0x485   : > { %v4462_v0 = vadd.f32 %v4406_v54, %v8179_v11  ;;  %6503 = vst.msk [vmem:[%s8232_s26 + $0x458] sm:$0xff] %vm4541_vm2, %v4745_v19 }
 0x486   : > { %6568 = vst.msk [vmem:[%s8232_s26 + $0x4e0] sm:$0xff] %vm4541_vm2, %v5004_v40  ;;  %v2946_v10 = vpop.f32.mrf.mxu2  ;;  %v3299_v49 = vpop.f32.mrf.mxu3 }
 0x487   : > { %v4530_v5 = vadd.f32 %v9035_v55, %v4462_v0  ;;  %v3300_v29 = vadd.f32 %v3299_v49, %v2946_v10 }
 0x489   : > { %4595 = vst.msk [vmem:[%s8232_s26 + $0x650] sm:$0xff] %vm4541_vm2, %v4530_v5  ;;  %v3856_v14 = vadd.f32 %v3796_v12, %v3300_v29  ;;  %5031 = vrot.lane.b32.xlu2 %v4529_v26, %s6723_s27  ;;  %4774 = vrot.lane.b32.xlu1 %v4529_v26, %s6724_s28 }
 0x48a   : > { %5033 = vrot.lane.b32.xlu0 %v4530_v5, %s6723_s27  ;;  %v3799_v62 = vpop.f32.mrf.mxu1 }
 0x48b   : > { %v4407_v11 = vadd.f32 %v4347_v63, %v3856_v14  ;;  %v4753_v33 = vpop.permute.xlu2 %4752  ;;  %v5261_v21 = vpop.permute.xlu1 %5260 }
 0x48c   : > { %6507 = vst.msk [vmem:[%s8232_s26 + $0x518] sm:$0xff] %vm4541_vm2, %v4753_v33  ;;  %v4749_v47 = vpop.permute.xlu0 %4748  ;;  %v4350_v23 = vpop.f32.mrf.mxu0 }
 0x48d   : > { %v4463_v18 = vadd.f32 %v4407_v11, %v8193_v60  ;;  %6632 = vst.msk [vmem:[%s8232_s26 + $0x4e8] sm:$0xff] %vm4541_vm2, %v5261_v21 }
 0x48e   : > { %6505 = vst.msk [vmem:[%s8232_s26 + $0x478] sm:$0xff] %vm4541_vm2, %v4749_v47  ;;  %v2949_v45 = vpop.f32.mrf.mxu2  ;;  %v3302_v36 = vpop.f32.mrf.mxu3 }
 0x48f   : > { %v4531_v6 = vadd.f32 %v9035_v55, %v4463_v18  ;;  %v3303_v32 = vadd.f32 %v3302_v36, %v2949_v45 }
 0x491   : > { %4596 = vst.msk [vmem:[%s8232_s26 + $0x660] sm:$0xff] %vm4541_vm2, %v4531_v6  ;;  %v3857_v38 = vadd.f32 %v3799_v62, %v3303_v32  ;;  %4776 = vrot.lane.b32.xlu2 %v4530_v5, %s6724_s28  ;;  %5290 = vrot.lane.b32.xlu1 %v4530_v5, %s6722_s15 }
 0x492   : > { %4778 = vrot.lane.b32.xlu0 %v4531_v6, %s6724_s28 }
 0x493   : > { %v4408_v60 = vadd.f32 %v4350_v23, %v3857_v38  ;;  %v5269_v2 = vpop.permute.xlu2 %5268  ;;  %v5006_v25 = vpop.permute.xlu1 %5005 }
 0x494   : > { %6636 = vst.msk [vmem:[%s8232_s26 + $0x5a8] sm:$0xff] %vm4541_vm2, %v5269_v2  ;;  %v5265_v9 = vpop.permute.xlu0 %5264 }
 0x495   : > { %v4464_v7 = vadd.f32 %v4408_v60, %v8209_v42  ;;  %6569 = vst.msk [vmem:[%s8232_s26 + $0x4f0] sm:$0xff] %vm4541_vm2, %v5006_v25 }
 0x496   : > { %6634 = vst.msk [vmem:[%s8232_s26 + $0x588] sm:$0xff] %vm4541_vm2, %v5265_v9 }
 0x497   : > { %v4532_v31 = vadd.f32 %v9035_v55, %v4464_v7 }
 0x499   : > { %4597 = vst.msk [vmem:[%s8232_s26 + $0x670] sm:$0xff] %vm4541_vm2, %v4532_v31  ;;  %5292 = vrot.lane.b32.xlu2 %v4531_v6, %s6722_s15  ;;  %5035 = vrot.lane.b32.xlu1 %v4531_v6, %s6723_s27 }
 0x49a   : > { %5294 = vrot.lane.b32.xlu0 %v4532_v31, %s6722_s15 }
 0x49b   : > { %v5014_v48 = vpop.permute.xlu2 %5013  ;;  %v4751_v46 = vpop.permute.xlu1 %4750 }
 0x49c   : > { %6573 = vst.msk [vmem:[%s8232_s26 + $0x5b0] sm:$0xff] %vm4541_vm2, %v5014_v48  ;;  %v5010_v42 = vpop.permute.xlu0 %5009 }
 0x49d   : > { %6506 = vst.msk [vmem:[%s8232_s26 + $0x508] sm:$0xff] %vm4541_vm2, %v4751_v46 }
 0x49e   : > { %6571 = vst.msk [vmem:[%s8232_s26 + $0x590] sm:$0xff] %vm4541_vm2, %v5010_v42 }
 0x4a1   : > { %5037 = vrot.lane.b32.xlu2 %v4532_v31, %s6723_s27  ;;  %4780 = vrot.lane.b32.xlu1 %v4532_v31, %s6724_s28 }
 0x4a2   : > { %5306 = vrot.lane.b32.xlu0 %v8322_v35, %s6722_s15 }
 0x4a3   : > { %v4759_v55 = vpop.permute.xlu2 %4758  ;;  %v5267_v20 = vpop.permute.xlu1 %5266 }
 0x4a4   : > { %6510 = vst.msk [vmem:[%s8232_s26 + $0x548] sm:$0xff] %vm4541_vm2, %v4759_v55  ;;  %v4755_v34 = vpop.permute.xlu0 %4754 }
 0x4a5   : > { %6635 = vst.msk [vmem:[%s8232_s26 + $0x598] sm:$0xff] %vm4541_vm2, %v5267_v20 }
 0x4a6   : > { %6508 = vst.msk [vmem:[%s8232_s26 + $0x528] sm:$0xff] %vm4541_vm2, %v4755_v34 }
 0x4a9   : > { %5310 = vrot.lane.b32.xlu2 %v8361_v56, %s6722_s15  ;;  %5308 = vrot.lane.b32.xlu1 %v8342_v39, %s6722_s15 }
 0x4ab   : > { %v5275_v35 = vpop.permute.xlu2 %5274  ;;  %v5012_v27 = vpop.permute.xlu1 %5011 }
 0x4ac   : > { %6639 = vst.msk [vmem:[%s8232_s26 + $0x5d8] sm:$0xff] %vm4541_vm2, %v5275_v35  ;;  %v5271_v1 = vpop.permute.xlu0 %5270 }
 0x4ad   : > { %6572 = vst.msk [vmem:[%s8232_s26 + $0x5a0] sm:$0xff] %vm4541_vm2, %v5012_v27 }
 0x4ae   : > { %6637 = vst.msk [vmem:[%s8232_s26 + $0x5b8] sm:$0xff] %vm4541_vm2, %v5271_v1 }
 0x4b3   : > { %v5020_v43 = vpop.permute.xlu2 %5019  ;;  %v4757_v30 = vpop.permute.xlu1 %4756 }
 0x4b4   : > { %6576 = vst.msk [vmem:[%s8232_s26 + $0x5e0] sm:$0xff] %vm4541_vm2, %v5020_v43  ;;  %v5016_v56 = vpop.permute.xlu0 %5015 }
 0x4b5   : > { %6509 = vst.msk [vmem:[%s8232_s26 + $0x538] sm:$0xff] %vm4541_vm2, %v4757_v30 }
 0x4b6   : > { %6574 = vst.msk [vmem:[%s8232_s26 + $0x5c0] sm:$0xff] %vm4541_vm2, %v5016_v56 }
 0x4bb   : > { %v4765_v39 = vpop.permute.xlu2 %4764  ;;  %v5273_v16 = vpop.permute.xlu1 %5272 }
 0x4bc   : > { %6513 = vst.msk [vmem:[%s8232_s26 + $0x578] sm:$0xff] %vm4541_vm2, %v4765_v39  ;;  %v4761_v44 = vpop.permute.xlu0 %4760 }
 0x4bd   : > { %6638 = vst.msk [vmem:[%s8232_s26 + $0x5c8] sm:$0xff] %vm4541_vm2, %v5273_v16 }
 0x4be   : > { %6511 = vst.msk [vmem:[%s8232_s26 + $0x558] sm:$0xff] %vm4541_vm2, %v4761_v44 }
 0x4c3   : > { %v5281_v24 = vpop.permute.xlu2 %5280  ;;  %v5018_v58 = vpop.permute.xlu1 %5017 }
 0x4c4   : > { %6642 = vst.msk [vmem:[%s8232_s26 + $0x688] sm:$0xff] %vm4541_vm2, %v5281_v24  ;;  %v5277_v51 = vpop.permute.xlu0 %5276 }
 0x4c5   : > { %6575 = vst.msk [vmem:[%s8232_s26 + $0x5d0] sm:$0xff] %vm4541_vm2, %v5018_v58 }
 0x4c6   : > { %6640 = vst.msk [vmem:[%s8232_s26 + $0x5e8] sm:$0xff] %vm4541_vm2, %v5277_v51 }
 0x4cb   : > { %v5026_v28 = vpop.permute.xlu2 %5025  ;;  %v4763_v61 = vpop.permute.xlu1 %4762 }
 0x4cc   : > { %6579 = vst.msk [vmem:[%s8232_s26 + $0x690] sm:$0xff] %vm4541_vm2, %v5026_v28  ;;  %v5022_v4 = vpop.permute.xlu0 %5021 }
 0x4cd   : > { %6512 = vst.msk [vmem:[%s8232_s26 + $0x568] sm:$0xff] %vm4541_vm2, %v4763_v61 }
 0x4ce   : > { %6577 = vst.msk [vmem:[%s8232_s26 + $0x5f0] sm:$0xff] %vm4541_vm2, %v5022_v4 }
 0x4d3   : > { %v4771_v52 = vpop.permute.xlu2 %4770  ;;  %v5279_v53 = vpop.permute.xlu1 %5278 }
 0x4d4   : > { %6516 = vst.msk [vmem:[%s8232_s26 + $0x628] sm:$0xff] %vm4541_vm2, %v4771_v52  ;;  %v4767_v50 = vpop.permute.xlu0 %4766 }
 0x4d5   : > { %6641 = vst.msk [vmem:[%s8232_s26 + $0x5f8] sm:$0xff] %vm4541_vm2, %v5279_v53 }
 0x4d6   : > { %6514 = vst.msk [vmem:[%s8232_s26 + $0x608] sm:$0xff] %vm4541_vm2, %v4767_v50 }
 0x4db   : > { %v5287_v41 = vpop.permute.xlu2 %5286  ;;  %v5024_v3 = vpop.permute.xlu1 %5023 }
 0x4dc   : > { %6645 = vst.msk [vmem:[%s8232_s26 + $0x6b8] sm:$0xff] %vm4541_vm2, %v5287_v41  ;;  %v5283_v15 = vpop.permute.xlu0 %5282 }
 0x4dd   : > { %6578 = vst.msk [vmem:[%s8232_s26 + $0x680] sm:$0xff] %vm4541_vm2, %v5024_v3 }
 0x4de   : > { %6643 = vst.msk [vmem:[%s8232_s26 + $0x698] sm:$0xff] %vm4541_vm2, %v5283_v15 }
 0x4e3   : > { %v5032_v22 = vpop.permute.xlu2 %5031  ;;  %v4769_v59 = vpop.permute.xlu1 %4768 }
 0x4e4   : > { %6582 = vst.msk [vmem:[%s8232_s26 + $0x6c0] sm:$0xff] %vm4541_vm2, %v5032_v22  ;;  %v5028_v37 = vpop.permute.xlu0 %5027 }
 0x4e5   : > { %6515 = vst.msk [vmem:[%s8232_s26 + $0x618] sm:$0xff] %vm4541_vm2, %v4769_v59 }
 0x4e6   : > { %6580 = vst.msk [vmem:[%s8232_s26 + $0x6a0] sm:$0xff] %vm4541_vm2, %v5028_v37 }
 0x4eb   : > { %v4777_v13 = vpop.permute.xlu2 %4776  ;;  %v5285_v26 = vpop.permute.xlu1 %5284 }
 0x4ec   : > { %6519 = vst.msk [vmem:[%s8232_s26 + $0x658] sm:$0xff] %vm4541_vm2, %v4777_v13  ;;  %v4773_v8 = vpop.permute.xlu0 %4772 }
 0x4ed   : > { %6644 = vst.msk [vmem:[%s8232_s26 + $0x6a8] sm:$0xff] %vm4541_vm2, %v5285_v26 }
 0x4ee   : > { %6517 = vst.msk [vmem:[%s8232_s26 + $0x638] sm:$0xff] %vm4541_vm2, %v4773_v8 }
 0x4f3   : > { %v5293_v57 = vpop.permute.xlu2 %5292  ;;  %v5030_v12 = vpop.permute.xlu1 %5029 }
 0x4f4   : > { %6648 = vst.msk [vmem:[%s8232_s26 + $0x6e8] sm:$0xff] %vm4541_vm2, %v5293_v57  ;;  %v5289_v54 = vpop.permute.xlu0 %5288 }
 0x4f5   : > { %6581 = vst.msk [vmem:[%s8232_s26 + $0x6b0] sm:$0xff] %vm4541_vm2, %v5030_v12 }
 0x4f6   : > { %6646 = vst.msk [vmem:[%s8232_s26 + $0x6c8] sm:$0xff] %vm4541_vm2, %v5289_v54 }
 0x4fb   : > { %v5038_v17 = vpop.permute.xlu2 %5037  ;;  %v4775_v19 = vpop.permute.xlu1 %4774 }
 0x4fc   : > { %6585 = vst.msk [vmem:[%s8232_s26 + $0x6f0] sm:$0xff] %vm4541_vm2, %v5038_v17  ;;  %v5034_v40 = vpop.permute.xlu0 %5033 }
 0x4fd   : > { %6518 = vst.msk [vmem:[%s8232_s26 + $0x648] sm:$0xff] %vm4541_vm2, %v4775_v19 }
 0x4fe   : > { %6583 = vst.msk [vmem:[%s8232_s26 + $0x6d0] sm:$0xff] %vm4541_vm2, %v5034_v40 }
 0x503   : > { %v5311_v0 = vpop.permute.xlu2 %5310  ;;  %v5291_v63 = vpop.permute.xlu1 %5290 }
 0x504   : > { %6657 = vst.msk [vmem:[%s8232_s26 + $0x7f8] sm:$0xff] %vm4541_vm2, %v5311_v0  ;;  %v4779_v10 = vpop.permute.xlu0 %4778 }
 0x505   : > { %6647 = vst.msk [vmem:[%s8232_s26 + $0x6d8] sm:$0xff] %vm4541_vm2, %v5291_v63 }
 0x506   : > { %6520 = vst.msk [vmem:[%s8232_s26 + $0x668] sm:$0xff] %vm4541_vm2, %v4779_v10 }
 0x50b   : > { %v5036_v49 = vpop.permute.xlu1 %5035 }
 0x50c   : > { %6584 = vst.msk [vmem:[%s8232_s26 + $0x6e0] sm:$0xff] %vm4541_vm2, %v5036_v49  ;;  %v5295_v5 = vpop.permute.xlu0 %5294 }
 0x50d   : > { %6649 = vst.msk [vmem:[%s8232_s26 + $0x6f8] sm:$0xff] %vm4541_vm2, %v5295_v5 }
 0x513   : > { %v4781_v29 = vpop.permute.xlu1 %4780 }
 0x514   : > { %6521 = vst.msk [vmem:[%s8232_s26 + $0x678] sm:$0xff] %vm4541_vm2, %v4781_v29  ;;  %v5307_v14 = vpop.permute.xlu0 %5306 }
 0x515   : > { %6655 = vst.msk [vmem:[%s8232_s26 + $0x7d8] sm:$0xff] %vm4541_vm2, %v5307_v14 }
 0x51b   : > { %v5309_v11 = vpop.permute.xlu1 %5308 }
 0x51c   : > { %6656 = vst.msk [vmem:[%s8232_s26 + $0x7e8] sm:$0xff] %vm4541_vm2, %v5309_v11 }
 0x51d PF: > { %s14_s17 = sadd.s32 1, %s6720_s17   ;;  %s9500_s15 = smov %s6716_s16 }
 0x51e   : > { %p11_p5 = scmp.ge.s32.totalorder %s14_s17, 4   ;;  %s9501_s16 = smov %s9503_s18 }
 0x520   :  { %13 = sbr.rel (!%p11_p5) target bundleno = 2 (0x2), region = 83 }

</bundles_post_ra>
